<compile_context>
chip_gen: v7x
topology: tpu7x:2x2x1
jax: 0.10.0
libtpu: 0.0.40
codegen_flags: <defaults>
</compile_context>

<pallas_src>
import functools

import numpy as np
import jax
import jax.numpy as jnp
from jax.experimental import pallas as pl
from jax.experimental.pallas import tpu as pltpu

# ----------------------------- small synthetic config -----------------------------
B = 2             # batch
IN_CHANS = 3      # RGB, as the timm model expects
IMG = 64          # image size (real model: 384)
PATCH = 16        # patch size (same as deit3_small_patch16)
EMBED_DIM = 256   # real model: 384  (kept a lane multiple of 128)
DEPTH = 2         # real model: 12
NUM_HEADS = 2     # head_dim = 128 -> per-head slices land on lane boundaries
HEAD_DIM = EMBED_DIM // NUM_HEADS
MLP_DIM = 4 * EMBED_DIM
OUT_DIM = 128     # real module default: 256 (AdaptiveAvgPool1d target); lane-dense
N_PATCHES = (IMG // PATCH) ** 2          # 16
NUM_TOKENS = N_PATCHES + 1               # 17 (+ cls token)
T_PAD = 24                               # tokens padded to a sublane multiple of 8
PATCH_DIM = IN_CHANS * PATCH * PATCH     # 768
LN_EPS = 1e-6


# --------------------------------- kernel helpers ----------------------------------
def _layernorm(x, gamma, beta):
    mu = jnp.mean(x, axis=-1, keepdims=True)
    var = jnp.mean(jnp.square(x - mu), axis=-1, keepdims=True)
    return (x - mu) * jax.lax.rsqrt(var + LN_EPS) * gamma + beta


# ----------------------------------- fused kernel ----------------------------------
def _encoder_kernel(patches_ref, w_pe_ref, b_pe_ref, cls_ref, pos_ref,
                    g1_ref, b1_ref, wqkv_ref, bqkv_ref, wo_ref, bo_ref, ls1_ref,
                    g2_ref, b2_ref, w1_ref, bm1_ref, w2_ref, bm2_ref, ls2_ref,
                    gf_ref, bf_ref, pool_ref,
                    o_ref, x_sc,
                    *, num_heads, num_tokens):
    d = pl.program_id(1)
    depth = pl.num_programs(1)
    T, D = x_sc.shape
    hd = D // num_heads
    scale = float(hd) ** -0.5

    # ---- first depth step: patch embedding + cls token + positional embedding ----
    @pl.when(d == 0)
    def _():
        emb = jnp.dot(patches_ref[...].astype(jnp.bfloat16), w_pe_ref[...],
                      preferred_element_type=jnp.float32) + b_pe_ref[...]   # [T, D]
        rows = jax.lax.broadcasted_iota(jnp.int32, (T, 1), 0)
        # row 0 = cls token, rows 1..num_tokens-1 = patch tokens, rest = zero padding
        x0 = jnp.where(rows == 0, cls_ref[...],
                       jnp.where(rows < num_tokens, emb, 0.0))
        x_sc[...] = x0 + pos_ref[...]

    x = x_sc[...]                                                    # [T, D] f32

    # key-padding mask: padded token columns must never be attended to.
    kmask = jax.lax.broadcasted_iota(jnp.int32, (1, T), 1) < num_tokens   # [1, T]

    # --------------------------------- attention ---------------------------------
    h = _layernorm(x, g1_ref[...], b1_ref[...])
    qkv = jnp.dot(h.astype(jnp.bfloat16), wqkv_ref[...],
                  preferred_element_type=jnp.float32) + bqkv_ref[...]      # [T, 3D]
    heads = []
    for hh in range(num_heads):                    # tiny static unroll; slices are
        qh = qkv[:, hh * hd:(hh + 1) * hd].astype(jnp.bfloat16)            # lane-aligned
        kh = qkv[:, D + hh * hd:D + (hh + 1) * hd].astype(jnp.bfloat16)
        vh = qkv[:, 2 * D + hh * hd:2 * D + (hh + 1) * hd].astype(jnp.bfloat16)
        s = jax.lax.dot_general(qh, kh, (((1,), (1,)), ((), ())),          # q @ k^T
                                preferred_element_type=jnp.float32) * scale
        s = jnp.where(kmask, s, -1e30)
        s = s - jnp.max(s, axis=-1, keepdims=True)
        p = jnp.exp(s)
        p = p * pl.reciprocal(jnp.sum(p, axis=-1, keepdims=True), approx=True)
        heads.append(jnp.dot(p.astype(jnp.bfloat16), vh,
                             preferred_element_type=jnp.float32))          # [T, hd]
    attn = jnp.dot(jnp.concatenate(heads, axis=-1).astype(jnp.bfloat16),   # concat-heads @ Wo
                   wo_ref[...], preferred_element_type=jnp.float32) + bo_ref[...]
    x = x + ls1_ref[...] * attn

    # ------------------------------------ MLP ------------------------------------
    h = _layernorm(x, g2_ref[...], b2_ref[...])
    h = jnp.dot(h.astype(jnp.bfloat16), w1_ref[...],
                preferred_element_type=jnp.float32) + bm1_ref[...]
    # TODO(synk): timm/PyTorch nn.GELU defaults to exact erf GELU; tanh approx used here.
    h = jax.nn.gelu(h, approximate=True)
    h = jnp.dot(h.astype(jnp.bfloat16), w2_ref[...],
                preferred_element_type=jnp.float32) + bm2_ref[...]
    x = x + ls2_ref[...] * h
    x_sc[...] = x

    # ---- last depth step: final LayerNorm + AdaptiveAvgPool1d (exact pooling matmul) ----
    @pl.when(d == depth - 1)
    def _():
        tok = _layernorm(x, gf_ref[...], bf_ref[...])                      # [T, D]
        o_ref[0, :, :] = jnp.dot(tok, pool_ref[...],
                                 preferred_element_type=jnp.float32).astype(o_ref.dtype)


# -------------------------------- parameters / glue --------------------------------
def adaptive_avgpool1d_matrix(length, out_dim):
    """Exact nn.AdaptiveAvgPool1d(out_dim) as a [length, out_dim] matmul weight."""
    m = np.zeros((length, out_dim), np.float32)
    for i in range(out_dim):
        s = (i * length) // out_dim
        e = -((-(i + 1) * length) // out_dim)  # ceil
        m[s:e, i] = 1.0 / (e - s)
    return jnp.asarray(m)


def init_params(key):
    keys = jax.random.split(key, 16)
    it = iter(keys)

    def nrm(shape, dtype=jnp.float32, scale=0.02):
        return (scale * jax.random.normal(next(it), shape, jnp.float32)).astype(dtype)

    D, MLP, T = EMBED_DIM, MLP_DIM, T_PAD

    pos = jnp.zeros((T, D), jnp.float32).at[:NUM_TOKENS].set(
        0.02 * jax.random.normal(next(it), (NUM_TOKENS, D), jnp.float32))

    return dict(
        w_pe=nrm((PATCH_DIM, D), jnp.bfloat16),
        b_pe=jnp.zeros((1, D), jnp.float32),
        cls=nrm((1, D)),
        pos=pos,
        gf=jnp.ones((1, D), jnp.float32),
        bf=jnp.zeros((1, D), jnp.float32),
        pool=adaptive_avgpool1d_matrix(D, OUT_DIM),
        # per-block params stacked along DEPTH so one grid step streams one block.
        g1=jnp.ones((DEPTH, 1, D), jnp.float32),
        b1=jnp.zeros((DEPTH, 1, D), jnp.float32),
        wqkv=nrm((DEPTH, D, 3 * D), jnp.bfloat16),
        bqkv=jnp.zeros((DEPTH, 1, 3 * D), jnp.float32),
        wo=nrm((DEPTH, D, D), jnp.bfloat16),
        bo=jnp.zeros((DEPTH, 1, D), jnp.float32),
        ls1=jnp.full((DEPTH, 1, D), 0.1, jnp.float32),
        g2=jnp.ones((DEPTH, 1, D), jnp.float32),
        b2=jnp.zeros((DEPTH, 1, D), jnp.float32),
        w1=nrm((DEPTH, D, MLP), jnp.bfloat16),
        bm1=jnp.zeros((DEPTH, 1, MLP), jnp.float32),
        w2=nrm((DEPTH, MLP, D), jnp.bfloat16),
        bm2=jnp.zeros((DEPTH, 1, D), jnp.float32),
        ls2=jnp.full((DEPTH, 1, D), 0.1, jnp.float32),
    )


def encoder_forward(x, params):
    """x: NCHW [B, C, H, W] float32 -> [B, N_PATCHES, OUT_DIM]."""
    b, c, h, w = x.shape
    nh, nw = h // PATCH, w // PATCH
    n = nh * nw

    # glue: NCHW -> per-patch vectors in (c, ph, pw) flatten order (== Conv2d patch
    # embed), padded to T_PAD token rows (row 0 = cls slot, rows >= 1+n = padding).
    patches = x.reshape(b, c, nh, PATCH, nw, PATCH)
    patches = patches.transpose(0, 2, 4, 1, 3, 5).reshape(b, n, c * PATCH * PATCH)
    patches = jnp.pad(patches, ((0, 0), (1, T_PAD - 1 - n), (0, 0)))
    patches = patches.reshape(b * T_PAD, c * PATCH * PATCH)   # [B*T_PAD, PATCH_DIM]

    def const_spec(arr):                                  # resident, fetched once
        nd = arr.ndim
        return pl.BlockSpec(arr.shape, lambda bb, dd, _nd=nd: (0,) * _nd)

    def depth_spec(arr):                                  # stream block d's weights
        nd = arr.ndim
        return pl.BlockSpec((None,) + tuple(arr.shape[1:]),
                            lambda bb, dd, _nd=nd: (dd,) + (0,) * (_nd - 1))

    head_names = ('w_pe', 'b_pe', 'cls', 'pos')
    blk_names = ('g1', 'b1', 'wqkv', 'bqkv', 'wo', 'bo', 'ls1',
                 'g2', 'b2', 'w1', 'bm1', 'w2', 'bm2', 'ls2')
    tail_names = ('gf', 'bf', 'pool')

    args = ([patches] + [params[k] for k in head_names]
            + [params[k] for k in blk_names] + [params[k] for k in tail_names])
    in_specs = ([pl.BlockSpec((T_PAD, PATCH_DIM), lambda bb, dd: (bb, 0))]
                + [const_spec(params[k]) for k in head_names]
                + [depth_spec(params[k]) for k in blk_names]
                + [const_spec(params[k]) for k in tail_names])

    kernel = functools.partial(_encoder_kernel, num_heads=NUM_HEADS,
                               num_tokens=NUM_TOKENS)

    out = pl.pallas_call(
        kernel,
        grid=(b, DEPTH),
        in_specs=in_specs,
        out_specs=pl.BlockSpec((1, T_PAD, OUT_DIM), lambda bb, dd: (bb, 0, 0)),
        out_shape=jax.ShapeDtypeStruct((b, T_PAD, OUT_DIM), jnp.float32),
        scratch_shapes=[pltpu.VMEM((T_PAD, EMBED_DIM), jnp.float32)],
        compiler_params=pltpu.CompilerParams(
            dimension_semantics=("parallel", "arbitrary")),
    )(*args)

    # glue: AdaptiveAvgPool1d result for features[:, 1:] -> drop cls + padding rows.
    return out[:, 1:1 + n, :]


# --------------------------------------- main ---------------------------------------
if __name__ == "__main__":
    key = jax.random.PRNGKey(0)
    k_x, k_p = jax.random.split(key)
    x = jax.random.normal(k_x, (B, IN_CHANS, IMG, IMG), jnp.float32)
    params = init_params(k_p)

    out = jax.jit(encoder_forward)(x, params)
    out = jax.block_until_ready(out)

    assert out.shape == (B, N_PATCHES, OUT_DIM), out.shape
    assert bool(jnp.all(jnp.isfinite(out)))
    print("KERNEL_OK")
</pallas_src>

<mosaic_0001>
module attributes {stable_mosaic.version = 11 : i64} {
  func.func @_encoder_kernel(%arg0: i32, %arg1: i32, %arg2: memref<24x768xf32, #tpu.memory_space<vmem>>, %arg3: memref<768x256xbf16, #tpu.memory_space<vmem>>, %arg4: memref<1x256xf32, #tpu.memory_space<vmem>>, %arg5: memref<1x256xf32, #tpu.memory_space<vmem>>, %arg6: memref<24x256xf32, #tpu.memory_space<vmem>>, %arg7: memref<1x1x256xf32, #tpu.memory_space<vmem>>, %arg8: memref<1x1x256xf32, #tpu.memory_space<vmem>>, %arg9: memref<1x256x768xbf16, #tpu.memory_space<vmem>>, %arg10: memref<1x1x768xf32, #tpu.memory_space<vmem>>, %arg11: memref<1x256x256xbf16, #tpu.memory_space<vmem>>, %arg12: memref<1x1x256xf32, #tpu.memory_space<vmem>>, %arg13: memref<1x1x256xf32, #tpu.memory_space<vmem>>, %arg14: memref<1x1x256xf32, #tpu.memory_space<vmem>>, %arg15: memref<1x1x256xf32, #tpu.memory_space<vmem>>, %arg16: memref<1x256x1024xbf16, #tpu.memory_space<vmem>>, %arg17: memref<1x1x1024xf32, #tpu.memory_space<vmem>>, %arg18: memref<1x1024x256xbf16, #tpu.memory_space<vmem>>, %arg19: memref<1x1x256xf32, #tpu.memory_space<vmem>>, %arg20: memref<1x1x256xf32, #tpu.memory_space<vmem>>, %arg21: memref<1x256xf32, #tpu.memory_space<vmem>>, %arg22: memref<1x256xf32, #tpu.memory_space<vmem>>, %arg23: memref<256x128xf32, #tpu.memory_space<vmem>>, %arg24: memref<1x24x128xf32, #tpu.memory_space<vmem>>, %arg25: memref<24x256xf32, #tpu.memory_space<vmem>>) attributes {dimension_semantics = [#tpu.dimension_semantics<parallel>, #tpu.dimension_semantics<arbitrary>], iteration_bounds = array<i64: 2, 2>, scalar_prefetch = 0 : i64, scratch_operands = 1 : i64, tpu.core_type = #tpu.core_type<tc>, window_params = [{transform_indices = @transform_0, window_bounds = array<i64: 24, 768>}, {pipeline_mode = #tpu.pipeline_mode<synchronous>, transform_indices = @transform_1, window_bounds = array<i64: 768, 256>}, {pipeline_mode = #tpu.pipeline_mode<synchronous>, transform_indices = @transform_2, window_bounds = array<i64: 1, 256>}, {pipeline_mode = #tpu.pipeline_mode<synchronous>, transform_indices = @transform_3, window_bounds = array<i64: 1, 256>}, {pipeline_mode = #tpu.pipeline_mode<synchronous>, transform_indices = @transform_4, window_bounds = array<i64: 24, 256>}, {transform_indices = @transform_5, window_bounds = array<i64: 1, 1, 256>}, {transform_indices = @transform_6, window_bounds = array<i64: 1, 1, 256>}, {transform_indices = @transform_7, window_bounds = array<i64: 1, 256, 768>}, {transform_indices = @transform_8, window_bounds = array<i64: 1, 1, 768>}, {transform_indices = @transform_9, window_bounds = array<i64: 1, 256, 256>}, {transform_indices = @transform_10, window_bounds = array<i64: 1, 1, 256>}, {transform_indices = @transform_11, window_bounds = array<i64: 1, 1, 256>}, {transform_indices = @transform_12, window_bounds = array<i64: 1, 1, 256>}, {transform_indices = @transform_13, window_bounds = array<i64: 1, 1, 256>}, {transform_indices = @transform_14, window_bounds = array<i64: 1, 256, 1024>}, {transform_indices = @transform_15, window_bounds = array<i64: 1, 1, 1024>}, {transform_indices = @transform_16, window_bounds = array<i64: 1, 1024, 256>}, {transform_indices = @transform_17, window_bounds = array<i64: 1, 1, 256>}, {transform_indices = @transform_18, window_bounds = array<i64: 1, 1, 256>}, {pipeline_mode = #tpu.pipeline_mode<synchronous>, transform_indices = @transform_19, window_bounds = array<i64: 1, 256>}, {pipeline_mode = #tpu.pipeline_mode<synchronous>, transform_indices = @transform_20, window_bounds = array<i64: 1, 256>}, {pipeline_mode = #tpu.pipeline_mode<synchronous>, transform_indices = @transform_21, window_bounds = array<i64: 256, 128>}, {transform_indices = @transform_22, window_bounds = array<i64: 1, 24, 128>}]} {
    %c0_i32 = arith.constant 0 : i32
    %0 = arith.cmpi eq, %arg1, %c0_i32 : i32
    %1 = arith.extui %0 : i1 to i32
    %c0_i32_0 = arith.constant 0 : i32
    %2 = arith.cmpi ne, %1, %c0_i32_0 : i32
    scf.if %2 {
      %c0_76 = arith.constant 0 : index
      %c0_77 = arith.constant 0 : index
      %169 = vector.load %arg2[%c0_76, %c0_77] : memref<24x768xf32, #tpu.memory_space<vmem>>, vector<24x768xf32>
      %170 = arith.truncf %169 : vector<24x768xf32> to vector<24x768xbf16>
      %c0_78 = arith.constant 0 : index
      %c0_79 = arith.constant 0 : index
      %171 = vector.load %arg3[%c0_78, %c0_79] : memref<768x256xbf16, #tpu.memory_space<vmem>>, vector<768x256xbf16>
      %cst_80 = arith.constant dense<0.000000e+00> : vector<24x256xf32>
      %172 = tpu.matmul %170, %171, %cst_80 {dimension_numbers = #tpu.dot_dimension_numbers<[1], [0], [0], [1], [0, 0, 1, 1], [], []>} : vector<24x768xbf16>, vector<768x256xbf16>, vector<24x256xf32> -> vector<24x256xf32>
      %c0_81 = arith.constant 0 : index
      %c0_82 = arith.constant 0 : index
      %173 = vector.load %arg4[%c0_81, %c0_82] : memref<1x256xf32, #tpu.memory_space<vmem>>, vector<1x256xf32>
      %174 = vector.broadcast %173 : vector<1x256xf32> to vector<24x256xf32>
      %175 = arith.addf %172, %174 : vector<24x256xf32>
      %176 = tpu.iota {dimensions = array<i32: 0>} : vector<24x1xi32>
      %c0_i32_83 = arith.constant 0 : i32
      %177 = vector.broadcast %c0_i32_83 : i32 to vector<24x1xi32>
      %178 = arith.cmpi eq, %176, %177 : vector<24x1xi32>
      %c0_84 = arith.constant 0 : index
      %c0_85 = arith.constant 0 : index
      %179 = vector.load %arg5[%c0_84, %c0_85] : memref<1x256xf32, #tpu.memory_space<vmem>>, vector<1x256xf32>
      %c17_i32_86 = arith.constant 17 : i32
      %180 = vector.broadcast %c17_i32_86 : i32 to vector<24x1xi32>
      %181 = arith.cmpi slt, %176, %180 : vector<24x1xi32>
      %cst_87 = arith.constant 0.000000e+00 : f32
      %182 = vector.shape_cast %181 : vector<24x1xi1> to vector<24x1xi1>
      %183 = vector.broadcast %182 : vector<24x1xi1> to vector<24x256xi1>
      %184 = vector.broadcast %cst_87 : f32 to vector<24x256xf32>
      %185 = arith.select %183, %175, %184 : vector<24x256xi1>, vector<24x256xf32>
      %186 = vector.shape_cast %178 : vector<24x1xi1> to vector<24x1xi1>
      %187 = vector.broadcast %186 : vector<24x1xi1> to vector<24x256xi1>
      %188 = vector.shape_cast %179 : vector<1x256xf32> to vector<1x256xf32>
      %189 = vector.broadcast %188 : vector<1x256xf32> to vector<24x256xf32>
      %190 = arith.select %187, %189, %185 : vector<24x256xi1>, vector<24x256xf32>
      %c0_88 = arith.constant 0 : index
      %c0_89 = arith.constant 0 : index
      %191 = vector.load %arg6[%c0_88, %c0_89] : memref<24x256xf32, #tpu.memory_space<vmem>>, vector<24x256xf32>
      %192 = arith.addf %190, %191 : vector<24x256xf32>
      %c0_90 = arith.constant 0 : index
      %c0_91 = arith.constant 0 : index
      %193 = vector.load %arg25[%c0_90, %c0_91] : memref<24x256xf32, #tpu.memory_space<vmem>>, vector<24x256xf32>
      tpu.vector_store %arg25[%c0_90, %c0_91], %192 {strides = array<i32>} : memref<24x256xf32, #tpu.memory_space<vmem>>, vector<24x256xf32>,
    } else {
    }
    %c0 = arith.constant 0 : index
    %c0_1 = arith.constant 0 : index
    %3 = vector.load %arg25[%c0, %c0_1] : memref<24x256xf32, #tpu.memory_space<vmem>>, vector<24x256xf32>
    %4 = tpu.iota {dimensions = array<i32: 1>} : vector<1x24xi32>
    %c17_i32 = arith.constant 17 : i32
    %5 = vector.broadcast %c17_i32 : i32 to vector<1x24xi32>
    %6 = arith.cmpi slt, %4, %5 : vector<1x24xi32>
    %c0_2 = arith.constant 0 : index
    %c0_3 = arith.constant 0 : index
    %c0_4 = arith.constant 0 : index
    %7 = vector.load %arg7[%c0_2, %c0_3, %c0_4] : memref<1x1x256xf32, #tpu.memory_space<vmem>>, vector<1x1x256xf32>
    %8 = vector.shape_cast %7 : vector<1x1x256xf32> to vector<1x256xf32>
    %c0_5 = arith.constant 0 : index
    %c0_6 = arith.constant 0 : index
    %c0_7 = arith.constant 0 : index
    %9 = vector.load %arg8[%c0_5, %c0_6, %c0_7] : memref<1x1x256xf32, #tpu.memory_space<vmem>>, vector<1x1x256xf32>
    %10 = vector.shape_cast %9 : vector<1x1x256xf32> to vector<1x256xf32>
    %cst = arith.constant dense<0.000000e+00> : vector<24xf32>
    %11 = vector.multi_reduction <add>, %3, %cst [1] : vector<24x256xf32> to vector<24xf32>
    %12 = vector.shape_cast %11 : vector<24xf32> to vector<24x1xf32>
    %cst_8 = arith.constant 2.560000e+02 : f32
    %13 = vector.broadcast %cst_8 : f32 to vector<24x1xf32>
    %14 = arith.divf %12, %13 : vector<24x1xf32>
    %15 = vector.broadcast %14 : vector<24x1xf32> to vector<24x256xf32>
    %16 = arith.subf %3, %15 : vector<24x256xf32>
    %17 = arith.mulf %16, %16 : vector<24x256xf32>
    %cst_9 = arith.constant dense<0.000000e+00> : vector<24xf32>
    %18 = vector.multi_reduction <add>, %17, %cst_9 [1] : vector<24x256xf32> to vector<24xf32>
    %19 = vector.shape_cast %18 : vector<24xf32> to vector<24x1xf32>
    %cst_10 = arith.constant 2.560000e+02 : f32
    %20 = vector.broadcast %cst_10 : f32 to vector<24x1xf32>
    %21 = arith.divf %19, %20 : vector<24x1xf32>
    %22 = vector.broadcast %14 : vector<24x1xf32> to vector<24x256xf32>
    %23 = arith.subf %3, %22 : vector<24x256xf32>
    %cst_11 = arith.constant 9.99999997E-7 : f32
    %24 = vector.broadcast %cst_11 : f32 to vector<24x1xf32>
    %25 = arith.addf %21, %24 : vector<24x1xf32>
    %26 = math.rsqrt %25 : vector<24x1xf32>
    %27 = vector.broadcast %26 : vector<24x1xf32> to vector<24x256xf32>
    %28 = arith.mulf %23, %27 : vector<24x256xf32>
    %29 = vector.broadcast %8 : vector<1x256xf32> to vector<24x256xf32>
    %30 = arith.mulf %28, %29 : vector<24x256xf32>
    %31 = vector.broadcast %10 : vector<1x256xf32> to vector<24x256xf32>
    %32 = arith.addf %30, %31 : vector<24x256xf32>
    %33 = arith.truncf %32 : vector<24x256xf32> to vector<24x256xbf16>
    %c0_12 = arith.constant 0 : index
    %c0_13 = arith.constant 0 : index
    %c0_14 = arith.constant 0 : index
    %34 = vector.load %arg9[%c0_12, %c0_13, %c0_14] : memref<1x256x768xbf16, #tpu.memory_space<vmem>>, vector<1x256x768xbf16>
    %35 = vector.shape_cast %34 : vector<1x256x768xbf16> to vector<256x768xbf16>
    %cst_15 = arith.constant dense<0.000000e+00> : vector<24x768xf32>
    %36 = tpu.matmul %33, %35, %cst_15 {dimension_numbers = #tpu.dot_dimension_numbers<[1], [0], [0], [1], [0, 0, 1, 1], [], []>} : vector<24x256xbf16>, vector<256x768xbf16>, vector<24x768xf32> -> vector<24x768xf32>
    %c0_16 = arith.constant 0 : index
    %c0_17 = arith.constant 0 : index
    %c0_18 = arith.constant 0 : index
    %37 = vector.load %arg10[%c0_16, %c0_17, %c0_18] : memref<1x1x768xf32, #tpu.memory_space<vmem>>, vector<1x1x768xf32>
    %38 = vector.shape_cast %37 : vector<1x1x768xf32> to vector<1x768xf32>
    %39 = vector.broadcast %38 : vector<1x768xf32> to vector<24x768xf32>
    %40 = arith.addf %36, %39 : vector<24x768xf32>
    %41 = vector.extract_strided_slice %40 {offsets = [0, 0], sizes = [24, 128], strides = [1, 1]} : vector<24x768xf32> to vector<24x128xf32>
    %42 = arith.truncf %41 : vector<24x128xf32> to vector<24x128xbf16>
    %43 = vector.extract_strided_slice %40 {offsets = [0, 256], sizes = [24, 128], strides = [1, 1]} : vector<24x768xf32> to vector<24x128xf32>
    %44 = arith.truncf %43 : vector<24x128xf32> to vector<24x128xbf16>
    %45 = vector.extract_strided_slice %40 {offsets = [0, 512], sizes = [24, 128], strides = [1, 1]} : vector<24x768xf32> to vector<24x128xf32>
    %46 = arith.truncf %45 : vector<24x128xf32> to vector<24x128xbf16>
    %cst_19 = arith.constant dense<0.000000e+00> : vector<24x24xf32>
    %47 = tpu.matmul %42, %44, %cst_19 {dimension_numbers = #tpu.dot_dimension_numbers<[1], [1], [0], [0], [0, 0, 1, 0], [], []>} : vector<24x128xbf16>, vector<24x128xbf16>, vector<24x24xf32> -> vector<24x24xf32>
    %cst_20 = arith.constant 0.0883883461 : f32
    %48 = vector.broadcast %cst_20 : f32 to vector<24x24xf32>
    %49 = arith.mulf %47, %48 : vector<24x24xf32>
    %cst_21 = arith.constant -1.000000e+30 : f32
    %50 = vector.shape_cast %6 : vector<1x24xi1> to vector<1x24xi1>
    %51 = vector.broadcast %50 : vector<1x24xi1> to vector<24x24xi1>
    %52 = vector.broadcast %cst_21 : f32 to vector<24x24xf32>
    %53 = arith.select %51, %49, %52 : vector<24x24xi1>, vector<24x24xf32>
    %cst_22 = arith.constant dense<0xFF800000> : vector<24xf32>
    %54 = vector.multi_reduction <maximumf>, %53, %cst_22 [1] : vector<24x24xf32> to vector<24xf32>
    %55 = vector.shape_cast %54 : vector<24xf32> to vector<24x1xf32>
    %56 = vector.broadcast %55 : vector<24x1xf32> to vector<24x24xf32>
    %57 = arith.subf %53, %56 : vector<24x24xf32>
    %58 = math.exp %57 : vector<24x24xf32>
    %cst_23 = arith.constant dense<0.000000e+00> : vector<24xf32>
    %59 = vector.multi_reduction <add>, %58, %cst_23 [1] : vector<24x24xf32> to vector<24xf32>
    %60 = vector.shape_cast %59 : vector<24xf32> to vector<24x1xf32>
    %61 = tpu.reciprocal %60 {approx = true} : vector<24x1xf32> -> vector<24x1xf32>
    %62 = vector.broadcast %61 : vector<24x1xf32> to vector<24x24xf32>
    %63 = arith.mulf %58, %62 : vector<24x24xf32>
    %64 = arith.truncf %63 : vector<24x24xf32> to vector<24x24xbf16>
    %cst_24 = arith.constant dense<0.000000e+00> : vector<24x128xf32>
    %65 = tpu.matmul %64, %46, %cst_24 {dimension_numbers = #tpu.dot_dimension_numbers<[1], [0], [0], [1], [0, 0, 1, 1], [], []>} : vector<24x24xbf16>, vector<24x128xbf16>, vector<24x128xf32> -> vector<24x128xf32>
    %66 = vector.extract_strided_slice %40 {offsets = [0, 128], sizes = [24, 128], strides = [1, 1]} : vector<24x768xf32> to vector<24x128xf32>
    %67 = arith.truncf %66 : vector<24x128xf32> to vector<24x128xbf16>
    %68 = vector.extract_strided_slice %40 {offsets = [0, 384], sizes = [24, 128], strides = [1, 1]} : vector<24x768xf32> to vector<24x128xf32>
    %69 = arith.truncf %68 : vector<24x128xf32> to vector<24x128xbf16>
    %70 = vector.extract_strided_slice %40 {offsets = [0, 640], sizes = [24, 128], strides = [1, 1]} : vector<24x768xf32> to vector<24x128xf32>
    %71 = arith.truncf %70 : vector<24x128xf32> to vector<24x128xbf16>
    %cst_25 = arith.constant dense<0.000000e+00> : vector<24x24xf32>
    %72 = tpu.matmul %67, %69, %cst_25 {dimension_numbers = #tpu.dot_dimension_numbers<[1], [1], [0], [0], [0, 0, 1, 0], [], []>} : vector<24x128xbf16>, vector<24x128xbf16>, vector<24x24xf32> -> vector<24x24xf32>
    %cst_26 = arith.constant 0.0883883461 : f32
    %73 = vector.broadcast %cst_26 : f32 to vector<24x24xf32>
    %74 = arith.mulf %72, %73 : vector<24x24xf32>
    %cst_27 = arith.constant -1.000000e+30 : f32
    %75 = vector.shape_cast %6 : vector<1x24xi1> to vector<1x24xi1>
    %76 = vector.broadcast %75 : vector<1x24xi1> to vector<24x24xi1>
    %77 = vector.broadcast %cst_27 : f32 to vector<24x24xf32>
    %78 = arith.select %76, %74, %77 : vector<24x24xi1>, vector<24x24xf32>
    %cst_28 = arith.constant dense<0xFF800000> : vector<24xf32>
    %79 = vector.multi_reduction <maximumf>, %78, %cst_28 [1] : vector<24x24xf32> to vector<24xf32>
    %80 = vector.shape_cast %79 : vector<24xf32> to vector<24x1xf32>
    %81 = vector.broadcast %80 : vector<24x1xf32> to vector<24x24xf32>
    %82 = arith.subf %78, %81 : vector<24x24xf32>
    %83 = math.exp %82 : vector<24x24xf32>
    %cst_29 = arith.constant dense<0.000000e+00> : vector<24xf32>
    %84 = vector.multi_reduction <add>, %83, %cst_29 [1] : vector<24x24xf32> to vector<24xf32>
    %85 = vector.shape_cast %84 : vector<24xf32> to vector<24x1xf32>
    %86 = tpu.reciprocal %85 {approx = true} : vector<24x1xf32> -> vector<24x1xf32>
    %87 = vector.broadcast %86 : vector<24x1xf32> to vector<24x24xf32>
    %88 = arith.mulf %83, %87 : vector<24x24xf32>
    %89 = arith.truncf %88 : vector<24x24xf32> to vector<24x24xbf16>
    %cst_30 = arith.constant dense<0.000000e+00> : vector<24x128xf32>
    %90 = tpu.matmul %89, %71, %cst_30 {dimension_numbers = #tpu.dot_dimension_numbers<[1], [0], [0], [1], [0, 0, 1, 1], [], []>} : vector<24x24xbf16>, vector<24x128xbf16>, vector<24x128xf32> -> vector<24x128xf32>
    %91 = tpu.concatenate %65, %90 in 1 : vector<24x128xf32>, vector<24x128xf32> -> vector<24x256xf32>
    %92 = arith.truncf %91 : vector<24x256xf32> to vector<24x256xbf16>
    %c0_31 = arith.constant 0 : index
    %c0_32 = arith.constant 0 : index
    %c0_33 = arith.constant 0 : index
    %93 = vector.load %arg11[%c0_31, %c0_32, %c0_33] : memref<1x256x256xbf16, #tpu.memory_space<vmem>>, vector<1x256x256xbf16>
    %94 = vector.shape_cast %93 : vector<1x256x256xbf16> to vector<256x256xbf16>
    %cst_34 = arith.constant dense<0.000000e+00> : vector<24x256xf32>
    %95 = tpu.matmul %92, %94, %cst_34 {dimension_numbers = #tpu.dot_dimension_numbers<[1], [0], [0], [1], [0, 0, 1, 1], [], []>} : vector<24x256xbf16>, vector<256x256xbf16>, vector<24x256xf32> -> vector<24x256xf32>
    %c0_35 = arith.constant 0 : index
    %c0_36 = arith.constant 0 : index
    %c0_37 = arith.constant 0 : index
    %96 = vector.load %arg12[%c0_35, %c0_36, %c0_37] : memref<1x1x256xf32, #tpu.memory_space<vmem>>, vector<1x1x256xf32>
    %97 = vector.shape_cast %96 : vector<1x1x256xf32> to vector<1x256xf32>
    %98 = vector.broadcast %97 : vector<1x256xf32> to vector<24x256xf32>
    %99 = arith.addf %95, %98 : vector<24x256xf32>
    %c0_38 = arith.constant 0 : index
    %c0_39 = arith.constant 0 : index
    %c0_40 = arith.constant 0 : index
    %100 = vector.load %arg13[%c0_38, %c0_39, %c0_40] : memref<1x1x256xf32, #tpu.memory_space<vmem>>, vector<1x1x256xf32>
    %101 = vector.shape_cast %100 : vector<1x1x256xf32> to vector<1x256xf32>
    %102 = vector.broadcast %101 : vector<1x256xf32> to vector<24x256xf32>
    %103 = arith.mulf %102, %99 : vector<24x256xf32>
    %104 = arith.addf %3, %103 : vector<24x256xf32>
    %c0_41 = arith.constant 0 : index
    %c0_42 = arith.constant 0 : index
    %c0_43 = arith.constant 0 : index
    %105 = vector.load %arg14[%c0_41, %c0_42, %c0_43] : memref<1x1x256xf32, #tpu.memory_space<vmem>>, vector<1x1x256xf32>
    %106 = vector.shape_cast %105 : vector<1x1x256xf32> to vector<1x256xf32>
    %c0_44 = arith.constant 0 : index
    %c0_45 = arith.constant 0 : index
    %c0_46 = arith.constant 0 : index
    %107 = vector.load %arg15[%c0_44, %c0_45, %c0_46] : memref<1x1x256xf32, #tpu.memory_space<vmem>>, vector<1x1x256xf32>
    %108 = vector.shape_cast %107 : vector<1x1x256xf32> to vector<1x256xf32>
    %cst_47 = arith.constant dense<0.000000e+00> : vector<24xf32>
    %109 = vector.multi_reduction <add>, %104, %cst_47 [1] : vector<24x256xf32> to vector<24xf32>
    %110 = vector.shape_cast %109 : vector<24xf32> to vector<24x1xf32>
    %cst_48 = arith.constant 2.560000e+02 : f32
    %111 = vector.broadcast %cst_48 : f32 to vector<24x1xf32>
    %112 = arith.divf %110, %111 : vector<24x1xf32>
    %113 = vector.broadcast %112 : vector<24x1xf32> to vector<24x256xf32>
    %114 = arith.subf %104, %113 : vector<24x256xf32>
    %115 = arith.mulf %114, %114 : vector<24x256xf32>
    %cst_49 = arith.constant dense<0.000000e+00> : vector<24xf32>
    %116 = vector.multi_reduction <add>, %115, %cst_49 [1] : vector<24x256xf32> to vector<24xf32>
    %117 = vector.shape_cast %116 : vector<24xf32> to vector<24x1xf32>
    %cst_50 = arith.constant 2.560000e+02 : f32
    %118 = vector.broadcast %cst_50 : f32 to vector<24x1xf32>
    %119 = arith.divf %117, %118 : vector<24x1xf32>
    %120 = vector.broadcast %112 : vector<24x1xf32> to vector<24x256xf32>
    %121 = arith.subf %104, %120 : vector<24x256xf32>
    %cst_51 = arith.constant 9.99999997E-7 : f32
    %122 = vector.broadcast %cst_51 : f32 to vector<24x1xf32>
    %123 = arith.addf %119, %122 : vector<24x1xf32>
    %124 = math.rsqrt %123 : vector<24x1xf32>
    %125 = vector.broadcast %124 : vector<24x1xf32> to vector<24x256xf32>
    %126 = arith.mulf %121, %125 : vector<24x256xf32>
    %127 = vector.broadcast %106 : vector<1x256xf32> to vector<24x256xf32>
    %128 = arith.mulf %126, %127 : vector<24x256xf32>
    %129 = vector.broadcast %108 : vector<1x256xf32> to vector<24x256xf32>
    %130 = arith.addf %128, %129 : vector<24x256xf32>
    %131 = arith.truncf %130 : vector<24x256xf32> to vector<24x256xbf16>
    %c0_52 = arith.constant 0 : index
    %c0_53 = arith.constant 0 : index
    %c0_54 = arith.constant 0 : index
    %132 = vector.load %arg16[%c0_52, %c0_53, %c0_54] : memref<1x256x1024xbf16, #tpu.memory_space<vmem>>, vector<1x256x1024xbf16>
    %133 = vector.shape_cast %132 : vector<1x256x1024xbf16> to vector<256x1024xbf16>
    %cst_55 = arith.constant dense<0.000000e+00> : vector<24x1024xf32>
    %134 = tpu.matmul %131, %133, %cst_55 {dimension_numbers = #tpu.dot_dimension_numbers<[1], [0], [0], [1], [0, 0, 1, 1], [], []>} : vector<24x256xbf16>, vector<256x1024xbf16>, vector<24x1024xf32> -> vector<24x1024xf32>
    %c0_56 = arith.constant 0 : index
    %c0_57 = arith.constant 0 : index
    %c0_58 = arith.constant 0 : index
    %135 = vector.load %arg17[%c0_56, %c0_57, %c0_58] : memref<1x1x1024xf32, #tpu.memory_space<vmem>>, vector<1x1x1024xf32>
    %136 = vector.shape_cast %135 : vector<1x1x1024xf32> to vector<1x1024xf32>
    %137 = vector.broadcast %136 : vector<1x1024xf32> to vector<24x1024xf32>
    %138 = arith.addf %134, %137 : vector<24x1024xf32>
    %139 = arith.mulf %138, %138 : vector<24x1024xf32>
    %140 = arith.mulf %138, %139 : vector<24x1024xf32>
    %cst_59 = arith.constant 4.471500e-02 : f32
    %141 = vector.broadcast %cst_59 : f32 to vector<24x1024xf32>
    %142 = arith.mulf %141, %140 : vector<24x1024xf32>
    %143 = arith.addf %138, %142 : vector<24x1024xf32>
    %cst_60 = arith.constant 0.797884583 : f32
    %144 = vector.broadcast %cst_60 : f32 to vector<24x1024xf32>
    %145 = arith.mulf %144, %143 : vector<24x1024xf32>
    %146 = math.tanh %145 : vector<24x1024xf32>
    %cst_61 = arith.constant 1.000000e+00 : f32
    %147 = vector.broadcast %cst_61 : f32 to vector<24x1024xf32>
    %148 = arith.addf %147, %146 : vector<24x1024xf32>
    %cst_62 = arith.constant 5.000000e-01 : f32
    %149 = vector.broadcast %cst_62 : f32 to vector<24x1024xf32>
    %150 = arith.mulf %149, %148 : vector<24x1024xf32>
    %151 = arith.mulf %138, %150 : vector<24x1024xf32>
    %152 = arith.truncf %151 : vector<24x1024xf32> to vector<24x1024xbf16>
    %c0_63 = arith.constant 0 : index
    %c0_64 = arith.constant 0 : index
    %c0_65 = arith.constant 0 : index
    %153 = vector.load %arg18[%c0_63, %c0_64, %c0_65] : memref<1x1024x256xbf16, #tpu.memory_space<vmem>>, vector<1x1024x256xbf16>
    %154 = vector.shape_cast %153 : vector<1x1024x256xbf16> to vector<1024x256xbf16>
    %cst_66 = arith.constant dense<0.000000e+00> : vector<24x256xf32>
    %155 = tpu.matmul %152, %154, %cst_66 {dimension_numbers = #tpu.dot_dimension_numbers<[1], [0], [0], [1], [0, 0, 1, 1], [], []>} : vector<24x1024xbf16>, vector<1024x256xbf16>, vector<24x256xf32> -> vector<24x256xf32>
    %c0_67 = arith.constant 0 : index
    %c0_68 = arith.constant 0 : index
    %c0_69 = arith.constant 0 : index
    %156 = vector.load %arg19[%c0_67, %c0_68, %c0_69] : memref<1x1x256xf32, #tpu.memory_space<vmem>>, vector<1x1x256xf32>
    %157 = vector.shape_cast %156 : vector<1x1x256xf32> to vector<1x256xf32>
    %158 = vector.broadcast %157 : vector<1x256xf32> to vector<24x256xf32>
    %159 = arith.addf %155, %158 : vector<24x256xf32>
    %c0_70 = arith.constant 0 : index
    %c0_71 = arith.constant 0 : index
    %c0_72 = arith.constant 0 : index
    %160 = vector.load %arg20[%c0_70, %c0_71, %c0_72] : memref<1x1x256xf32, #tpu.memory_space<vmem>>, vector<1x1x256xf32>
    %161 = vector.shape_cast %160 : vector<1x1x256xf32> to vector<1x256xf32>
    %162 = vector.broadcast %161 : vector<1x256xf32> to vector<24x256xf32>
    %163 = arith.mulf %162, %159 : vector<24x256xf32>
    %164 = arith.addf %104, %163 : vector<24x256xf32>
    %c0_73 = arith.constant 0 : index
    %c0_74 = arith.constant 0 : index
    %165 = vector.load %arg25[%c0_73, %c0_74] : memref<24x256xf32, #tpu.memory_space<vmem>>, vector<24x256xf32>
    tpu.vector_store %arg25[%c0_73, %c0_74], %164 {strides = array<i32>} : memref<24x256xf32, #tpu.memory_space<vmem>>, vector<24x256xf32>,
    %c1_i32 = arith.constant 1 : i32
    %166 = arith.cmpi eq, %arg1, %c1_i32 : i32
    %167 = arith.extui %166 : i1 to i32
    %c0_i32_75 = arith.constant 0 : i32
    %168 = arith.cmpi ne, %167, %c0_i32_75 : i32
    scf.if %168 {
      %c0_76 = arith.constant 0 : index
      %c0_77 = arith.constant 0 : index
      %169 = vector.load %arg21[%c0_76, %c0_77] : memref<1x256xf32, #tpu.memory_space<vmem>>, vector<1x256xf32>
      %c0_78 = arith.constant 0 : index
      %c0_79 = arith.constant 0 : index
      %170 = vector.load %arg22[%c0_78, %c0_79] : memref<1x256xf32, #tpu.memory_space<vmem>>, vector<1x256xf32>
      %cst_80 = arith.constant dense<0.000000e+00> : vector<24xf32>
      %171 = vector.multi_reduction <add>, %164, %cst_80 [1] : vector<24x256xf32> to vector<24xf32>
      %172 = vector.shape_cast %171 : vector<24xf32> to vector<24x1xf32>
      %cst_81 = arith.constant 2.560000e+02 : f32
      %173 = vector.broadcast %cst_81 : f32 to vector<24x1xf32>
      %174 = arith.divf %172, %173 : vector<24x1xf32>
      %175 = vector.broadcast %174 : vector<24x1xf32> to vector<24x256xf32>
      %176 = arith.subf %164, %175 : vector<24x256xf32>
      %177 = arith.mulf %176, %176 : vector<24x256xf32>
      %cst_82 = arith.constant dense<0.000000e+00> : vector<24xf32>
      %178 = vector.multi_reduction <add>, %177, %cst_82 [1] : vector<24x256xf32> to vector<24xf32>
      %179 = vector.shape_cast %178 : vector<24xf32> to vector<24x1xf32>
      %cst_83 = arith.constant 2.560000e+02 : f32
      %180 = vector.broadcast %cst_83 : f32 to vector<24x1xf32>
      %181 = arith.divf %179, %180 : vector<24x1xf32>
      %182 = vector.broadcast %174 : vector<24x1xf32> to vector<24x256xf32>
      %183 = arith.subf %164, %182 : vector<24x256xf32>
      %cst_84 = arith.constant 9.99999997E-7 : f32
      %184 = vector.broadcast %cst_84 : f32 to vector<24x1xf32>
      %185 = arith.addf %181, %184 : vector<24x1xf32>
      %186 = math.rsqrt %185 : vector<24x1xf32>
      %187 = vector.broadcast %186 : vector<24x1xf32> to vector<24x256xf32>
      %188 = arith.mulf %183, %187 : vector<24x256xf32>
      %189 = vector.broadcast %169 : vector<1x256xf32> to vector<24x256xf32>
      %190 = arith.mulf %188, %189 : vector<24x256xf32>
      %191 = vector.broadcast %170 : vector<1x256xf32> to vector<24x256xf32>
      %192 = arith.addf %190, %191 : vector<24x256xf32>
      %c0_85 = arith.constant 0 : index
      %c0_86 = arith.constant 0 : index
      %193 = vector.load %arg23[%c0_85, %c0_86] : memref<256x128xf32, #tpu.memory_space<vmem>>, vector<256x128xf32>
      %cst_87 = arith.constant dense<0.000000e+00> : vector<24x128xf32>
      %194 = tpu.matmul %192, %193, %cst_87 {dimension_numbers = #tpu.dot_dimension_numbers<[1], [0], [0], [1], [0, 0, 1, 1], [], []>} : vector<24x256xf32>, vector<256x128xf32>, vector<24x128xf32> -> vector<24x128xf32>
      %c0_88 = arith.constant 0 : index
      %c0_89 = arith.constant 0 : index
      %c0_90 = arith.constant 0 : index
      %195 = vector.load %arg24[%c0_88, %c0_89, %c0_90] : memref<1x24x128xf32, #tpu.memory_space<vmem>>, vector<1x24x128xf32>
      %196 = vector.shape_cast %195 : vector<1x24x128xf32> to vector<24x128xf32>
      %197 = vector.shape_cast %194 : vector<24x128xf32> to vector<1x24x128xf32>
      tpu.vector_store %arg24[%c0_88, %c0_89, %c0_90], %197 {strides = array<i32>} : memref<1x24x128xf32, #tpu.memory_space<vmem>>, vector<1x24x128xf32>,
    } else {
    }
    return
  }
  func.func @transform_0(%arg0: i32, %arg1: i32) -> (i32, i32) {
    %c0_i32 = arith.constant 0 : i32
    %c0_i32_0 = arith.constant 0 : i32
    return %arg0, %c0_i32 : i32, i32
  }
  func.func @transform_1(%arg0: i32, %arg1: i32) -> (i32, i32) {
    %c0_i32 = arith.constant 0 : i32
    %c0_i32_0 = arith.constant 0 : i32
    %c0_i32_1 = arith.constant 0 : i32
    return %c0_i32, %c0_i32_0 : i32, i32
  }
  func.func @transform_2(%arg0: i32, %arg1: i32) -> (i32, i32) {
    %c0_i32 = arith.constant 0 : i32
    %c0_i32_0 = arith.constant 0 : i32
    %c0_i32_1 = arith.constant 0 : i32
    return %c0_i32, %c0_i32_0 : i32, i32
  }
  func.func @transform_3(%arg0: i32, %arg1: i32) -> (i32, i32) {
    %c0_i32 = arith.constant 0 : i32
    %c0_i32_0 = arith.constant 0 : i32
    %c0_i32_1 = arith.constant 0 : i32
    return %c0_i32, %c0_i32_0 : i32, i32
  }
  func.func @transform_4(%arg0: i32, %arg1: i32) -> (i32, i32) {
    %c0_i32 = arith.constant 0 : i32
    %c0_i32_0 = arith.constant 0 : i32
    %c0_i32_1 = arith.constant 0 : i32
    return %c0_i32, %c0_i32_0 : i32, i32
  }
  func.func @transform_5(%arg0: i32, %arg1: i32) -> (i32, i32, i32) {
    %c0_i32 = arith.constant 0 : i32
    %c0_i32_0 = arith.constant 0 : i32
    %c0_i32_1 = arith.constant 0 : i32
    return %arg1, %c0_i32, %c0_i32_0 : i32, i32, i32
  }
  func.func @transform_6(%arg0: i32, %arg1: i32) -> (i32, i32, i32) {
    %c0_i32 = arith.constant 0 : i32
    %c0_i32_0 = arith.constant 0 : i32
    %c0_i32_1 = arith.constant 0 : i32
    return %arg1, %c0_i32, %c0_i32_0 : i32, i32, i32
  }
  func.func @transform_7(%arg0: i32, %arg1: i32) -> (i32, i32, i32) {
    %c0_i32 = arith.constant 0 : i32
    %c0_i32_0 = arith.constant 0 : i32
    %c0_i32_1 = arith.constant 0 : i32
    return %arg1, %c0_i32, %c0_i32_0 : i32, i32, i32
  }
  func.func @transform_8(%arg0: i32, %arg1: i32) -> (i32, i32, i32) {
    %c0_i32 = arith.constant 0 : i32
    %c0_i32_0 = arith.constant 0 : i32
    %c0_i32_1 = arith.constant 0 : i32
    return %arg1, %c0_i32, %c0_i32_0 : i32, i32, i32
  }
  func.func @transform_9(%arg0: i32, %arg1: i32) -> (i32, i32, i32) {
    %c0_i32 = arith.constant 0 : i32
    %c0_i32_0 = arith.constant 0 : i32
    %c0_i32_1 = arith.constant 0 : i32
    return %arg1, %c0_i32, %c0_i32_0 : i32, i32, i32
  }
  func.func @transform_10(%arg0: i32, %arg1: i32) -> (i32, i32, i32) {
    %c0_i32 = arith.constant 0 : i32
    %c0_i32_0 = arith.constant 0 : i32
    %c0_i32_1 = arith.constant 0 : i32
    return %arg1, %c0_i32, %c0_i32_0 : i32, i32, i32
  }
  func.func @transform_11(%arg0: i32, %arg1: i32) -> (i32, i32, i32) {
    %c0_i32 = arith.constant 0 : i32
    %c0_i32_0 = arith.constant 0 : i32
    %c0_i32_1 = arith.constant 0 : i32
    return %arg1, %c0_i32, %c0_i32_0 : i32, i32, i32
  }
  func.func @transform_12(%arg0: i32, %arg1: i32) -> (i32, i32, i32) {
    %c0_i32 = arith.constant 0 : i32
    %c0_i32_0 = arith.constant 0 : i32
    %c0_i32_1 = arith.constant 0 : i32
    return %arg1, %c0_i32, %c0_i32_0 : i32, i32, i32
  }
  func.func @transform_13(%arg0: i32, %arg1: i32) -> (i32, i32, i32) {
    %c0_i32 = arith.constant 0 : i32
    %c0_i32_0 = arith.constant 0 : i32
    %c0_i32_1 = arith.constant 0 : i32
    return %arg1, %c0_i32, %c0_i32_0 : i32, i32, i32
  }
  func.func @transform_14(%arg0: i32, %arg1: i32) -> (i32, i32, i32) {
    %c0_i32 = arith.constant 0 : i32
    %c0_i32_0 = arith.constant 0 : i32
    %c0_i32_1 = arith.constant 0 : i32
    return %arg1, %c0_i32, %c0_i32_0 : i32, i32, i32
  }
  func.func @transform_15(%arg0: i32, %arg1: i32) -> (i32, i32, i32) {
    %c0_i32 = arith.constant 0 : i32
    %c0_i32_0 = arith.constant 0 : i32
    %c0_i32_1 = arith.constant 0 : i32
    return %arg1, %c0_i32, %c0_i32_0 : i32, i32, i32
  }
  func.func @transform_16(%arg0: i32, %arg1: i32) -> (i32, i32, i32) {
    %c0_i32 = arith.constant 0 : i32
    %c0_i32_0 = arith.constant 0 : i32
    %c0_i32_1 = arith.constant 0 : i32
    return %arg1, %c0_i32, %c0_i32_0 : i32, i32, i32
  }
  func.func @transform_17(%arg0: i32, %arg1: i32) -> (i32, i32, i32) {
    %c0_i32 = arith.constant 0 : i32
    %c0_i32_0 = arith.constant 0 : i32
    %c0_i32_1 = arith.constant 0 : i32
    return %arg1, %c0_i32, %c0_i32_0 : i32, i32, i32
  }
  func.func @transform_18(%arg0: i32, %arg1: i32) -> (i32, i32, i32) {
    %c0_i32 = arith.constant 0 : i32
    %c0_i32_0 = arith.constant 0 : i32
    %c0_i32_1 = arith.constant 0 : i32
    return %arg1, %c0_i32, %c0_i32_0 : i32, i32, i32
  }
  func.func @transform_19(%arg0: i32, %arg1: i32) -> (i32, i32) {
    %c0_i32 = arith.constant 0 : i32
    %c0_i32_0 = arith.constant 0 : i32
    %c0_i32_1 = arith.constant 0 : i32
    return %c0_i32, %c0_i32_0 : i32, i32
  }
  func.func @transform_20(%arg0: i32, %arg1: i32) -> (i32, i32) {
    %c0_i32 = arith.constant 0 : i32
    %c0_i32_0 = arith.constant 0 : i32
    %c0_i32_1 = arith.constant 0 : i32
    return %c0_i32, %c0_i32_0 : i32, i32
  }
  func.func @transform_21(%arg0: i32, %arg1: i32) -> (i32, i32) {
    %c0_i32 = arith.constant 0 : i32
    %c0_i32_0 = arith.constant 0 : i32
    %c0_i32_1 = arith.constant 0 : i32
    return %c0_i32, %c0_i32_0 : i32, i32
  }
  func.func @transform_22(%arg0: i32, %arg1: i32) -> (i32, i32, i32) {
    %c0_i32 = arith.constant 0 : i32
    %c0_i32_0 = arith.constant 0 : i32
    %c0_i32_1 = arith.constant 0 : i32
    return %arg0, %c0_i32, %c0_i32_0 : i32, i32, i32
  }
}

</mosaic_0001>

<bundles_post_ra>
// kernel: encoder_forward.1
= control target key start
LH: loop header
LB: loop body
LE: loop exit
PB: predicated region body
PF: predicated region fallthrough
CT: control target
= control target key end

     0   :  { %s10205_s0 = inlined_call_operand.vmem [shape: f32[48,768], index: 0, kind: input, shape index: {}]   ;;  %s10206_s1 = inlined_call_operand.vmem [shape: bf16[768,256], index: 1, kind: input, shape index: {}]   ;;  %s10207_s2 = inlined_call_operand.hbm [shape: f32[1,256], index: 2, kind: input, shape index: {}]   ;;  %s10208_s3 = inlined_call_operand.hbm [shape: f32[1,256], index: 3, kind: input, shape index: {}]   ;;  %s10209_s4 = inlined_call_operand.hbm [shape: f32[24,256], index: 4, kind: input, shape index: {}]   ;;  %s10210_s5 = inlined_call_operand.vmem [shape: f32[2,1,256], index: 5, kind: input, shape index: {}]   ;;  %s10211_s6 = inlined_call_operand.vmem [shape: f32[2,1,256], index: 6, kind: input, shape index: {}]   ;;  %s10212_s7 = inlined_call_operand.vmem [shape: bf16[2,256,768], index: 7, kind: input, shape index: {}]   ;;  %s10213_s8 = inlined_call_operand.vmem [shape: f32[2,1,768], index: 8, kind: input, shape index: {}]   ;;  %s10214_s9 = inlined_call_operand.vmem [shape: bf16[2,256,256], index: 9, kind: input, shape index: {}]   ;;  %s10215_s10 = inlined_call_operand.vmem [shape: f32[2,1,256], index: 10, kind: input, shape index: {}]   ;;  %s10216_s11 = inlined_call_operand.hbm [shape: f32[2,1,256], index: 11, kind: input, shape index: {}]   ;;  %s10217_s12 = inlined_call_operand.hbm [shape: f32[2,1,256], index: 12, kind: input, shape index: {}]   ;;  %s10218_s13 = inlined_call_operand.hbm [shape: f32[2,1,256], index: 13, kind: input, shape index: {}]   ;;  %s10219_s14 = inlined_call_operand.vmem [shape: bf16[2,256,1024], index: 14, kind: input, shape index: {}]   ;;  %s10220_s15 = inlined_call_operand.vmem [shape: f32[2,1,1024], index: 15, kind: input, shape index: {}]   ;;  %s10221_s16 = inlined_call_operand.vmem [shape: bf16[2,1024,256], index: 16, kind: input, shape index: {}]   ;;  %s10222_s17 = inlined_call_operand.hbm [shape: f32[2,1,256], index: 17, kind: input, shape index: {}]   ;;  %s10223_s18 = inlined_call_operand.hbm [shape: f32[2,1,256], index: 18, kind: input, shape index: {}]   ;;  %s10224_s19 = inlined_call_operand.hbm [shape: f32[1,256], index: 19, kind: input, shape index: {}]   ;;  %s10225_s20 = inlined_call_operand.hbm [shape: f32[1,256], index: 20, kind: input, shape index: {}]   ;;  %s10226_s21 = inlined_call_operand.vmem [shape: f32[256,128], index: 21, kind: input, shape index: {}]   ;;  %s10227_s22 = inlined_call_operand.vmem [shape: f32[2,24,128], index: 22, kind: output, shape index: {}]  }
   0x1   :  { %10257 = sst [smem:[#allocation35_spill]] %s10205_s0 }
   0x2   :  { %10258 = sst [smem:[#allocation36_spill]] %s10206_s1 }
   0x3   :  { %10259 = sst [smem:[#allocation37_spill]] %s10207_s2 }
   0x4   :  { %10260 = sst [smem:[#allocation38_spill]] %s10208_s3 }
   0x5   :  { %10261 = sst [smem:[#allocation39_spill]] %s10209_s4 }
   0x6   :  { %10262 = sst [smem:[#allocation40_spill]] %s10210_s5 }
   0x7   :  { %10263 = sst [smem:[#allocation41_spill]] %s10211_s6 }
   0x8   :  { %10264 = sst [smem:[#allocation42_spill]] %s10212_s7 }
   0x9   :  { %10265 = sst [smem:[#allocation43_spill]] %s10213_s8 }
   0xa   :  { %10266 = sst [smem:[#allocation44_spill]] %s10214_s9 }
   0xb   :  { %10267 = sst [smem:[#allocation45_spill]] %s10215_s10 }
   0xc   :  { %10268 = sst [smem:[#allocation46_spill]] %s10216_s11 }
   0xd   :  { %10269 = sst [smem:[#allocation47_spill]] %s10217_s12 }
   0xe   :  { %10270 = sst [smem:[#allocation48_spill]] %s10218_s13 }
   0xf   :  { %10271 = sst [smem:[#allocation49_spill]] %s10219_s14 }
  0x10   :  { %10272 = sst [smem:[#allocation50_spill]] %s10220_s15 }
  0x11   :  { %10273 = sst [smem:[#allocation51_spill]] %s10221_s16 }
  0x12   :  { %10274 = sst [smem:[#allocation52_spill]] %s10222_s17 }
  0x13   :  { %10275 = sst [smem:[#allocation53_spill]] %s10223_s18 }
  0x14   :  { %10276 = sst [smem:[#allocation54_spill]] %s10224_s19 }
  0x15   :  { %10277 = sst [smem:[#allocation55_spill]] %s10226_s21 }
  0x16   :  { %10278 = sst [smem:[#allocation56_spill]] %s10227_s22 }
  0x17   :  { %27 = vsyncpa [#allocation4], 0 }
  0x18   :  { %28 = vsyncpa [#allocation6], 0 }
  0x19   :  { %29 = vsyncpa [#allocation9], 0 }
  0x1a   :  { %31 = vsyncpa [#allocation9 + $0x1], 0 }
  0x1b   :  { %32 = vsyncpa [#allocation12], 0 }
  0x1c   :  { %34 = vsyncpa [#allocation12 + $0x1], 0 }
  0x1d   :  { %35 = vsyncpa [#allocation15], 0 }
  0x1e   :  { %37 = vsyncpa [#allocation15 + $0x1], 0 }
  0x1f   :  { %38 = vsyncpa [#allocation18], 0  ;;  %s8334_s3 = smov 0   ;;  %s8336_s28 = smov 0  }
  0x20   :  { %s8338_s29 = smov 0   ;;  %s8340_s30 = smov 0  }
  0x21   :  { %s8342_s4 = smov 0   ;;  %s8344_s0 = smov 0  }
  0x22   :  { %s8346_s23 = smov 0   ;;  %s8348_s1 = smov 0  }
  0x23 LB: > { %10279 = sst [smem:[#allocation26_spill]] %s8185_s29  ;;  %s8207_s5 = smov [#allocation5]   ;;  %s8205_s1 = sphi %s8348_s1, %s44_s1   ;;  %s8201_s23 = sphi %s8346_s23, %s10354_s23   ;;  %s8197_s0 = sphi %s8344_s0, %s10353_s0   ;;  %s8193_s4 = sphi %s8342_s4, %s10352_s4   ;;  %s8189_s30 = sphi %s8340_s30, %s10351_s30   ;;  %s8185_s29 = sphi %s8338_s29, %s10350_s29   ;;  %s8181_s28 = sphi %s8336_s28, %s10356_s28   ;;  %s8177_s3 = sphi %s8334_s3, %s10355_s3  }
  0x24   : > { %10280 = sst [smem:[#allocation27_spill]] %s8189_s30  ;;  %s651_s24 = sshll.u32 %s8207_s5, 4  ;;  %s652_s24 = int_to_ptr.vmem [resolvable:$true] %s651_s24 }
  0x25   : > { %10281 = sst [smem:[#allocation28_spill]] %s8193_s4  ;;  %s10232_s6 = sadd.s32 4294967295, %s8205_s1  }
  0x26   : > { %10282 = sst [smem:[#allocation29_spill]] %s8197_s0  ;;  %p6292_p0 = scmp.ge.s32.totalorder %s8205_s1, 1 }
  0x27   : > { %10283 = sst [smem:[#allocation30_spill]] %s8201_s23  ;;  %p8378_p1 = scmp.eq.s32.totalorder %s10232_s6, 0 }
  0x28   : > { %p624_p2 = scmp.lt.s32.totalorder %s8205_s1, 5  ;;  %s8208_s2 = smov [#allocation16]  }
  0x29   : > { %s10284_s25 = scalar_select %p8378_p1, 1, 0 }
  0x2a   : > { %p8383_p3 = pnand %p6292_p0, %p624_p2  ;;  %s675_s27 = sshll.u32 %s8208_s2, 4  ;;  %s8389_s27 = int_to_ptr.vmem [resolvable:$true] %s675_s27 }
  0x2b   : > { %s10287_s22 = sld [smem:[#allocation38_spill]] }
  0x2c   : > { %s10285_s26 = scalar_select %p8383_p3, 1, 0 }
  0x2d   : > { %p7087_p4 = pneg %p8383_p3 }
  0x2f   : > { %p8393_p5 = pnand %p7087_p4, %p8378_p1 }
  0x31   : > { %s10286_s5 = scalar_select %p8393_p5, 1, 0 }
  0x32   : > { %s7825_s16 = scalar_lea.hbm %s10287_s22, 32  ;;  %p8405_p7 = pneg %p8393_p5 }
  0x33   : > { %p7826_p6 = scmp.ne.s32.totalorder %s10287_s22, %s7825_s16  ;;  %p7832_p10 = scmp.lt.u32.totalorder %s7825_s16, %s10287_s22 }
  0x34   : > { %s10288_s9 = scalar_select %p8405_p7, 1, 0 }
  0x35   : > { %p7828_p8 = pnand %p8405_p7, %p7826_p6 }
  0x37   : > { %p7829_p9 = pneg %p7828_p8 }
  0x39   : > { %p7834_p11 = pnand %p7832_p10, %p7829_p9 }
  0x3b   : > { %7837 = shalt.err (!%p7834_p11)
}
  0x3c   : > { %s7838_s21 = scalar_lea.vmem %s652_s24, 32  ;;  %p7846_p2 = scmp.lt.s32.totalorder %s652_s24, %s652_s24 }
  0x3d   : > { %p7839_p12 = scmp.ne.s32.totalorder %s652_s24, %s7838_s21  ;;  %p7847_p4 = scmp.lt.s32.totalorder %s7838_s21, %s7838_s21 }
  0x3f   : > { %p7841_p13 = pnand %p7839_p12, %p8405_p7  ;;  %p7848_p3 = por %p7847_p4, %p7846_p2 }
  0x41   : > { %p7842_p0 = pneg %p7841_p13 }
  0x43   : > { %p7849_p1 = pnand %p7848_p3, %p7842_p0 }
  0x45   : > { %7852 = shalt.err (!%p7849_p1)
}
  0x46   : > { %7093 = dma.hbm_to_vmem [thread:$0]  (!%p8393_p5), %s10287_s22, 32, %s652_s24, [#allocation6]  }
  0x47   : > { %s10289_s19 = sld [smem:[#allocation54_spill]] }
  0x4d   : > { %s7853_s6 = scalar_lea.hbm %s10289_s19, 32 }
  0x4e   : > { %p7854_p6 = scmp.ne.s32.totalorder %s10289_s19, %s7853_s6  ;;  %p7860_p1 = scmp.lt.u32.totalorder %s7853_s6, %s10289_s19 }
  0x50   : > { %p7856_p8 = pnand %p7854_p6, %p8405_p7 }
  0x52   : > { %p7857_p9 = pneg %p7856_p8 }
  0x54   : > { %p7862_p3 = pnand %p7860_p1, %p7857_p9 }
  0x56   : > { %7865 = shalt.err (!%p7862_p3)
}
  0x57   : > { %s7866_s24 = scalar_lea.vmem %s8389_s27, 32  ;;  %p7874_p13 = scmp.lt.s32.totalorder %s8389_s27, %s8389_s27 }
  0x58   : > { %p7867_p10 = scmp.ne.s32.totalorder %s8389_s27, %s7866_s24  ;;  %p7875_p0 = scmp.lt.s32.totalorder %s7866_s24, %s7866_s24 }
  0x5a   : > { %p7869_p11 = pnand %p7867_p10, %p8405_p7  ;;  %p7876_p2 = por %p7875_p0, %p7874_p13 }
  0x5c   : > { %p7870_p12 = pneg %p7869_p11 }
  0x5e   : > { %p7877_p4 = pnand %p7876_p2, %p7870_p12 }
  0x60   : > { %7880 = shalt.err (!%p7877_p4)
}
  0x61   : > { %7099 = dma.hbm_to_vmem [thread:$0]  (!%p8393_p5), %s10289_s19, 32, %s8389_s27, [#allocation15]  }
  0x62   : > { %s53_s14 = sadd.s32 1, %s8197_s0  ;;  %s56_s15 = sadd.s32 1, %s8201_s23 }
  0x63   : > { %p54_p6 = scmp.ge.s32.totalorder %s53_s14, 2  ;;  %s329_s8 = sadd.s32 1, %s8185_s29 }
  0x64   : > { %p336_p8 = scmp.ne.s32.totalorder %s8185_s29, %s8181_s28  ;;  %p337_p9 = scmp.eq.s32.totalorder %s8205_s1, 0 }
  0x65   : > { %s10358_s14 = smov (%p54_p6, %s53_s14), 0  ;;  %s10360_s15 = smov (!%p54_p6, %s56_s15), %s8201_s23 }
  0x66   : > { %10290 = sst [smem:[#allocation31_spill]] %s10358_s14  ;;  %s326_s16 = ssub.s32 %s8197_s0, %s10358_s14 }
  0x67   : > { %p8455_p1 = por %p337_p9, %p336_p8  ;;  %p58_p3 = scmp.ge.s32.totalorder %s10360_s15, 2 }
  0x68   : > { %p327_p10 = scmp.eq.s32.totalorder %s326_s16, 0  ;;  %p342_p11 = scmp.ne.s32.totalorder %s8181_s28, %s8177_s3 }
  0x69   : > { %p7124_p12 = scmp.lt.s32.totalorder %s8205_s1, 4  ;;  %s10362_s15 = smov (%p58_p3, %s10360_s15), 0 }
  0x6a   : > { %10292 = sst [smem:[#allocation32_spill]] %s10362_s15  ;;  %p10294_p13 = scmp.ne.s32.totalorder %s10284_s25, 0 }
  0x6b   : > { %s8465_s27 = scalar_select %p327_p10, %s8185_s29, %s329_s8  }
  0x6c   : > { %p8469_p0 = por %p10294_p13, %p342_p11  ;;  %s8474_s21 = sand.u32 1, %s8205_s1  }
  0x6d   : > { %10293 = sst [smem:[#allocation33_spill]] %s8465_s27  ;;  %s756_s24 = sand.u32 1, %s8185_s29  }
  0x6e   : > { %s10295_s2 = scalar_select %p8469_p0, 1, 0 }
  0x6f   : > { %s8477_s7 = sshll.u32 %s756_s24, 1  ;;  %s8480_s10 = sshll.u32 %s8197_s0, 5 }
  0x70   : > { %10296 = sst [smem:[#allocation34_spill]] %s10295_s2  ;;  %s10297_s11 = sld [smem:[#allocation46_spill]] }
  0x71   : > { %s758_s19 = scalar_lea.vmem [#allocation8], %s8477_s7  ;;  %p8491_p2 = pnand %p7124_p12, %p8455_p1 }
  0x72   : > { %s766_s22 = sshll.u32 %s758_s19, 4  ;;  %s8495_s22 = int_to_ptr.vmem [resolvable:$true] %s766_s22 }
  0x73   : > { %s10298_s15 = scalar_select %p8491_p2, 1, 0 }
  0x74   : > { %p8502_p6 = pneg %p8491_p2 }
  0x76   : > { %s8486_s8 = scalar_lea.hbm %s10297_s11, %s8480_s10  ;;  %s7886_s16 = scalar_lea.hbm %s10297_s11, 64 }
  0x77   : > { %s7881_s14 = scalar_lea.hbm %s8486_s8, 32  ;;  %p7887_p1 = scmp.lt.u32.totalorder %s8486_s8, %s10297_s11 }
  0x78   : > { %p7882_p4 = scmp.ne.s32.totalorder %s8486_s8, %s7881_s14  ;;  %p7888_p3 = scmp.lt.u32.totalorder %s7886_s16, %s7881_s14 }
  0x79   : > { %s10299_s3 = scalar_select %p8502_p6, 1, 0 }
  0x7a   : > { %p7884_p8 = pnand %p8502_p6, %p7882_p4  ;;  %p7889_p10 = por %p7888_p3, %p7887_p1 }
  0x7b   : > { %p7890_p11 = scmp.lt.u32.totalorder %s7881_s14, %s8486_s8 }
  0x7c   : > { %p7885_p9 = pneg %p7884_p8 }
  0x7d   : > { %p7891_p12 = por %p7890_p11, %p7889_p10 }
  0x7f   : > { %p7892_p13 = pnand %p7891_p12, %p7885_p9 }
  0x81   : > { %7895 = shalt.err (!%p7892_p13)
}
  0x82   : > { %s7896_s24 = scalar_lea.vmem %s8495_s22, 32  ;;  %s8209_s19 = smov [#allocation8]  }
  0x83   : > { %p7897_p4 = scmp.ne.s32.totalorder %s8495_s22, %s7896_s24  ;;  %s7901_s6 = sshll.u32 %s8209_s19, 4  ;;  %s7902_s6 = int_to_ptr.vmem [resolvable:$false] %s7901_s6 }
  0x84   : > { %s7903_s0 = scalar_lea.vmem %s7902_s6, 64  ;;  %p7904_p5 = scmp.lt.s32.totalorder %s8495_s22, %s7902_s6 }
  0x85   : > { %p7899_p8 = pnand %p7897_p4, %p8502_p6  ;;  %p7905_p7 = scmp.lt.s32.totalorder %s7903_s0, %s7896_s24 }
  0x87   : > { %p7900_p0 = pneg %p7899_p8  ;;  %p7906_p1 = por %p7905_p7, %p7904_p5 }
  0x89   : > { %p7907_p3 = pnand %p7906_p1, %p7900_p0 }
  0x8b   : > { %7910 = shalt.err (!%p7907_p3)
}
  0x8c   : > { %s10300_s23 = scalar_lea.sflag [#allocation9], %s8474_s21  ;;  %s10301_s13 = sld [smem:[#allocation48_spill]] }
  0x8d   : > { %7106 = dma.hbm_to_vmem [thread:$0]  (!%p8491_p2), %s8486_s8, 32, %s8495_s22, %s10300_s23  }
  0x8e   : > { %s796_s24 = scalar_lea.vmem [#allocation11], %s8477_s7 }
  0x8f   : > { %s804_s6 = sshll.u32 %s796_s24, 4  ;;  %s805_s6 = int_to_ptr.vmem [resolvable:$true] %s804_s6 }
  0x92   : > { %s8531_s19 = scalar_lea.hbm %s10301_s13, %s8480_s10  ;;  %s7916_s8 = scalar_lea.hbm %s10301_s13, 64 }
  0x93   : > { %s7911_s11 = scalar_lea.hbm %s8531_s19, 32  ;;  %p7917_p9 = scmp.lt.u32.totalorder %s8531_s19, %s10301_s13 }
  0x94   : > { %p7912_p5 = scmp.ne.s32.totalorder %s8531_s19, %s7911_s11  ;;  %p7918_p10 = scmp.lt.u32.totalorder %s7916_s8, %s7911_s11 }
  0x95   : > { %p7920_p12 = scmp.lt.u32.totalorder %s7911_s11, %s8531_s19 }
  0x96   : > { %p7914_p7 = pnand %p7912_p5, %p8502_p6  ;;  %p7919_p11 = por %p7918_p10, %p7917_p9 }
  0x98   : > { %p7915_p0 = pneg %p7914_p7  ;;  %p7921_p13 = por %p7920_p12, %p7919_p11 }
  0x9a   : > { %p7922_p4 = pnand %p7921_p13, %p7915_p0 }
  0x9c   : > { %7925 = shalt.err (!%p7922_p4)
}
  0x9d   : > { %s7926_s16 = scalar_lea.vmem %s805_s6, 32  ;;  %s8210_s24 = smov [#allocation11]  }
  0x9e   : > { %p7927_p8 = scmp.ne.s32.totalorder %s805_s6, %s7926_s16  ;;  %s7931_s0 = sshll.u32 %s8210_s24, 4  ;;  %s7932_s0 = int_to_ptr.vmem [resolvable:$false] %s7931_s0 }
  0x9f   : > { %s7933_s27 = scalar_lea.vmem %s7932_s0, 64  ;;  %p7934_p5 = scmp.lt.s32.totalorder %s805_s6, %s7932_s0 }
  0xa0   : > { %p7929_p1 = pnand %p7927_p8, %p8502_p6  ;;  %p7935_p7 = scmp.lt.s32.totalorder %s7933_s27, %s7926_s16 }
  0xa2   : > { %p7930_p3 = pneg %p7929_p1  ;;  %p7936_p2 = por %p7935_p7, %p7934_p5 }
  0xa4   : > { %p7937_p9 = pnand %p7936_p2, %p7930_p3 }
  0xa6   : > { %7940 = shalt.err (!%p7937_p9)
}
  0xa7   : > { %p10302_p10 = scmp.ne.s32.totalorder %s10298_s15, 0  ;;  %s10303_s11 = scalar_lea.sflag [#allocation12], %s8474_s21 }
  0xa8   : > { %s8211_s22 = smov [#allocation3]   ;;  %s8212_s23 = smov [#allocation7]  }
  0xa9   : > { %7112 = dma.hbm_to_vmem [thread:$0]  (!%p10302_p10), %s8531_s19, 32, %s805_s6, %s10303_s11  }
  0xaa   : > { %s640_s8 = sshll.u32 %s8211_s22, 4  ;;  %s661_s14 = sshll.u32 %s8212_s23, 4  ;;  %s641_s8 = int_to_ptr.vmem [resolvable:$true] %s640_s8  ;;  %s662_s14 = int_to_ptr.vmem [resolvable:$true] %s661_s14 }
  0xab   : > { %s10304_s29 = sld [smem:[#allocation37_spill]]  ;;  %p10306_p0 = scmp.ne.s32.totalorder %s10288_s9, 0 }
  0xb1   : > { %s10305_s2 = smov %s10304_s29  ;;  %s7941_s0 = scalar_lea.hbm %s10304_s29, 32 }
  0xb2   : > { %p7942_p2 = scmp.ne.s32.totalorder %s10305_s2, %s7941_s0  ;;  %p7948_p13 = scmp.lt.u32.totalorder %s7941_s0, %s10305_s2 }
  0xb4   : > { %p7944_p11 = pnand %p7942_p2, %p10306_p0 }
  0xb6   : > { %p7945_p12 = pneg %p7944_p11 }
  0xb8   : > { %p7950_p4 = pnand %p7948_p13, %p7945_p12 }
  0xba   : > { %7953 = shalt.err (!%p7950_p4)
}
  0xbb   : > { %s7954_s19 = scalar_lea.vmem %s641_s8, 32  ;;  %p7962_p5 = scmp.lt.s32.totalorder %s641_s8, %s641_s8 }
  0xbc   : > { %p7955_p8 = scmp.ne.s32.totalorder %s641_s8, %s7954_s19  ;;  %p7963_p7 = scmp.lt.s32.totalorder %s7954_s19, %s7954_s19 }
  0xbe   : > { %p7957_p1 = pnand %p7955_p8, %p10306_p0  ;;  %p7964_p9 = por %p7963_p7, %p7962_p5 }
  0xc0   : > { %p7958_p3 = pneg %p7957_p1 }
  0xc2   : > { %p7965_p10 = pnand %p7964_p9, %p7958_p3 }
  0xc4   : > { %7968 = shalt.err (!%p7965_p10)
}
  0xc5   : > { %p10307_p2 = scmp.ne.s32.totalorder %s10286_s5, 0  ;;  %s10308_s6 = sld [smem:[#allocation39_spill]] }
  0xc7   : > { %7090 = dma.hbm_to_vmem [thread:$0]  (!%p10307_p2), %s10305_s2, 32, %s641_s8, [#allocation4]  }
  0xcb   : > { %s7969_s11 = scalar_lea.hbm %s10308_s6, 768 }
  0xcc   : > { %p7970_p11 = scmp.ne.s32.totalorder %s10308_s6, %s7969_s11  ;;  %p7976_p10 = scmp.lt.u32.totalorder %s7969_s11, %s10308_s6 }
  0xce   : > { %p7972_p12 = pnand %p7970_p11, %p10306_p0 }
  0xd0   : > { %p7973_p13 = pneg %p7972_p12 }
  0xd2   : > { %p7978_p4 = pnand %p7976_p10, %p7973_p13 }
  0xd4   : > { %7981 = shalt.err (!%p7978_p4)
}
  0xd5   : > { %s7982_s16 = scalar_lea.vmem %s662_s14, 768  ;;  %p7990_p5 = scmp.lt.s32.totalorder %s662_s14, %s662_s14 }
  0xd6   : > { %p7983_p8 = scmp.ne.s32.totalorder %s662_s14, %s7982_s16  ;;  %p7991_p7 = scmp.lt.s32.totalorder %s7982_s16, %s7982_s16 }
  0xd8   : > { %p7985_p1 = pnand %p7983_p8, %p10306_p0  ;;  %p7992_p9 = por %p7991_p7, %p7990_p5 }
  0xda   : > { %p7986_p3 = pneg %p7985_p1 }
  0xdc   : > { %p7993_p6 = pnand %p7992_p9, %p7986_p3 }
  0xde   : > { %7996 = shalt.err (!%p7993_p6)
}
  0xdf   : > { %s8213_s8 = smov 256   ;;  %s8214_s27 = smov 16  }
  0xe0   : > { %7096 = dma.hbm_to_vmem [thread:$0]  (!%p10307_p2), %s10308_s6, 768, %s662_s14, [#allocation6], %s8213_s8, %s8213_s8, %s8214_s27  }
  0xe1   : > { %s8215_s29 = smov [#allocation17]   ;;  %s10309_s12 = sld [smem:[#allocation47_spill]] }
  0xe2   : > { %s686_s30 = sshll.u32 %s8215_s29, 4  ;;  %s7997_s0 = scalar_lea.hbm %s10225_s20, 32  ;;  %s687_s30 = int_to_ptr.vmem [resolvable:$true] %s686_s30 }
  0xe3   : > { %p7998_p6 = scmp.ne.s32.totalorder %s10225_s20, %s7997_s0  ;;  %p8004_p13 = scmp.lt.u32.totalorder %s7997_s0, %s10225_s20 }
  0xe5   : > { %p8000_p11 = pnand %p7998_p6, %p10306_p0 }
  0xe7   : > { %s8594_s22 = scalar_lea.hbm %s10309_s12, %s8480_s10  ;;  %p8001_p12 = pneg %p8000_p11 }
  0xe9   : > { %p8006_p10 = pnand %p8004_p13, %p8001_p12 }
  0xeb   : > { %8009 = shalt.err (!%p8006_p10)
}
  0xec   : > { %s8010_s27 = scalar_lea.vmem %s687_s30, 32  ;;  %p8018_p3 = scmp.lt.s32.totalorder %s687_s30, %s687_s30 }
  0xed   : > { %p8011_p4 = scmp.ne.s32.totalorder %s687_s30, %s8010_s27  ;;  %p8019_p5 = scmp.lt.s32.totalorder %s8010_s27, %s8010_s27 }
  0xef   : > { %p8013_p8 = pnand %p8011_p4, %p10306_p0  ;;  %p8020_p7 = por %p8019_p5, %p8018_p3 }
  0xf1   : > { %p8014_p1 = pneg %p8013_p8 }
  0xf3   : > { %p8021_p9 = pnand %p8020_p7, %p8014_p1 }
  0xf5   : > { %8024 = shalt.err (!%p8021_p9)
}
  0xf6   : > { %7102 = dma.hbm_to_vmem [thread:$0]  (!%p10307_p2), %s10225_s20, 32, %s687_s30, [#allocation18]  }
  0xf7   : > { %s777_s9 = scalar_lea.vmem [#allocation10], %s8477_s7  ;;  %s10310_s17 = sld [smem:[#allocation52_spill]] }
  0xf8   : > { %s785_s13 = sshll.u32 %s777_s9, 4  ;;  %s8025_s5 = scalar_lea.hbm %s8594_s22, 32  ;;  %s786_s13 = int_to_ptr.vmem [resolvable:$true] %s785_s13 }
  0xf9   : > { %p8026_p0 = scmp.ne.s32.totalorder %s8594_s22, %s8025_s5  ;;  %p10311_p6 = scmp.ne.s32.totalorder %s10299_s3, 0 }
  0xfa   : > { %s8030_s0 = scalar_lea.hbm %s10309_s12, 64  ;;  %p8031_p2 = scmp.lt.u32.totalorder %s8594_s22, %s10309_s12 }
  0xfb   : > { %p8028_p11 = pnand %p8026_p0, %p10311_p6  ;;  %p8032_p13 = scmp.lt.u32.totalorder %s8030_s0, %s8025_s5 }
  0xfc   : > { %p8034_p4 = scmp.lt.u32.totalorder %s8025_s5, %s8594_s22 }
  0xfd   : > { %s8619_s11 = scalar_lea.hbm %s10310_s17, %s8480_s10  ;;  %p8029_p12 = pneg %p8028_p11 }
  0xfe   : > { %p8033_p10 = por %p8032_p13, %p8031_p2 }
 0x100   : > { %p8035_p8 = por %p8034_p4, %p8033_p10 }
 0x102   : > { %p8036_p1 = pnand %p8035_p8, %p8029_p12 }
 0x104   : > { %8039 = shalt.err (!%p8036_p1)
}
 0x105   : > { %s8040_s30 = scalar_lea.vmem %s786_s13, 32  ;;  %s8216_s8 = smov [#allocation10]  }
 0x106   : > { %p8041_p3 = scmp.ne.s32.totalorder %s786_s13, %s8040_s30  ;;  %s8045_s27 = sshll.u32 %s8216_s8, 4  ;;  %s8046_s27 = int_to_ptr.vmem [resolvable:$false] %s8045_s27 }
 0x107   : > { %s8047_s2 = scalar_lea.vmem %s8046_s27, 64  ;;  %p8048_p9 = scmp.lt.s32.totalorder %s786_s13, %s8046_s27 }
 0x108   : > { %p8043_p5 = pnand %p8041_p3, %p10311_p6  ;;  %p8049_p0 = scmp.lt.s32.totalorder %s8047_s2, %s8040_s30 }
 0x10a   : > { %p8044_p7 = pneg %p8043_p5  ;;  %p8050_p11 = por %p8049_p0, %p8048_p9 }
 0x10c   : > { %p8051_p2 = pnand %p8050_p11, %p8044_p7 }
 0x10e   : > { %8054 = shalt.err (!%p8051_p2)
}
 0x10f   : > { %p10312_p13 = scmp.ne.s32.totalorder %s10298_s15, 0  ;;  %s10313_s19 = scalar_lea.sflag [#allocation9], %s8474_s21 }
 0x110   : > { %s838_s9 = scalar_lea.vmem [#allocation13], %s8477_s7  ;;  %s8055_s4 = scalar_lea.hbm %s8619_s11, 32 }
 0x111   : > { %7109 = dma.hbm_to_vmem [thread:$0]  (!%p10312_p13), %s8594_s22, 32, %s786_s13, %s10313_s19  }
 0x112   : > { %s846_s29 = sshll.u32 %s838_s9, 4  ;;  %p8056_p12 = scmp.ne.s32.totalorder %s8619_s11, %s8055_s4  ;;  %s847_s29 = int_to_ptr.vmem [resolvable:$true] %s846_s29 }
 0x113   : > { %s8060_s24 = scalar_lea.hbm %s10310_s17, 64  ;;  %p8061_p8 = scmp.lt.u32.totalorder %s8619_s11, %s10310_s17 }
 0x114   : > { %p8058_p10 = pnand %p8056_p12, %p10311_p6  ;;  %p8062_p1 = scmp.lt.u32.totalorder %s8060_s24, %s8055_s4 }
 0x115   : > { %p8064_p5 = scmp.lt.u32.totalorder %s8055_s4, %s8619_s11 }
 0x116   : > { %p8059_p4 = pneg %p8058_p10  ;;  %p8063_p3 = por %p8062_p1, %p8061_p8 }
 0x118   : > { %p8065_p7 = por %p8064_p5, %p8063_p3 }
 0x11a   : > { %p8066_p9 = pnand %p8065_p7, %p8059_p4 }
 0x11c   : > { %8069 = shalt.err (!%p8066_p9)
}
 0x11d   : > { %s8070_s22 = scalar_lea.vmem %s847_s29, 32  ;;  %s8217_s13 = smov [#allocation13]  }
 0x11e   : > { %p8071_p0 = scmp.ne.s32.totalorder %s847_s29, %s8070_s22  ;;  %s8075_s14 = sshll.u32 %s8217_s13, 4  ;;  %s8076_s14 = int_to_ptr.vmem [resolvable:$false] %s8075_s14 }
 0x11f   : > { %s8077_s30 = scalar_lea.vmem %s8076_s14, 64  ;;  %p8078_p12 = scmp.lt.s32.totalorder %s847_s29, %s8076_s14 }
 0x120   : > { %p8073_p11 = pnand %p8071_p0, %p10311_p6  ;;  %p8079_p10 = scmp.lt.s32.totalorder %s8077_s30, %s8070_s22 }
 0x122   : > { %p8074_p2 = pneg %p8073_p11  ;;  %p8080_p13 = por %p8079_p10, %p8078_p12 }
 0x124   : > { %p8081_p1 = pnand %p8080_p13, %p8074_p2 }
 0x126   : > { %8084 = shalt.err (!%p8081_p1)
}
 0x127   : > { %p10314_p8 = scmp.ne.s32.totalorder %s10298_s15, 0  ;;  %s10315_s8 = scalar_lea.sflag [#allocation12], %s8474_s21 }
 0x128   : > { %s10316_s18 = sld [smem:[#allocation53_spill]]  ;;  %s857_s9 = scalar_lea.vmem [#allocation14], %s8477_s7 }
 0x129   : > { %7115 = dma.hbm_to_vmem [thread:$0]  (!%p10314_p8), %s8619_s11, 32, %s847_s29, %s10315_s8  }
 0x12a   : > { %s865_s4 = sshll.u32 %s857_s9, 4  ;;  %s854_s5 = scalar_lea.sflag [#allocation15], %s8474_s21  ;;  %s866_s4 = int_to_ptr.vmem [resolvable:$true] %s865_s4 }
 0x12e   : > { %s8664_s19 = scalar_lea.hbm %s10316_s18, %s8480_s10  ;;  %s8090_s29 = scalar_lea.hbm %s10316_s18, 64 }
 0x12f   : > { %s8085_s23 = scalar_lea.hbm %s8664_s19, 32  ;;  %p8091_p5 = scmp.lt.u32.totalorder %s8664_s19, %s10316_s18 }
 0x130   : > { %p8086_p13 = scmp.ne.s32.totalorder %s8664_s19, %s8085_s23  ;;  %p8092_p7 = scmp.lt.u32.totalorder %s8090_s29, %s8085_s23 }
 0x131   : > { %p8094_p0 = scmp.lt.u32.totalorder %s8085_s23, %s8664_s19 }
 0x132   : > { %p8088_p4 = pnand %p8086_p13, %p10311_p6  ;;  %p8093_p9 = por %p8092_p7, %p8091_p5 }
 0x134   : > { %p8089_p3 = pneg %p8088_p4  ;;  %p8095_p11 = por %p8094_p0, %p8093_p9 }
 0x136   : > { %p8096_p2 = pnand %p8095_p11, %p8089_p3 }
 0x138   : > { %8099 = shalt.err (!%p8096_p2)
}
 0x139   : > { %s8100_s21 = scalar_lea.vmem %s866_s4, 32  ;;  %s8218_s7 = smov [#allocation14]  }
 0x13a   : > { %p8101_p12 = scmp.ne.s32.totalorder %s866_s4, %s8100_s21  ;;  %s8105_s16 = sshll.u32 %s8218_s7, 4  ;;  %s8106_s16 = int_to_ptr.vmem [resolvable:$false] %s8105_s16 }
 0x13b   : > { %s8107_s22 = scalar_lea.vmem %s8106_s16, 64  ;;  %p8108_p13 = scmp.lt.s32.totalorder %s866_s4, %s8106_s16 }
 0x13c   : > { %p8103_p10 = pnand %p8101_p12, %p10311_p6  ;;  %p8109_p4 = scmp.lt.s32.totalorder %s8107_s22, %s8100_s21 }
 0x13e   : > { %p8104_p1 = pneg %p8103_p10  ;;  %p8110_p8 = por %p8109_p4, %p8108_p13 }
 0x140   : > { %p8111_p5 = pnand %p8110_p8, %p8104_p1 }
 0x142   : > { %8114 = shalt.err (!%p8111_p5)
}
 0x143   : > { %p10317_p7 = scmp.ne.s32.totalorder %s10298_s15, 0  ;;  %p10318_p3 = scmp.ne.s32.totalorder %s10285_s26, 0 }
 0x144   : > { %p10319_p9 = scmp.ne.s32.totalorder (!%p10318_p3), %s10284_s25, 0 }
 0x145   : > { %7118 = dma.hbm_to_vmem [thread:$0]  (!%p10317_p7), %s8664_s19, 32, %s866_s4, %s854_s5  }
 0x146   : > { %874 = sbr.rel (%p10318_p3) target bundleno = 4402 (0x1132), region = 108 }
 0x14d   : > { %8148 = dma.done.wait (%p10319_p9), [#allocation4], 32  }
 0x14e   : > { %8150 = vsyncadd (%p10319_p9), [#allocation4], 4294967264 }
 0x14f   : > { %8152 = dma.done.wait (%p10319_p9), [#allocation6], 800  }
 0x150   : > { %8154 = vsyncadd (%p10319_p9), [#allocation6], 4294966496  ;;  %s10320_s3 = sadd.s32 4294967295, %s8205_s1   ;;  %s10321_s15 = sld [smem:[#allocation34_spill]] }
 0x151   : > { %s888_s13 = sand.u32 1, %s10320_s3   ;;  %s890_s14 = sand.u32 1, %s8181_s28  }
 0x152   : > { %s8698_s26 = sshll.u32 %s890_s14, 1  ;;  %s889_s30 = scalar_lea.sflag [#allocation9], %s888_s13 }
 0x156   : > { %p10322_p6 = scmp.ne.s32.totalorder %s10321_s15, 0 }
 0x158   : > { %8156 = dma.done.wait (%p10322_p6), %s889_s30, 64  }
 0x159   : > { %8158 = vsyncadd (%p10322_p6), %s889_s30, 4294967232  ;;  %s907_s2 = scalar_lea.sflag [#allocation12], %s888_s13 }
 0x15a   : > { %8160 = dma.done.wait (%p10322_p6), %s907_s2, 64  }
 0x15b   : > { %8162 = vsyncadd (%p10322_p6), %s907_s2, 4294967232  ;;  %s925_s4 = scalar_lea.sflag [#allocation15], %s888_s13 }
 0x15c   : > { %8164 = dma.done.wait (%p10322_p6), %s925_s4, 32  }
 0x15d   : > { %8166 = vsyncadd (%p10322_p6), %s925_s4, 4294967264 }
 0x15e   : > { %8168 = dma.done.wait (%p10319_p9), [#allocation15], 32  }
 0x15f   : > { %8170 = vsyncadd (%p10319_p9), [#allocation15], 4294967264 }
 0x160   : > { %8172 = dma.done.wait (%p10319_p9), [#allocation18], 32  }
 0x161   : > { %8174 = vsyncadd (%p10319_p9), [#allocation18], 4294967264  ;;  %s10323_s23 = sld [smem:[#allocation28_spill]]  ;;  %s10324_s24 = sld [smem:[#allocation27_spill]] }
 0x162   : > { %s10327_s4 = sld [smem:[#allocation42_spill]]  ;;  %s10328_s27 = sld [smem:[#allocation35_spill]] }
 0x163   : > { %s10329_s21 = sld [smem:[#allocation45_spill]]  ;;  %s10330_s3 = sld [smem:[#allocation43_spill]] }
 0x164   : > { %s10333_s17 = sld [smem:[#allocation50_spill]]  ;;  %s10334_s16 = sld [smem:[#allocation51_spill]] }
 0x165   : > { %s10335_s30 = sld [smem:[#allocation56_spill]] }
 0x167   : > { %s1063_s11 = smul.u32 3, %s10323_s23  ;;  %p1070_p8 = scmp.lt.s32.totalorder %s10324_s24, 1 }
 0x168   : > { %p1110_p11 = scmp.lt.s32.totalorder %s10323_s23, 1  ;;  %p6338_p2 = scmp.ne.s32.totalorder %s10324_s24, 0 }
 0x169   : > { %p1064_p0 = scmp.lt.s32.totalorder %s1063_s11, 5 }
 0x16a   : > { %s1071_s29 = scalar_select %p1070_p8, %s10324_s24, 1 }
 0x16b   : > { %s10364_s11 = smov (!%p1064_p0, %s1063_s11), 5  ;;  %s10366_s23 = smov (!%p1110_p11, %s10323_s23), 1 }
 0x16c   : > { %s8729_s0 = sshll.u32 %s1071_s29, 1  ;;  %s7054_s10 = smul.u32 768, %s1071_s29 }
 0x16d   : > { %s7053_s25 = smul.u32 48, %s10364_s11  ;;  %s6831_s11 = sshll.u32 %s1071_s29, 8 }
 0x16e   : > { %s8742_s5 = scalar_lea.vmem %s10327_s4, %s7054_s10  ;;  %s7055_s6 = smul.u32 6, %s1071_s29 }
 0x16f   : > { %s8747_s8 = scalar_lea.vmem %s10328_s27, %s7053_s25  ;;  %s1095_s7 = scalar_lea.vmem %s10329_s21, %s8729_s0 }
 0x170   : > { %s8756_s15 = scalar_lea.vmem %s10330_s3, %s7055_s6  ;;  %s10331_s10 = sld [smem:[#allocation44_spill]]  ;;  %v1121_v46 = vld [vmem:[%s8747_s8 + $0x8] sm:$0xff] (!%p6338_p2)  ;;  %v1127_v49 = vld [vmem:[%s8747_s8 + $0x38] sm:$0xff] (!%p6338_p2) }
 0x171   : > { %s6832_s4 = sshll.u32 %s1071_s29, 10  ;;  %s6334_s19 = sshll.u32 %s1071_s29, 3  ;;  %v1139_v50 = vpack.c.bf16 (!%p6338_p2), %v1127_v49, %v1121_v46  ;;  %v1123_v51 = vld [vmem:[%s8747_s8 + $0x18] sm:$0xff] (!%p6338_p2)  ;;  %v1129_v52 = vld [vmem:[%s8747_s8 + $0x48] sm:$0xff] (!%p6338_p2) }
 0x172   : > { %s10332_s25 = sld [smem:[#allocation49_spill]]  ;;  %s8771_s21 = scalar_lea.vmem %s10333_s17, %s6334_s19  ;;  %v1141_v55 = vpack.c.bf16 (!%p6338_p2), %v1129_v52, %v1123_v51 }
 0x173   : > { %s8776_s3 = scalar_lea.vmem %s10334_s16, %s6832_s4  ;;  %1119 = sbr.rel (%p6338_p2) target bundleno = 728 (0x2d8), region = 152  ;;  %1770 = vmatprep.mubr.bf16.mxu1 (!%p6338_p2), %v1139_v50 }
 0x174   : > { %s10336_s19 = sld [smem:[#allocation36_spill]] (!%p6338_p2)  ;;  %1821 = vmatprep.mubr.bf16.mxu0 (!%p6338_p2), %v1141_v55 }
 0x176   : > { %s8761_s2 = scalar_lea.vmem %s10331_s10, %s6831_s11  ;;  %s7056_s11 = smul.u32 24, %s10366_s23 }
 0x178   : > { %s8766_s14 = scalar_lea.vmem %s10332_s25, %s6832_s4  ;;  %s8784_s10 = scalar_lea.vmem %s10335_s30, %s7056_s11 }
 0x17a   : > { %v7201_v0 = vld [vmem:[%s10336_s19 + $0x4] ss:$8 sps:$4 sm:$0xff]   ;;  %v7205_v2 = vld [vmem:[%s10336_s19] ss:$8 sps:$4 sm:$0xff]   ;;  %v7207_v4 = vld [vmem:[%s10336_s19 + $0x14] ss:$8 sps:$4 sm:$0xff]  }
 0x17b   : > { %v7203_v1 = vld [vmem:[%s10336_s19 + $0x104] ss:$8 sps:$4 sm:$0xff]   ;;  %1738 = vmatprep.subr.bf16.mxu1 %v7201_v0  ;;  %v7206_v3 = vld [vmem:[%s10336_s19 + $0x100] ss:$8 sps:$4 sm:$0xff]   ;;  %v7209_v5 = vld [vmem:[%s10336_s19 + $0x114] ss:$8 sps:$4 sm:$0xff]  }
 0x17c   : > { %1789 = vmatprep.subr.bf16.mxu0 %v7203_v1  ;;  %1739 = vmatpush1.bf16.msra.mxu1 %v7205_v2  ;;  %v7211_v6 = vld [vmem:[%s10336_s19 + $0x10] ss:$8 sps:$4 sm:$0xff]   ;;  %v7213_v8 = vld [vmem:[%s10336_s19 + $0x24] ss:$8 sps:$4 sm:$0xff]   ;;  %v7217_v10 = vld [vmem:[%s10336_s19 + $0x20] ss:$8 sps:$4 sm:$0xff]  }
 0x17d   : > { %1790 = vmatpush1.bf16.msra.mxu0 %v7206_v3  ;;  %1740 = vmatprep.subr.bf16.mxu1 %v7207_v4  ;;  %v7212_v7 = vld [vmem:[%s10336_s19 + $0x110] ss:$8 sps:$4 sm:$0xff]   ;;  %v7215_v9 = vld [vmem:[%s10336_s19 + $0x124] ss:$8 sps:$4 sm:$0xff]   ;;  %v7218_v11 = vld [vmem:[%s10336_s19 + $0x120] ss:$8 sps:$4 sm:$0xff]  }
 0x17e   : > { %1791 = vmatprep.subr.bf16.mxu0 %v7209_v5  ;;  %v7219_v12 = vld [vmem:[%s10336_s19 + $0x34] ss:$8 sps:$4 sm:$0xff]   ;;  %v7223_v14 = vld [vmem:[%s10336_s19 + $0x30] ss:$8 sps:$4 sm:$0xff]   ;;  %v7225_v16 = vld [vmem:[%s10336_s19 + $0x44] ss:$8 sps:$4 sm:$0xff]  }
 0x17f   : > { %v7221_v13 = vld [vmem:[%s10336_s19 + $0x134] ss:$8 sps:$4 sm:$0xff]   ;;  %v7224_v15 = vld [vmem:[%s10336_s19 + $0x130] ss:$8 sps:$4 sm:$0xff]   ;;  %v7227_v17 = vld [vmem:[%s10336_s19 + $0x144] ss:$8 sps:$4 sm:$0xff]  }
 0x180   : > { %1741 = vmatpush1.bf16.msra.mxu1 %v7211_v6  ;;  %v7229_v18 = vld [vmem:[%s10336_s19 + $0x40] ss:$8 sps:$4 sm:$0xff]   ;;  %v7231_v20 = vld [vmem:[%s10336_s19 + $0x54] ss:$8 sps:$4 sm:$0xff]   ;;  %v7235_v22 = vld [vmem:[%s10336_s19 + $0x50] ss:$8 sps:$4 sm:$0xff]  }
 0x181   : > { %1792 = vmatpush1.bf16.msra.mxu0 %v7212_v7  ;;  %1742 = vmatprep.subr.bf16.mxu1 %v7213_v8  ;;  %v7230_v19 = vld [vmem:[%s10336_s19 + $0x140] ss:$8 sps:$4 sm:$0xff]   ;;  %v7233_v21 = vld [vmem:[%s10336_s19 + $0x154] ss:$8 sps:$4 sm:$0xff]   ;;  %v7236_v23 = vld [vmem:[%s10336_s19 + $0x150] ss:$8 sps:$4 sm:$0xff]  }
 0x182   : > { %1793 = vmatprep.subr.bf16.mxu0 %v7215_v9  ;;  %v7237_v24 = vld [vmem:[%s10336_s19 + $0x64] ss:$8 sps:$4 sm:$0xff]   ;;  %v7241_v26 = vld [vmem:[%s10336_s19 + $0x60] ss:$8 sps:$4 sm:$0xff]   ;;  %v7243_v28 = vld [vmem:[%s10336_s19 + $0x74] ss:$8 sps:$4 sm:$0xff]  }
 0x183   : > { %v7239_v25 = vld [vmem:[%s10336_s19 + $0x164] ss:$8 sps:$4 sm:$0xff]   ;;  %v7242_v27 = vld [vmem:[%s10336_s19 + $0x160] ss:$8 sps:$4 sm:$0xff]   ;;  %v7245_v29 = vld [vmem:[%s10336_s19 + $0x174] ss:$8 sps:$4 sm:$0xff]  }
 0x184   : > { %1743 = vmatpush1.bf16.msra.mxu1 %v7217_v10  ;;  %v7247_v30 = vld [vmem:[%s10336_s19 + $0x70] ss:$8 sps:$4 sm:$0xff]   ;;  %v7249_v32 = vld [vmem:[%s10336_s19 + $0x84] ss:$8 sps:$4 sm:$0xff]   ;;  %v7253_v34 = vld [vmem:[%s10336_s19 + $0x80] ss:$8 sps:$4 sm:$0xff]  }
 0x185   : > { %1794 = vmatpush1.bf16.msra.mxu0 %v7218_v11  ;;  %1744 = vmatprep.subr.bf16.mxu1 %v7219_v12  ;;  %v7248_v31 = vld [vmem:[%s10336_s19 + $0x170] ss:$8 sps:$4 sm:$0xff]   ;;  %v7251_v33 = vld [vmem:[%s10336_s19 + $0x184] ss:$8 sps:$4 sm:$0xff]   ;;  %v7254_v35 = vld [vmem:[%s10336_s19 + $0x180] ss:$8 sps:$4 sm:$0xff]  }
 0x186   : > { %1795 = vmatprep.subr.bf16.mxu0 %v7221_v13  ;;  %v7255_v36 = vld [vmem:[%s10336_s19 + $0x94] ss:$8 sps:$4 sm:$0xff]   ;;  %v7259_v38 = vld [vmem:[%s10336_s19 + $0x90] ss:$8 sps:$4 sm:$0xff]   ;;  %v7261_v40 = vld [vmem:[%s10336_s19 + $0xa4] ss:$8 sps:$4 sm:$0xff]  }
 0x187   : > { %v7257_v37 = vld [vmem:[%s10336_s19 + $0x194] ss:$8 sps:$4 sm:$0xff]   ;;  %v7260_v39 = vld [vmem:[%s10336_s19 + $0x190] ss:$8 sps:$4 sm:$0xff]   ;;  %v7263_v41 = vld [vmem:[%s10336_s19 + $0x1a4] ss:$8 sps:$4 sm:$0xff]  }
 0x188   : > { %1745 = vmatpush1.bf16.msra.mxu1 %v7223_v14  ;;  %v7265_v42 = vld [vmem:[%s10336_s19 + $0xa0] ss:$8 sps:$4 sm:$0xff]   ;;  %v7267_v44 = vld [vmem:[%s10336_s19 + $0xb4] ss:$8 sps:$4 sm:$0xff]   ;;  %v7271_v47 = vld [vmem:[%s10336_s19 + $0xb0] ss:$8 sps:$4 sm:$0xff]  }
 0x189   : > { %1796 = vmatpush1.bf16.msra.mxu0 %v7224_v15  ;;  %1746 = vmatprep.subr.bf16.mxu1 %v7225_v16  ;;  %v7266_v43 = vld [vmem:[%s10336_s19 + $0x1a0] ss:$8 sps:$4 sm:$0xff]   ;;  %v7269_v45 = vld [vmem:[%s10336_s19 + $0x1b4] ss:$8 sps:$4 sm:$0xff]   ;;  %v7272_v48 = vld [vmem:[%s10336_s19 + $0x1b0] ss:$8 sps:$4 sm:$0xff]  }
 0x18a   : > { %1797 = vmatprep.subr.bf16.mxu0 %v7227_v17  ;;  %v7273_v53 = vld [vmem:[%s10336_s19 + $0xc4] ss:$8 sps:$4 sm:$0xff]   ;;  %v7277_v56 = vld [vmem:[%s10336_s19 + $0xc0] ss:$8 sps:$4 sm:$0xff]   ;;  %v7279_v58 = vld [vmem:[%s10336_s19 + $0xd4] ss:$8 sps:$4 sm:$0xff]  }
 0x18b   : > { %v7275_v54 = vld [vmem:[%s10336_s19 + $0x1c4] ss:$8 sps:$4 sm:$0xff]   ;;  %v7278_v57 = vld [vmem:[%s10336_s19 + $0x1c0] ss:$8 sps:$4 sm:$0xff]   ;;  %v7281_v59 = vld [vmem:[%s10336_s19 + $0x1d4] ss:$8 sps:$4 sm:$0xff]  }
 0x18c   : > { %1747 = vmatpush1.bf16.msra.mxu1 %v7229_v18  ;;  %v7283_v60 = vld [vmem:[%s10336_s19 + $0xd0] ss:$8 sps:$4 sm:$0xff]   ;;  %v7285_v62 = vld [vmem:[%s10336_s19 + $0xe4] ss:$8 sps:$4 sm:$0xff]   ;;  %v7289_v0 = vld [vmem:[%s10336_s19 + $0xe0] ss:$8 sps:$4 sm:$0xff]  }
 0x18d   : > { %1798 = vmatpush1.bf16.msra.mxu0 %v7230_v19  ;;  %1748 = vmatprep.subr.bf16.mxu1 %v7231_v20  ;;  %v7284_v61 = vld [vmem:[%s10336_s19 + $0x1d0] ss:$8 sps:$4 sm:$0xff]   ;;  %v7287_v63 = vld [vmem:[%s10336_s19 + $0x1e4] ss:$8 sps:$4 sm:$0xff]   ;;  %v7290_v1 = vld [vmem:[%s10336_s19 + $0x1e0] ss:$8 sps:$4 sm:$0xff]  }
 0x18e   : > { %1799 = vmatprep.subr.bf16.mxu0 %v7233_v21  ;;  %v7291_v2 = vld [vmem:[%s10336_s19 + $0xf4] ss:$8 sps:$4 sm:$0xff]   ;;  %v7295_v4 = vld [vmem:[%s10336_s19 + $0xf0] ss:$8 sps:$4 sm:$0xff]   ;;  %v1120_v6 = vld [vmem:[%s8747_s8] sm:$0xff] }
 0x18f   : > { %v7293_v3 = vld [vmem:[%s10336_s19 + $0x1f4] ss:$8 sps:$4 sm:$0xff]   ;;  %v7296_v5 = vld [vmem:[%s10336_s19 + $0x1f0] ss:$8 sps:$4 sm:$0xff]   ;;  %v1128_v9 = vld [vmem:[%s8747_s8 + $0x40] sm:$0xff] }
 0x190   : > { %1749 = vmatpush1.bf16.msra.mxu1 %v7235_v22  ;;  %v1126_v7 = vld [vmem:[%s8747_s8 + $0x30] sm:$0xff]  ;;  %v7299_v10 = vld [vmem:[%s10336_s19 + $0x204] ss:$8 sps:$4 sm:$0xff]   ;;  %v1135_v14 = vld [vmem:[%s8747_s8 + $0x78] sm:$0xff] }
 0x191   : > { %1800 = vmatpush1.bf16.msra.mxu0 %v7236_v23  ;;  %1750 = vmatprep.subr.bf16.mxu1 %v7237_v24  ;;  %v1122_v8 = vld [vmem:[%s8747_s8 + $0x10] sm:$0xff]  ;;  %v1133_v11 = vld [vmem:[%s8747_s8 + $0x68] sm:$0xff]  ;;  %v1138_v12 = vpack.c.bf16 %v1126_v7, %v1120_v6  ;;  %v1147_v18 = vpack.c.bf16 %v1135_v14, %v1135_v14  ;;  %v1132_v20 = vld [vmem:[%s8747_s8 + $0x60] sm:$0xff] }
 0x192   : > { %1801 = vmatprep.subr.bf16.mxu0 %v7239_v25  ;;  %v1140_v13 = vpack.c.bf16 %v1128_v9, %v1122_v8  ;;  %v7297_v15 = vld [vmem:[%s10336_s19 + $0x200] ss:$8 sps:$4 sm:$0xff]   ;;  %v7302_v16 = vld [vmem:[%s10336_s19 + $0x214] ss:$8 sps:$4 sm:$0xff]   ;;  %v1145_v17 = vpack.c.bf16 %v1133_v11, %v1133_v11  ;;  %v7300_v19 = vld [vmem:[%s10336_s19 + $0x210] ss:$8 sps:$4 sm:$0xff]   ;;  %v1144_v23 = vpack.c.bf16 %v1132_v20, %v1132_v20 }
 0x193   : > { %v1134_v21 = vld [vmem:[%s8747_s8 + $0x70] sm:$0xff]  ;;  %v7305_v22 = vld [vmem:[%s10336_s19 + $0x224] ss:$8 sps:$4 sm:$0xff]   ;;  %v7327_v46 = vld [vmem:[%s10336_s19 + $0x2a0] ss:$8 sps:$4 sm:$0xff]  }
 0x194   : > { %1751 = vmatpush1.bf16.msra.mxu1 %v7241_v26  ;;  %v1146_v24 = vpack.c.bf16 %v1134_v21, %v1134_v21  ;;  %v1125_v25 = vld [vmem:[%s8747_s8 + $0x28] sm:$0xff]  ;;  %v1131_v26 = vld [vmem:[%s8747_s8 + $0x58] sm:$0xff]  ;;  %v1898_v21 = vld [vmem:[#allocation5] sm:$0x3] }
 0x195   : > { %1802 = vmatpush1.bf16.msra.mxu0 %v7242_v27  ;;  %1752 = vmatprep.subr.bf16.mxu1 %v7243_v28  ;;  %v1137_v27 = vld [vmem:[%s8747_s8 + $0x88] sm:$0xff]  ;;  %v7338_v51 = vld [vmem:[%s10336_s19 + $0x2d4] ss:$8 sps:$4 sm:$0xff]   ;;  %v7336_v52 = vld [vmem:[%s10336_s19 + $0x2d0] ss:$8 sps:$4 sm:$0xff]  }
 0x196   : > { %1803 = vmatprep.subr.bf16.mxu0 %v7245_v29  ;;  %v7303_v28 = vld [vmem:[%s10336_s19 + $0x220] ss:$8 sps:$4 sm:$0xff]   ;;  %v7308_v29 = vld [vmem:[%s10336_s19 + $0x234] ss:$8 sps:$4 sm:$0xff]   ;;  %v7335_v49 = vld [vmem:[%s10336_s19 + $0x2c4] ss:$8 sps:$4 sm:$0xff]  }
 0x197   : > { %v7333_v50 = vld [vmem:[%s10336_s19 + $0x2c0] ss:$8 sps:$4 sm:$0xff]   ;;  %v7344_v55 = vld [vmem:[%s10336_s19 + $0x2f4] ss:$8 sps:$4 sm:$0xff]  }
 0x198   : > { %1753 = vmatpush1.bf16.msra.mxu1 %v7247_v30  ;;  %v1143_v30 = vpack.c.bf16 %v1131_v26, %v1125_v25 }
 0x199   : > { %1804 = vmatpush1.bf16.msra.mxu0 %v7248_v31  ;;  %1754 = vmatprep.subr.bf16.mxu1 %v7249_v32  ;;  %v1149_v31 = vpack.c.bf16 %v1137_v27, %v1137_v27  ;;  %v7306_v32 = vld [vmem:[%s10336_s19 + $0x230] ss:$8 sps:$4 sm:$0xff]  }
 0x19a   : > { %1805 = vmatprep.subr.bf16.mxu0 %v7251_v33  ;;  %v7311_v33 = vld [vmem:[%s10336_s19 + $0x244] ss:$8 sps:$4 sm:$0xff]  }
 0x19c   : > { %1755 = vmatpush1.bf16.msra.mxu1 %v7253_v34  ;;  %v7309_v34 = vld [vmem:[%s10336_s19 + $0x240] ss:$8 sps:$4 sm:$0xff]  }
 0x19d   : > { %1806 = vmatpush1.bf16.msra.mxu0 %v7254_v35  ;;  %1756 = vmatprep.subr.bf16.mxu1 %v7255_v36  ;;  %v7314_v35 = vld [vmem:[%s10336_s19 + $0x254] ss:$8 sps:$4 sm:$0xff]   ;;  %v7312_v36 = vld [vmem:[%s10336_s19 + $0x250] ss:$8 sps:$4 sm:$0xff]  }
 0x19e   : > { %1807 = vmatprep.subr.bf16.mxu0 %v7257_v37  ;;  %v7317_v37 = vld [vmem:[%s10336_s19 + $0x264] ss:$8 sps:$4 sm:$0xff]  }
 0x1a0   : > { %1757 = vmatpush1.bf16.msra.mxu1 %v7259_v38  ;;  %v7315_v38 = vld [vmem:[%s10336_s19 + $0x260] ss:$8 sps:$4 sm:$0xff]  }
 0x1a1   : > { %1808 = vmatpush1.bf16.msra.mxu0 %v7260_v39  ;;  %1758 = vmatprep.subr.bf16.mxu1 %v7261_v40  ;;  %v7320_v39 = vld [vmem:[%s10336_s19 + $0x274] ss:$8 sps:$4 sm:$0xff]   ;;  %v7318_v40 = vld [vmem:[%s10336_s19 + $0x270] ss:$8 sps:$4 sm:$0xff]  }
 0x1a2   : > { %1809 = vmatprep.subr.bf16.mxu0 %v7263_v41  ;;  %v7323_v41 = vld [vmem:[%s10336_s19 + $0x284] ss:$8 sps:$4 sm:$0xff]  }
 0x1a4   : > { %1759 = vmatpush1.bf16.msra.mxu1 %v7265_v42  ;;  %v7321_v42 = vld [vmem:[%s10336_s19 + $0x280] ss:$8 sps:$4 sm:$0xff]  }
 0x1a5   : > { %1810 = vmatpush1.bf16.msra.mxu0 %v7266_v43  ;;  %1760 = vmatprep.subr.bf16.mxu1 %v7267_v44  ;;  %v7326_v43 = vld [vmem:[%s10336_s19 + $0x294] ss:$8 sps:$4 sm:$0xff]   ;;  %v7324_v44 = vld [vmem:[%s10336_s19 + $0x290] ss:$8 sps:$4 sm:$0xff]  }
 0x1a6   : > { %1811 = vmatprep.subr.bf16.mxu0 %v7269_v45  ;;  %v7329_v45 = vld [vmem:[%s10336_s19 + $0x2a4] ss:$8 sps:$4 sm:$0xff]  }
 0x1a8   : > { %1761 = vmatpush1.bf16.msra.mxu1 %v7271_v47  ;;  %v7332_v47 = vld [vmem:[%s10336_s19 + $0x2b4] ss:$8 sps:$4 sm:$0xff]  }
 0x1a9   : > { %1812 = vmatpush1.bf16.msra.mxu0 %v7272_v48  ;;  %1762 = vmatprep.subr.bf16.mxu1 %v7273_v53  ;;  %v7330_v48 = vld [vmem:[%s10336_s19 + $0x2b0] ss:$8 sps:$4 sm:$0xff]   ;;  %v7341_v53 = vld [vmem:[%s10336_s19 + $0x2e4] ss:$8 sps:$4 sm:$0xff]  }
 0x1aa   : > { %1813 = vmatprep.subr.bf16.mxu0 %v7275_v54  ;;  %v7339_v54 = vld [vmem:[%s10336_s19 + $0x2e0] ss:$8 sps:$4 sm:$0xff]  }
 0x1ac   : > { %1763 = vmatpush1.bf16.msra.mxu1 %v7277_v56  ;;  %v7342_v56 = vld [vmem:[%s10336_s19 + $0x2f0] ss:$8 sps:$4 sm:$0xff]  }
 0x1ad   : > { %1814 = vmatpush1.bf16.msra.mxu0 %v7278_v57  ;;  %1764 = vmatprep.subr.bf16.mxu1 %v7279_v58  ;;  %v1124_v57 = vld [vmem:[%s8747_s8 + $0x20] sm:$0xff]  ;;  %v1130_v58 = vld [vmem:[%s8747_s8 + $0x50] sm:$0xff] }
 0x1ae   : > { %1815 = vmatprep.subr.bf16.mxu0 %v7281_v59  ;;  %v1136_v59 = vld [vmem:[%s8747_s8 + $0x80] sm:$0xff] }
 0x1b0   : > { %1765 = vmatpush1.bf16.msra.mxu1 %v7283_v60  ;;  %v1142_v60 = vpack.c.bf16 %v1130_v58, %v1124_v57 }
 0x1b1   : > { %1816 = vmatpush1.bf16.msra.mxu0 %v7284_v61  ;;  %1766 = vmatprep.subr.bf16.mxu1 %v7285_v62  ;;  %v1148_v61 = vpack.c.bf16 %v1136_v59, %v1136_v59  ;;  %v1248_v62 = vlaneseq }
 0x1b2   : > { %1817 = vmatprep.subr.bf16.mxu0 %v7287_v63 }
 0x1b3   : > { %v1249_v63 = vshrl.u32 %v1248_v62, 7 }
 0x1b4   : > { %1767 = vmatpush1.bf16.msra.mxu1 %v7289_v0 }
 0x1b5   : > { %1818 = vmatpush1.bf16.msra.mxu0 %v7290_v1  ;;  %1768 = vmatprep.subr.bf16.mxu1 %v7291_v2  ;;  %v1254_v6 = vsub.s32 1, %v1249_v63  ;;  %vm1895_vm0 = vcmp.eq.s32.totalorder %v1249_v63, 0 }
 0x1b6   : > { %1819 = vmatprep.subr.bf16.mxu0 %v7293_v3  ;;  %v1250_v3 = vsub.s32 0, %v1249_v63 }
 0x1b7   : > { %v1928_v26 = vrot.slane %v1898_v21, %v1254_v6 }
 0x1b8   : > { %1769 = vmatpush1.bf16.msra.mxu1 %v7295_v4 }
 0x1b9   : > { %1820 = vmatpush1.bf16.msra.mxu0 %v7296_v5  ;;  %6955 = vmatprep.subr.bf16.mxu1 %v7299_v10  ;;  %v1246_v5 = vld [vmem:[#allocation3] sm:$0x3] }
 0x1ba   : > { %1840 = vmatprep.subr.bf16.mxu0 %v7299_v10  ;;  %v1251_v7 = vrot.slane %v1246_v5, %v1250_v3  ;;  %v1255_v8 = vrot.slane %v1246_v5, %v1254_v6 }
 0x1bb   : > { %1771 = vmatmul.mubr.bf16.vlgmr.msra.gmra.mrb[0].mxu1 %v1138_v12 }
 0x1bc   : > { %1822 = vmatmul.mubr.bf16.vlgmr.msra.gmra.mrb[0].mxu0 %v1140_v13  ;;  %6971 = vmatpush1.bf16.msra.mxu1 %v7297_v15 }
 0x1bd   : > { %1841 = vmatpush1.bf16.msra.mxu0 %v7297_v15  ;;  %6956 = vmatprep.subr.bf16.mxu1 %v7302_v16 }
 0x1be   : > { %1842 = vmatprep.subr.bf16.mxu0 %v7302_v16  ;;  %1780 = vmatprep.mubr.bf16.mxu1 %v1145_v17 }
 0x1bf   : > { %1831 = vmatprep.mubr.bf16.mxu0 %v1147_v18 }
 0x1c0   : > { %6972 = vmatpush1.bf16.msra.mxu1 %v7300_v19 }
 0x1c1   : > { %1843 = vmatpush1.bf16.msra.mxu0 %v7300_v19  ;;  %6957 = vmatprep.subr.bf16.mxu1 %v7305_v22 }
 0x1c2   : > { %1844 = vmatprep.subr.bf16.mxu0 %v7305_v22  ;;  %v1894_v22 = vadd.s32 16, %v1249_v63 }
 0x1c3   : > { %1781 = vmatmul.mubr.bf16.gmra.mrb[4].mxu1 %v1144_v23 }
 0x1c4   : > { %1832 = vmatmul.mubr.bf16.gmra.mrb[4].mxu0 %v1146_v24  ;;  %6973 = vmatpush1.bf16.msra.mxu1 %v7303_v28  ;;  %v1924_v24 = vrot.slane %v1898_v21, %v1250_v3  ;;  %vm1901_vm1 = vcmp.lt.s32.totalorder %v1894_v22, 17 }
 0x1c5   : > { %1845 = vmatpush1.bf16.msra.mxu0 %v7303_v28  ;;  %6958 = vmatprep.subr.bf16.mxu1 %v7308_v29 }
 0x1c6   : > { %1846 = vmatprep.subr.bf16.mxu0 %v7308_v29  ;;  %1872 = vmatprep.mubr.bf16.mxu0 %v1143_v30 }
 0x1c7   : > { %1882 = vmatprep.mubr.bf16.mxu1 %v1149_v31  ;;  %v1937_v31 = vld [vmem:[#allocation7] sm:$0xff] }
 0x1c8   : > { %6974 = vmatpush1.bf16.msra.mxu1 %v7306_v32 }
 0x1c9   : > { %1847 = vmatpush1.bf16.msra.mxu0 %v7306_v32  ;;  %6959 = vmatprep.subr.bf16.mxu1 %v7311_v33 }
 0x1ca   : > { %1848 = vmatprep.subr.bf16.mxu0 %v7311_v33  ;;  %v1941_v33 = vld [vmem:[#allocation7 + $0x20] sm:$0xff] }
 0x1cc   : > { %6975 = vmatpush1.bf16.msra.mxu1 %v7309_v34 }
 0x1cd   : > { %1849 = vmatpush1.bf16.msra.mxu0 %v7309_v34  ;;  %6960 = vmatprep.subr.bf16.mxu1 %v7314_v35 }
 0x1ce   : > { %1850 = vmatprep.subr.bf16.mxu0 %v7314_v35 }
 0x1d0   : > { %6976 = vmatpush1.bf16.msra.mxu1 %v7312_v36 }
 0x1d1   : > { %1851 = vmatpush1.bf16.msra.mxu0 %v7312_v36  ;;  %6961 = vmatprep.subr.bf16.mxu1 %v7317_v37 }
 0x1d2   : > { %1852 = vmatprep.subr.bf16.mxu0 %v7317_v37  ;;  %v1938_v37 = vld [vmem:[#allocation7 + $0x8] sm:$0xff] }
 0x1d4   : > { %6977 = vmatpush1.bf16.msra.mxu1 %v7315_v38 }
 0x1d5   : > { %1853 = vmatpush1.bf16.msra.mxu0 %v7315_v38  ;;  %6962 = vmatprep.subr.bf16.mxu1 %v7320_v39 }
 0x1d6   : > { %1854 = vmatprep.subr.bf16.mxu0 %v7320_v39  ;;  %v1942_v39 = vld [vmem:[#allocation7 + $0x28] sm:$0xff] }
 0x1d8   : > { %6978 = vmatpush1.bf16.msra.mxu1 %v7318_v40 }
 0x1d9   : > { %1855 = vmatpush1.bf16.msra.mxu0 %v7318_v40  ;;  %6963 = vmatprep.subr.bf16.mxu1 %v7323_v41 }
 0x1da   : > { %1856 = vmatprep.subr.bf16.mxu0 %v7323_v41  ;;  %v1939_v41 = vld [vmem:[#allocation7 + $0x10] sm:$0xff] }
 0x1dc   : > { %6979 = vmatpush1.bf16.msra.mxu1 %v7321_v42 }
 0x1dd   : > { %1857 = vmatpush1.bf16.msra.mxu0 %v7321_v42  ;;  %6964 = vmatprep.subr.bf16.mxu1 %v7326_v43 }
 0x1de   : > { %1858 = vmatprep.subr.bf16.mxu0 %v7326_v43 }
 0x1e0   : > { %6980 = vmatpush1.bf16.msra.mxu1 %v7324_v44 }
 0x1e1   : > { %1859 = vmatpush1.bf16.msra.mxu0 %v7324_v44  ;;  %6965 = vmatprep.subr.bf16.mxu1 %v7329_v45 }
 0x1e2   : > { %1860 = vmatprep.subr.bf16.mxu0 %v7329_v45 }
 0x1e4   : > { %6981 = vmatpush1.bf16.msra.mxu1 %v7327_v46 }
 0x1e5   : > { %1861 = vmatpush1.bf16.msra.mxu0 %v7327_v46  ;;  %6966 = vmatprep.subr.bf16.mxu1 %v7332_v47 }
 0x1e6   : > { %1862 = vmatprep.subr.bf16.mxu0 %v7332_v47 }
 0x1e8   : > { %6982 = vmatpush1.bf16.msra.mxu1 %v7330_v48 }
 0x1e9   : > { %1863 = vmatpush1.bf16.msra.mxu0 %v7330_v48  ;;  %6967 = vmatprep.subr.bf16.mxu1 %v7335_v49 }
 0x1ea   : > { %1864 = vmatprep.subr.bf16.mxu0 %v7335_v49 }
 0x1ec   : > { %6983 = vmatpush1.bf16.msra.mxu1 %v7333_v50 }
 0x1ed   : > { %1865 = vmatpush1.bf16.msra.mxu0 %v7333_v50  ;;  %6968 = vmatprep.subr.bf16.mxu1 %v7338_v51 }
 0x1ee   : > { %1866 = vmatprep.subr.bf16.mxu0 %v7338_v51 }
 0x1f0   : > { %6984 = vmatpush1.bf16.msra.mxu1 %v7336_v52 }
 0x1f1   : > { %1867 = vmatpush1.bf16.msra.mxu0 %v7336_v52  ;;  %6969 = vmatprep.subr.bf16.mxu1 %v7341_v53 }
 0x1f2   : > { %1868 = vmatprep.subr.bf16.mxu0 %v7341_v53  ;;  %v1940_v53 = vld [vmem:[#allocation7 + $0x18] sm:$0xff] }
 0x1f4   : > { %6985 = vmatpush1.bf16.msra.mxu1 %v7339_v54 }
 0x1f5   : > { %1869 = vmatpush1.bf16.msra.mxu0 %v7339_v54  ;;  %6970 = vmatprep.subr.bf16.mxu1 %v7344_v55 }
 0x1f6   : > { %1870 = vmatprep.subr.bf16.mxu0 %v7344_v55 }
 0x1f8   : > { %6986 = vmatpush1.bf16.msra.mxu1 %v7342_v56 }
 0x1f9   : > { %1871 = vmatpush1.bf16.msra.mxu0 %v7342_v56 }
 0x1fb   : > { %1883 = vmatmul.mubr.bf16.vlgmr.msra.gmra.mrb[8].mxu1 %v1148_v61 }
 0x1fc   : > { %1873 = vmatmul.mubr.bf16.vlgmr.msra.gmra.mrb[0].mxu0 %v1142_v60 }
 0x28e   : > { %v1772_v0 = vpop.f32.mrb[0].mxu1 }
 0x28f   : > { %v1774_v1 = vpop.f32.mrb[1].mxu1  ;;  %v1773_v23 = vadd.f32 %v1772_v0, %v1251_v7 }
 0x290   : > { %v1776_v2 = vpop.f32.mrb[2].mxu1  ;;  %v1775_v25 = vadd.f32 %v1774_v1, %v1255_v8 }
 0x291   : > { %v1778_v4 = vpop.f32.mrb[3].mxu1  ;;  %v1777_v29 = vadd.f32 %v1776_v2, %v1251_v7 }
 0x292   : > { %v1779_v43 = vadd.f32 %v1778_v4, %v1255_v8 }
 0x296   : > { %v1782_v9 = vpop.f32.mrb[4].mxu1 }
 0x297   : > { %v1833_v10 = vpop.f32.mrb[4].mxu0  ;;  %v1783_v11 = vadd.f32 %v1782_v9, %v1251_v7  ;;  %v1784_v12 = vpop.f32.mrb[5].mxu1 }
 0x298   : > { %v1835_v13 = vpop.f32.mrb[5].mxu0  ;;  %v1785_v14 = vadd.f32 %v1784_v12, %v1255_v8  ;;  %v1786_v16 = vpop.f32.mrb[6].mxu1 }
 0x299   : > { %v1837_v15 = vpop.f32.mrb[6].mxu0  ;;  %v1834_v17 = vadd.f32 %v1833_v10, %v1783_v11  ;;  %v1787_v19 = vpop.f32.mrb[7].mxu1 }
 0x29a   : > { %v1838_v18 = vpop.f32.mrb[7].mxu0  ;;  %v1836_v20 = vadd.f32 %v1835_v13, %v1785_v14 }
 0x2ce   : > { %v1884_v28 = vpop.f32.mrb[8].mxu1 }
 0x2cf   : > { %v1874_v27 = vpop.f32.mrb[0].mxu0  ;;  %v1885_v32 = vadd.f32 %v1884_v28, %v1834_v17  ;;  %v1886_v35 = vpop.f32.mrb[9].mxu1 }
 0x2d0   : > { %v6988_v30 = vadd.f32 %v1874_v27, %v1773_v23  ;;  %v1876_v34 = vpop.f32.mrb[1].mxu0  ;;  %v1887_v38 = vadd.f32 %v1886_v35, %v1836_v20  ;;  %v1888_v42 = vpop.f32.mrb[10].mxu1 }
 0x2d1   : > { %v6990_v36 = vadd.f32 %v1876_v34, %v1775_v25  ;;  %v1878_v40 = vpop.f32.mrb[2].mxu0  ;;  %v1912_v45 = vsel %vm1901_vm1, %v1885_v32, 0.0  ;;  %v1889_v48 = vpop.f32.mrb[11].mxu1 }
 0x2d2   : > { %v1931_v44 = vsel %vm1895_vm0, %v1924_v24, %v6988_v30  ;;  %v6992_v46 = vadd.f32 %v1878_v40, %v1777_v29  ;;  %v1880_v47 = vpop.f32.mrb[3].mxu0  ;;  %v1947_v50 = vadd.f32 %v1941_v33, %v1912_v45  ;;  %v1913_v52 = vsel %vm1901_vm1, %v1887_v38, 0.0 }
 0x2d3   : > { %v1943_v49 = vadd.f32 %v1937_v31, %v1931_v44  ;;  %v1932_v51 = vsel %vm1895_vm0, %v1928_v26, %v6990_v36  ;;  %v1948_v55 = vadd.f32 %v1942_v39, %v1913_v52  ;;  %v6994_v57 = vadd.f32 %v1880_v47, %v1779_v43 }
 0x2d4   : > { %v1944_v54 = vadd.f32 %v1938_v37, %v1932_v51  ;;  %v1945_v56 = vadd.f32 %v6992_v46, %v1939_v41  ;;  %1953 = vst [vmem:[#allocation2 + $0x20] sm:$0xff] %v1947_v50 }
 0x2d5   : > { %1949 = vst [vmem:[#allocation2] sm:$0xff] %v1943_v49  ;;  %1954 = vst [vmem:[#allocation2 + $0x28] sm:$0xff] %v1948_v55  ;;  %v1946_v58 = vadd.f32 %v6994_v57, %v1940_v53 }
 0x2d6   : > { %1950 = vst [vmem:[#allocation2 + $0x8] sm:$0xff] %v1944_v54  ;;  %1951 = vst [vmem:[#allocation2 + $0x10] sm:$0xff] %v1945_v56 }
 0x2d7   : > { %1952 = vst [vmem:[#allocation2 + $0x18] sm:$0xff] %v1946_v58 }
 0x2d8 PF: > { %v7345_v4 = vld [vmem:[%s8742_s5 + $0x4] ss:$24 sps:$4 sm:$0xff]   ;;  %v7347_v5 = vld [vmem:[%s8742_s5] ss:$24 sps:$4 sm:$0xff]   ;;  %v7348_v6 = vld [vmem:[%s8742_s5 + $0x34] ss:$24 sps:$4 sm:$0xff]  }
 0x2d9   : > { %2661 = vmatprep.subr.bf16.mxu1 %v7345_v4  ;;  %v7350_v7 = vld [vmem:[%s8742_s5 + $0x30] ss:$24 sps:$4 sm:$0xff]   ;;  %v7351_v8 = vld [vmem:[%s8742_s5 + $0x64] ss:$24 sps:$4 sm:$0xff]   ;;  %v7353_v9 = vld [vmem:[%s8742_s5 + $0x60] ss:$24 sps:$4 sm:$0xff]  }
 0x2da   : > { %2662 = vmatpush1.bf16.msra.mxu1 %v7347_v5  ;;  %v7354_v10 = vld [vmem:[%s8742_s5 + $0x94] ss:$24 sps:$4 sm:$0xff]   ;;  %v7356_v11 = vld [vmem:[%s8742_s5 + $0x90] ss:$24 sps:$4 sm:$0xff]   ;;  %v7357_v12 = vld [vmem:[%s8742_s5 + $0xc4] ss:$24 sps:$4 sm:$0xff]  }
 0x2db   : > { %v1959_v61 = vld [vmem:[#allocation2 + $0x20] sm:$0xff]  ;;  %2663 = vmatprep.subr.bf16.mxu1 %v7348_v6  ;;  %v7360_v14 = vld [vmem:[%s8742_s5 + $0xf4] ss:$24 sps:$4 sm:$0xff]   ;;  %v7362_v15 = vld [vmem:[%s8742_s5 + $0xf0] ss:$24 sps:$4 sm:$0xff]   ;;  %s10337_s18 = sld [smem:[#allocation40_spill]] }
 0x2dc   : > { %v1955_v59 = vld [vmem:[#allocation2] sm:$0xff]  ;;  %v1960_v63 = vld [vmem:[#allocation2 + $0x28] sm:$0xff]  ;;  %s10339_s12 = sld [smem:[#allocation41_spill]]  ;;  %vm2918_vm2 = vcmask 1043456   ;;  %vm2876_vm4 = vcmask 195584   ;;  %s10342_s17 = scalar_lea.vmem [#allocation8], %s8698_s26 }
 0x2dd   : > { %v1956_v60 = vld [vmem:[#allocation2 + $0x8] sm:$0xff]  ;;  %v1957_v0 = vld [vmem:[#allocation2 + $0x10] sm:$0xff]  ;;  %v1972_v2 = vadd.f32 %v1960_v63, %v1959_v61  ;;  %v7359_v13 = vld [vmem:[%s8742_s5 + $0xc0] ss:$24 sps:$4 sm:$0xff]  }
 0x2de   : > { %v1966_v62 = vadd.f32 %v1956_v60, %v1955_v59  ;;  %v1958_v1 = vld [vmem:[#allocation2 + $0x18] sm:$0xff]  ;;  %2664 = vmatpush1.bf16.msra.mxu1 %v7350_v7  ;;  %v7366_v18 = vld [vmem:[%s8742_s5 + $0x154] ss:$24 sps:$4 sm:$0xff]   ;;  %v7368_v19 = vld [vmem:[%s8742_s5 + $0x150] ss:$24 sps:$4 sm:$0xff]  }
 0x2df   : > { %v1969_v3 = vadd.f32 %v1958_v1, %v1957_v0  ;;  %1973 = vadd.xlane.f32.xlu1 %v1972_v2  ;;  %2665 = vmatprep.subr.bf16.mxu1 %v7351_v8  ;;  %v7363_v16 = vld [vmem:[%s8742_s5 + $0x124] ss:$24 sps:$4 sm:$0xff]   ;;  %v7365_v17 = vld [vmem:[%s8742_s5 + $0x120] ss:$24 sps:$4 sm:$0xff]   ;;  %v7372_v22 = vld [vmem:[%s8742_s5 + $0x1b4] ss:$24 sps:$4 sm:$0xff]  }
 0x2e0   : > { %1967 = vadd.xlane.f32.xlu0 %v1966_v62  ;;  %v7369_v20 = vld [vmem:[%s8742_s5 + $0x184] ss:$24 sps:$4 sm:$0xff]   ;;  %v7371_v21 = vld [vmem:[%s8742_s5 + $0x180] ss:$24 sps:$4 sm:$0xff]   ;;  %v7374_v44 = vld [vmem:[%s8742_s5 + $0x1b0] ss:$24 sps:$4 sm:$0xff]  }
 0x2e1   : > { %v7375_v45 = vld [vmem:[%s8742_s5 + $0x1e4] ss:$24 sps:$4 sm:$0xff]   ;;  %v7377_v46 = vld [vmem:[%s8742_s5 + $0x1e0] ss:$24 sps:$4 sm:$0xff]   ;;  %v7378_v47 = vld [vmem:[%s8742_s5 + $0x214] ss:$24 sps:$4 sm:$0xff]   ;;  %s10338_s9 = scalar_lea.vmem %s10337_s18, %s8729_s0 }
 0x2e2   : > { %2666 = vmatpush1.bf16.msra.mxu1 %v7353_v9  ;;  %v7380_v48 = vld [vmem:[%s8742_s5 + $0x210] ss:$24 sps:$4 sm:$0xff]   ;;  %v7381_v49 = vld [vmem:[%s8742_s5 + $0x244] ss:$24 sps:$4 sm:$0xff]   ;;  %v7383_v50 = vld [vmem:[%s8742_s5 + $0x240] ss:$24 sps:$4 sm:$0xff]   ;;  %s10340_s23 = scalar_lea.vmem %s10339_s12, %s8729_s0 }
 0x2e3   : > { %2667 = vmatprep.subr.bf16.mxu1 %v7354_v10  ;;  %v7384_v51 = vld [vmem:[%s8742_s5 + $0x274] ss:$24 sps:$4 sm:$0xff]   ;;  %v7386_v52 = vld [vmem:[%s8742_s5 + $0x270] ss:$24 sps:$4 sm:$0xff]   ;;  %v7387_v53 = vld [vmem:[%s8742_s5 + $0x2a4] ss:$24 sps:$4 sm:$0xff]  }
 0x2e4   : > { %1970 = vadd.xlane.f32.xlu0 %v1969_v3  ;;  %v7389_v54 = vld [vmem:[%s8742_s5 + $0x2a0] ss:$24 sps:$4 sm:$0xff]   ;;  %v7390_v55 = vld [vmem:[%s8742_s5 + $0x2d4] ss:$24 sps:$4 sm:$0xff]   ;;  %v7392_v56 = vld [vmem:[%s8742_s5 + $0x2d0] ss:$24 sps:$4 sm:$0xff]  }
 0x2e5   : > { %v7395_v57 = vld [vmem:[%s8742_s5 + $0xc] ss:$24 sps:$4 sm:$0xff]   ;;  %v1964_v6 = vld [vmem:[%s10338_s9] sm:$0x3]  ;;  %s10343_s0 = scalar_lea.vmem [#allocation10], %s8698_s26 }
 0x2e6   : > { %2668 = vmatpush1.bf16.msra.mxu1 %v7356_v11  ;;  %v1965_v11 = vld [vmem:[%s10340_s23] sm:$0x3] }
 0x2e7   : > { %2669 = vmatprep.subr.bf16.mxu1 %v7357_v12 }
 0x2ea   : > { %2670 = vmatpush1.bf16.msra.mxu1 %v7359_v13 }
 0x2eb   : > { %2671 = vmatprep.subr.bf16.mxu1 %v7360_v14 }
 0x2ee   : > { %2672 = vmatpush1.bf16.msra.mxu1 %v7362_v15 }
 0x2ef   : > { %2673 = vmatprep.subr.bf16.mxu1 %v7363_v16 }
 0x2f2   : > { %2674 = vmatpush1.bf16.msra.mxu1 %v7365_v17 }
 0x2f3   : > { %2675 = vmatprep.subr.bf16.mxu1 %v7366_v18 }
 0x2f6   : > { %2676 = vmatpush1.bf16.msra.mxu1 %v7368_v19 }
 0x2f7   : > { %2677 = vmatprep.subr.bf16.mxu1 %v7369_v20 }
 0x2fa   : > { %2678 = vmatpush1.bf16.msra.mxu1 %v7371_v21 }
 0x2fb   : > { %2679 = vmatprep.subr.bf16.mxu1 %v7372_v22 }
 0x2fe   : > { %2680 = vmatpush1.bf16.msra.mxu1 %v7374_v44  ;;  %v7402_v44 = vld [vmem:[%s8742_s5 + $0x98] ss:$24 sps:$4 sm:$0xff]  }
 0x2ff   : > { %2681 = vmatprep.subr.bf16.mxu1 %v7375_v45  ;;  %v7407_v45 = vld [vmem:[%s8742_s5 + $0xcc] ss:$24 sps:$4 sm:$0xff]  }
 0x302   : > { %2682 = vmatpush1.bf16.msra.mxu1 %v7377_v46  ;;  %v7405_v46 = vld [vmem:[%s8742_s5 + $0xc8] ss:$24 sps:$4 sm:$0xff]  }
 0x303   : > { %2683 = vmatprep.subr.bf16.mxu1 %v7378_v47  ;;  %v7410_v47 = vld [vmem:[%s8742_s5 + $0xfc] ss:$24 sps:$4 sm:$0xff]  }
 0x306   : > { %2684 = vmatpush1.bf16.msra.mxu1 %v7380_v48  ;;  %v7408_v48 = vld [vmem:[%s8742_s5 + $0xf8] ss:$24 sps:$4 sm:$0xff]  }
 0x307   : > { %2685 = vmatprep.subr.bf16.mxu1 %v7381_v49  ;;  %v7413_v49 = vld [vmem:[%s8742_s5 + $0x12c] ss:$24 sps:$4 sm:$0xff]  }
 0x30a   : > { %2686 = vmatpush1.bf16.msra.mxu1 %v7383_v50  ;;  %v7411_v50 = vld [vmem:[%s8742_s5 + $0x128] ss:$24 sps:$4 sm:$0xff]  }
 0x30b   : > { %2687 = vmatprep.subr.bf16.mxu1 %v7384_v51  ;;  %v7416_v51 = vld [vmem:[%s8742_s5 + $0x15c] ss:$24 sps:$4 sm:$0xff]  }
 0x30e   : > { %2688 = vmatpush1.bf16.msra.mxu1 %v7386_v52  ;;  %v7414_v52 = vld [vmem:[%s8742_s5 + $0x158] ss:$24 sps:$4 sm:$0xff]  }
 0x30f   : > { %2689 = vmatprep.subr.bf16.mxu1 %v7387_v53  ;;  %v7419_v53 = vld [vmem:[%s8742_s5 + $0x18c] ss:$24 sps:$4 sm:$0xff]  }
 0x312   : > { %2690 = vmatpush1.bf16.msra.mxu1 %v7389_v54  ;;  %v7417_v54 = vld [vmem:[%s8742_s5 + $0x188] ss:$24 sps:$4 sm:$0xff]  }
 0x313   : > { %2691 = vmatprep.subr.bf16.mxu1 %v7390_v55  ;;  %v7422_v55 = vld [vmem:[%s8742_s5 + $0x1bc] ss:$24 sps:$4 sm:$0xff]  }
 0x316   : > { %2692 = vmatpush1.bf16.msra.mxu1 %v7392_v56  ;;  %v7420_v56 = vld [vmem:[%s8742_s5 + $0x1b8] ss:$24 sps:$4 sm:$0xff]  }
 0x317   : > { %2712 = vmatprep.subr.bf16.mxu1 %v7395_v57  ;;  %v7425_v57 = vld [vmem:[%s8742_s5 + $0x1ec] ss:$24 sps:$4 sm:$0xff]  }
 0x36c   : > { %v1974_v25 = vpop.xlane.xlu1 %1973 }
 0x36d   : > { %v1968_v23 = vpop.xlane.xlu0 %1967  ;;  %v1978_v26 = vmul.f32 0.00390625, %v1974_v25 }
 0x36e   : > { %v1976_v24 = vmul.f32 0.00390625, %v1968_v23 }
 0x36f   : > { %v9120_v29 = vsub.f32 %v1959_v61, %v1978_v26  ;;  %v9122_v30 = vsub.f32 %v1960_v63, %v1978_v26  ;;  %v1961_v63 = vlaneseq }
 0x370   : > { %v9116_v27 = vsub.f32 %v1955_v59, %v1976_v24  ;;  %v9118_v28 = vsub.f32 %v1956_v60, %v1976_v24 }
 0x371   : > { %v1971_v31 = vpop.xlane.xlu0 %1970  ;;  %v1989_v35 = vmul.f32 %v9120_v29, %v9120_v29  ;;  %v1990_v36 = vmul.f32 %v9122_v30, %v9122_v30  ;;  %v9155_v4 = vshrl.u32 %v1961_v63, 7 }
 0x372   : > { %v1977_v32 = vmul.f32 0.00390625, %v1971_v31  ;;  %v1985_v33 = vmul.f32 %v9116_v27, %v9116_v27  ;;  %v1986_v34 = vmul.f32 %v9118_v28, %v9118_v28 }
 0x373   : > { %v1997_v40 = vadd.f32 %v1990_v36, %v1989_v35  ;;  %v9158_v5 = vsub.s32 1, %v9155_v4  ;;  %v9166_v7 = vsub.s32 0, %v9155_v4  ;;  %v7398_v36 = vld [vmem:[%s8742_s5 + $0x3c] ss:$24 sps:$4 sm:$0xff]  }
 0x374   : > { %v9132_v37 = vsub.f32 %v1957_v0, %v1977_v32  ;;  %v9134_v38 = vsub.f32 %v1958_v1, %v1977_v32  ;;  %v1991_v39 = vadd.f32 %v1986_v34, %v1985_v33  ;;  %v7393_v34 = vld [vmem:[%s8742_s5 + $0x8] ss:$24 sps:$4 sm:$0xff]  }
 0x375   : > { %v2023_v10 = vrot.slane %v1964_v6, %v9158_v5  ;;  %v2019_v13 = vrot.slane %v1964_v6, %v9166_v7  ;;  %v2040_v17 = vrot.slane %v1965_v11, %v9158_v5  ;;  %v2036_v22 = vrot.slane %v1965_v11, %v9166_v7  ;;  %v7440_v6 = vld [vmem:[%s8742_s5 + $0x2dc] ss:$24 sps:$4 sm:$0xff]  }
 0x376   : > { %1992 = vadd.xlane.f32.xlu1 %v1991_v39  ;;  %v1987_v41 = vmul.f32 %v9132_v37, %v9132_v37  ;;  %v1988_v42 = vmul.f32 %v9134_v38, %v9134_v38  ;;  %v7401_v39 = vld [vmem:[%s8742_s5 + $0x6c] ss:$24 sps:$4 sm:$0xff]  }
 0x377   : > { %v7446_v11 = vld [vmem:[%s8742_s5 + $0x44] ss:$24 sps:$4 sm:$0xff]  }
 0x378   : > { %v1994_v43 = vadd.f32 %v1988_v42, %v1987_v41  ;;  %v7399_v41 = vld [vmem:[%s8742_s5 + $0x68] ss:$24 sps:$4 sm:$0xff]  }
 0x37a   : > { %1998 = vadd.xlane.f32.xlu1 %v1997_v40  ;;  %1995 = vadd.xlane.f32.xlu0 %v1994_v43  ;;  %v7404_v43 = vld [vmem:[%s8742_s5 + $0x9c] ss:$24 sps:$4 sm:$0xff]  }
 0x403   : > { %v1993_v58 = vpop.xlane.xlu1 %1992 }
 0x404   : > { %v2000_v59 = vmul.f32 0.00390625, %v1993_v58  ;;  %v7423_v58 = vld [vmem:[%s8742_s5 + $0x1e8] ss:$24 sps:$4 sm:$0xff]  }
 0x406   : > { %v2003_v60 = vadd.f32 1e-06, %v2000_v59  ;;  %v7428_v59 = vld [vmem:[%s8742_s5 + $0x21c] ss:$24 sps:$4 sm:$0xff]  }
 0x407   : > { %v1999_v61 = vpop.xlane.xlu1 %1998  ;;  %v1996_v62 = vpop.xlane.xlu0 %1995 }
 0x408   : > { %7729 = vrsqrt.f32 %v2003_v60  ;;  %v2002_v0 = vmul.f32 0.00390625, %v1999_v61  ;;  %v2001_v1 = vmul.f32 0.00390625, %v1996_v62  ;;  %v7426_v60 = vld [vmem:[%s8742_s5 + $0x218] ss:$24 sps:$4 sm:$0xff]   ;;  %v7431_v61 = vld [vmem:[%s8742_s5 + $0x24c] ss:$24 sps:$4 sm:$0xff]  }
 0x409   : > { %v7429_v62 = vld [vmem:[%s8742_s5 + $0x248] ss:$24 sps:$4 sm:$0xff]  }
 0x40a   : > { %v2005_v2 = vadd.f32 1e-06, %v2002_v0  ;;  %v2004_v3 = vadd.f32 1e-06, %v2001_v1  ;;  %v7434_v0 = vld [vmem:[%s8742_s5 + $0x27c] ss:$24 sps:$4 sm:$0xff]  }
 0x40b   : > { %v7432_v1 = vld [vmem:[%s8742_s5 + $0x278] ss:$24 sps:$4 sm:$0xff]  }
 0x40c   : > { %7731 = vrsqrt.f32 %v2005_v2  ;;  %v7437_v2 = vld [vmem:[%s8742_s5 + $0x2ac] ss:$24 sps:$4 sm:$0xff]  }
 0x40d   : > { %7733 = vrsqrt.f32 %v2004_v3  ;;  %v7435_v3 = vld [vmem:[%s8742_s5 + $0x2a8] ss:$24 sps:$4 sm:$0xff]  }
 0x412   : > { %v7730_v8 = vpop.eup %7729 }
 0x413   : > { %v2010_v9 = vmul.f32 %v7730_v8, %v9118_v28  ;;  %v2009_v12 = vmul.f32 %v7730_v8, %v9116_v27  ;;  %v7438_v8 = vld [vmem:[%s8742_s5 + $0x2d8] ss:$24 sps:$4 sm:$0xff]  }
 0x415   : > { %v2027_v16 = vmul.f32 %v2023_v10, %v2010_v9  ;;  %v2026_v21 = vmul.f32 %v2019_v13, %v2009_v12  ;;  %v7443_v9 = vld [vmem:[%s8742_s5 + $0x14] ss:$24 sps:$4 sm:$0xff]   ;;  %v7444_v12 = vld [vmem:[%s8742_s5 + $0x40] ss:$24 sps:$4 sm:$0xff]  }
 0x416   : > { %v7732_v14 = vpop.eup %7731 }
 0x417   : > { %v7734_v15 = vpop.eup %7733  ;;  %v2014_v18 = vmul.f32 %v7732_v14, %v9122_v30  ;;  %v2044_v26 = vadd.f32 %v2040_v17, %v2027_v16  ;;  %v2013_v27 = vmul.f32 %v7732_v14, %v9120_v29  ;;  %v2043_v31 = vadd.f32 %v2036_v22, %v2026_v21  ;;  %v7396_v29 = vld [vmem:[%s8742_s5 + $0x38] ss:$24 sps:$4 sm:$0xff]   ;;  %v7461_v21 = vld [vmem:[%s8742_s5 + $0x134] ss:$24 sps:$4 sm:$0xff]  }
 0x418   : > { %v2012_v19 = vmul.f32 %v7734_v15, %v9134_v38  ;;  %v2011_v20 = vmul.f32 %v7734_v15, %v9132_v37  ;;  %v7447_v14 = vld [vmem:[%s8742_s5 + $0x70] ss:$24 sps:$4 sm:$0xff]   ;;  %v7452_v15 = vld [vmem:[%s8742_s5 + $0xa4] ss:$24 sps:$4 sm:$0xff]   ;;  %v7450_v16 = vld [vmem:[%s8742_s5 + $0xa0] ss:$24 sps:$4 sm:$0xff]  }
 0x419   : > { %v2031_v23 = vmul.f32 %v2023_v10, %v2014_v18  ;;  %v2030_v37 = vmul.f32 %v2019_v13, %v2013_v27  ;;  %v7453_v18 = vld [vmem:[%s8742_s5 + $0xd0] ss:$24 sps:$4 sm:$0xff]   ;;  %v7470_v27 = vld [vmem:[%s8742_s5 + $0x1c4] ss:$24 sps:$4 sm:$0xff]  }
 0x41a   : > { %v2029_v24 = vmul.f32 %v2023_v10, %v2012_v19  ;;  %v2028_v25 = vmul.f32 %v2019_v13, %v2011_v20  ;;  %v7441_v10 = vld [vmem:[%s8742_s5 + $0x10] ss:$24 sps:$4 sm:$0xff]   ;;  %v7449_v13 = vld [vmem:[%s8742_s5 + $0x74] ss:$24 sps:$4 sm:$0xff]   ;;  %v7458_v19 = vld [vmem:[%s8742_s5 + $0x104] ss:$24 sps:$4 sm:$0xff]  }
 0x41b   : > { %v2048_v30 = vadd.f32 %v2040_v17, %v2031_v23  ;;  %v2047_v40 = vadd.f32 %v2036_v22, %v2030_v37  ;;  %v7456_v20 = vld [vmem:[%s8742_s5 + $0x100] ss:$24 sps:$4 sm:$0xff]   ;;  %v7464_v23 = vld [vmem:[%s8742_s5 + $0x164] ss:$24 sps:$4 sm:$0xff]  }
 0x41c   : > { %v2046_v28 = vadd.f32 %v2040_v17, %v2029_v24  ;;  %v2045_v32 = vadd.f32 %v2036_v22, %v2028_v25  ;;  %v7455_v17 = vld [vmem:[%s8742_s5 + $0xd4] ss:$24 sps:$4 sm:$0xff]   ;;  %v7459_v22 = vld [vmem:[%s8742_s5 + $0x130] ss:$24 sps:$4 sm:$0xff]   ;;  %v7462_v24 = vld [vmem:[%s8742_s5 + $0x160] ss:$24 sps:$4 sm:$0xff]  }
 0x41d   : > { %v9190_v38 = vpack.c.bf16 %v2048_v30, %v2048_v30  ;;  %v9197_v42 = vpack.c.bf16 %v2047_v40, %v2047_v40  ;;  %v7467_v25 = vld [vmem:[%s8742_s5 + $0x194] ss:$24 sps:$4 sm:$0xff]   ;;  %v7476_v30 = vld [vmem:[%s8742_s5 + $0x224] ss:$24 sps:$4 sm:$0xff]   ;;  %v7483_v40 = vld [vmem:[%s8742_s5 + $0x2b0] ss:$24 sps:$4 sm:$0xff]  }
 0x41e   : > { %v9183_v33 = vpack.c.bf16 %v2046_v28, %v2044_v26  ;;  %v9186_v35 = vpack.c.bf16 %v2045_v32, %v2043_v31  ;;  %v7465_v26 = vld [vmem:[%s8742_s5 + $0x190] ss:$24 sps:$4 sm:$0xff]   ;;  %v7468_v28 = vld [vmem:[%s8742_s5 + $0x1c0] ss:$24 sps:$4 sm:$0xff]   ;;  %v7473_v31 = vld [vmem:[%s8742_s5 + $0x1f4] ss:$24 sps:$4 sm:$0xff]  }
 0x41f   : > { %v7471_v32 = vld [vmem:[%s8742_s5 + $0x1f0] ss:$24 sps:$4 sm:$0xff]   ;;  %v7482_v37 = vld [vmem:[%s8742_s5 + $0x284] ss:$24 sps:$4 sm:$0xff]  }
 0x420   : > { %2693 = vmatprep.mubr.bf16.mxu1 %v9183_v33 }
 0x421   : > { %2694 = vmatmul.mubr.bf16.vlgmr.msra.gmra.mrb[0].mxu1 %v9186_v35 }
 0x422   : > { %2713 = vmatpush1.bf16.msra.mxu1 %v7393_v34  ;;  %2703 = vmatprep.mubr.bf16.mxu1 %v9190_v38  ;;  %v7479_v34 = vld [vmem:[%s8742_s5 + $0x254] ss:$24 sps:$4 sm:$0xff]  }
 0x423   : > { %2714 = vmatprep.subr.bf16.mxu1 %v7398_v36  ;;  %v7477_v36 = vld [vmem:[%s8742_s5 + $0x250] ss:$24 sps:$4 sm:$0xff]  }
 0x426   : > { %2715 = vmatpush1.bf16.msra.mxu1 %v7396_v29  ;;  %v7480_v29 = vld [vmem:[%s8742_s5 + $0x280] ss:$24 sps:$4 sm:$0xff]  }
 0x427   : > { %2716 = vmatprep.subr.bf16.mxu1 %v7401_v39  ;;  %v7485_v39 = vld [vmem:[%s8742_s5 + $0x2b4] ss:$24 sps:$4 sm:$0xff]  }
 0x429   : > { %2704 = vmatmul.mubr.bf16.gmra.mrb[4].mxu1 %v9197_v42 }
 0x42a   : > { %2717 = vmatpush1.bf16.msra.mxu1 %v7399_v41  ;;  %2744 = vmatprep.mubr.bf16.mxu1 %v9183_v33  ;;  %v7488_v41 = vld [vmem:[%s8742_s5 + $0x2e4] ss:$24 sps:$4 sm:$0xff]  }
 0x42b   : > { %2718 = vmatprep.subr.bf16.mxu1 %v7404_v43  ;;  %v7486_v43 = vld [vmem:[%s8742_s5 + $0x2e0] ss:$24 sps:$4 sm:$0xff]  }
 0x42e   : > { %2719 = vmatpush1.bf16.msra.mxu1 %v7402_v44  ;;  %v2149_v44 = vld [vmem:[%s8756_s15] sm:$0x3f] }
 0x42f   : > { %2720 = vmatprep.subr.bf16.mxu1 %v7407_v45  ;;  %v2154_v45 = vrot.slane %v2149_v44, %v9166_v7 }
 0x432   : > { %2721 = vmatpush1.bf16.msra.mxu1 %v7405_v46 }
 0x433   : > { %2722 = vmatprep.subr.bf16.mxu1 %v7410_v47  ;;  %v9269_v47 = vrot.slane %v2149_v44, %v9158_v5 }
 0x436   : > { %2723 = vmatpush1.bf16.msra.mxu1 %v7408_v48 }
 0x437   : > { %2724 = vmatprep.subr.bf16.mxu1 %v7413_v49 }
 0x43a   : > { %2725 = vmatpush1.bf16.msra.mxu1 %v7411_v50 }
 0x43b   : > { %2726 = vmatprep.subr.bf16.mxu1 %v7416_v51 }
 0x43e   : > { %2727 = vmatpush1.bf16.msra.mxu1 %v7414_v52 }
 0x43f   : > { %2728 = vmatprep.subr.bf16.mxu1 %v7419_v53 }
 0x442   : > { %2729 = vmatpush1.bf16.msra.mxu1 %v7417_v54 }
 0x443   : > { %2730 = vmatprep.subr.bf16.mxu1 %v7422_v55 }
 0x446   : > { %2731 = vmatpush1.bf16.msra.mxu1 %v7420_v56 }
 0x447   : > { %2732 = vmatprep.subr.bf16.mxu1 %v7425_v57 }
 0x44a   : > { %2733 = vmatpush1.bf16.msra.mxu1 %v7423_v58 }
 0x44b   : > { %2734 = vmatprep.subr.bf16.mxu1 %v7428_v59  ;;  %v2161_v59 = vsub.s32 2, %v9155_v4 }
 0x44e   : > { %2735 = vmatpush1.bf16.msra.mxu1 %v7426_v60  ;;  %v2165_v60 = vsub.s32 3, %v9155_v4 }
 0x44f   : > { %2736 = vmatprep.subr.bf16.mxu1 %v7431_v61  ;;  %v2162_v61 = vrot.slane %v2149_v44, %v2161_v59 }
 0x452   : > { %2737 = vmatpush1.bf16.msra.mxu1 %v7429_v62 }
 0x453   : > { %2738 = vmatprep.subr.bf16.mxu1 %v7434_v0  ;;  %v2166_v0 = vrot.slane %v2149_v44, %v2165_v60 }
 0x456   : > { %2739 = vmatpush1.bf16.msra.mxu1 %v7432_v1 }
 0x457   : > { %2740 = vmatprep.subr.bf16.mxu1 %v7437_v2 }
 0x45a   : > { %2741 = vmatpush1.bf16.msra.mxu1 %v7435_v3 }
 0x45b   : > { %2742 = vmatprep.subr.bf16.mxu1 %v7440_v6 }
 0x45e   : > { %2743 = vmatpush1.bf16.msra.mxu1 %v7438_v8 }
 0x45f   : > { %2763 = vmatprep.subr.bf16.mxu1 %v7443_v9 }
 0x461   : > { %2745 = vmatmul.mubr.bf16.vlgmr.msra.gmra.mrb[8].mxu1 %v9186_v35 }
 0x462   : > { %2754 = vmatprep.mubr.bf16.mxu1 %v9190_v38  ;;  %2764 = vmatpush1.bf16.msra.mxu1 %v7441_v10 }
 0x463   : > { %2765 = vmatprep.subr.bf16.mxu1 %v7446_v11 }
 0x466   : > { %2766 = vmatpush1.bf16.msra.mxu1 %v7444_v12 }
 0x467   : > { %2767 = vmatprep.subr.bf16.mxu1 %v7449_v13 }
 0x469   : > { %2755 = vmatmul.mubr.bf16.gmra.mrb[12].mxu1 %v9197_v42 }
 0x46a   : > { %2768 = vmatpush1.bf16.msra.mxu1 %v7447_v14  ;;  %2795 = vmatprep.mubr.bf16.mxu1 %v9183_v33  ;;  %v7474_v33 = vld [vmem:[%s8742_s5 + $0x220] ss:$24 sps:$4 sm:$0xff]  }
 0x46b   : > { %2769 = vmatprep.subr.bf16.mxu1 %v7452_v15 }
 0x46e   : > { %2770 = vmatpush1.bf16.msra.mxu1 %v7450_v16 }
 0x46f   : > { %2771 = vmatprep.subr.bf16.mxu1 %v7455_v17 }
 0x472   : > { %2772 = vmatpush1.bf16.msra.mxu1 %v7453_v18 }
 0x473   : > { %2773 = vmatprep.subr.bf16.mxu1 %v7458_v19 }
 0x476   : > { %2774 = vmatpush1.bf16.msra.mxu1 %v7456_v20 }
 0x477   : > { %2775 = vmatprep.subr.bf16.mxu1 %v7461_v21  ;;  %v2169_v21 = vsub.s32 4, %v9155_v4 }
 0x47a   : > { %2776 = vmatpush1.bf16.msra.mxu1 %v7459_v22  ;;  %v2173_v22 = vsub.s32 5, %v9155_v4 }
 0x47b   : > { %2777 = vmatprep.subr.bf16.mxu1 %v7464_v23  ;;  %v2170_v23 = vrot.slane %v2149_v44, %v2169_v21 }
 0x47e   : > { %2778 = vmatpush1.bf16.msra.mxu1 %v7462_v24 }
 0x47f   : > { %2779 = vmatprep.subr.bf16.mxu1 %v7467_v25  ;;  %v2174_v25 = vrot.slane %v2149_v44, %v2173_v22 }
 0x482   : > { %2780 = vmatpush1.bf16.msra.mxu1 %v7465_v26 }
 0x483   : > { %2781 = vmatprep.subr.bf16.mxu1 %v7470_v27 }
 0x486   : > { %2782 = vmatpush1.bf16.msra.mxu1 %v7468_v28 }
 0x487   : > { %2783 = vmatprep.subr.bf16.mxu1 %v7473_v31 }
 0x48a   : > { %2784 = vmatpush1.bf16.msra.mxu1 %v7471_v32 }
 0x48b   : > { %2785 = vmatprep.subr.bf16.mxu1 %v7476_v30 }
 0x48e   : > { %2786 = vmatpush1.bf16.msra.mxu1 %v7474_v33 }
 0x48f   : > { %2787 = vmatprep.subr.bf16.mxu1 %v7479_v34 }
 0x492   : > { %2788 = vmatpush1.bf16.msra.mxu1 %v7477_v36 }
 0x493   : > { %2789 = vmatprep.subr.bf16.mxu1 %v7482_v37 }
 0x496   : > { %2790 = vmatpush1.bf16.msra.mxu1 %v7480_v29 }
 0x497   : > { %2791 = vmatprep.subr.bf16.mxu1 %v7485_v39 }
 0x49a   : > { %2792 = vmatpush1.bf16.msra.mxu1 %v7483_v40 }
 0x49b   : > { %2793 = vmatprep.subr.bf16.mxu1 %v7488_v41 }
 0x49e   : > { %2794 = vmatpush1.bf16.msra.mxu1 %v7486_v43 }
 0x4a1   : > { %2796 = vmatmul.mubr.bf16.vlgmr.msra.gmra.mrb[16].mxu1 %v9186_v35 }
 0x4a2   : > { %2805 = vmatprep.mubr.bf16.mxu1 %v9190_v38 }
 0x4a9   : > { %2806 = vmatmul.mubr.bf16.gmra.mrb[20].mxu1 %v9197_v42 }
 0x4f4   : > { %v2695_v46 = vpop.f32.mrb[0].mxu1 }
 0x4f5   : > { %v2697_v48 = vpop.f32.mrb[1].mxu1  ;;  %v2696_v50 = vadd.f32 %v2695_v46, %v2154_v45 }
 0x4f6   : > { %v2699_v49 = vpop.f32.mrb[2].mxu1  ;;  %v9272_v53 = vadd.f32 %v2697_v48, %v9269_v47 }
 0x4f7   : > { %v2700_v51 = vadd.f32 %v2699_v49, %v2154_v45  ;;  %v2701_v52 = vpop.f32.mrb[3].mxu1  ;;  %v9299_v49 = vand.u32 127, %v1961_v63 }
 0x4f8   : > { %v9275_v35 = vadd.f32 %v2701_v52, %v9269_v47 }
 0x4f9   : > { %v2814_v38 = vpack.c.bf16 %v2700_v51, %v2696_v50  ;;  %vm1963_vm3 = vcmp.lt.s32.totalorder %v9299_v49, 17 }
 0x4fa   : > { %v2970_v42 = vpack.c.bf16 %v9275_v35, %v9272_v53 }
 0x4fb   : > { %6895 = vmatprep.mubr.bf16.mxu1 %v2814_v38 }
 0x4fc   : > { %v2705_v54 = vpop.f32.mrb[4].mxu1 }
 0x4fd   : > { %v2706_v55 = vadd.f32 %v2705_v54, %v2154_v45  ;;  %v9279_v56 = vpop.f32.mrb[5].mxu1 }
 0x4fe   : > { %v2709_v57 = vpop.f32.mrb[6].mxu1 }
 0x4ff   : > { %v2710_v58 = vpop.f32.mrb[7].mxu1  ;;  %v2815_v20 = vpack.c.bf16 %v2706_v55, %v2706_v55 }
 0x534   : > { %v2746_v62 = vpop.f32.mrb[8].mxu1 }
 0x535   : > { %v2748_v1 = vpop.f32.mrb[9].mxu1  ;;  %v2747_v3 = vadd.f32 %v2746_v62, %v2162_v61 }
 0x536   : > { %v2750_v2 = vpop.f32.mrb[10].mxu1  ;;  %v2749_v9 = vadd.f32 %v2748_v1, %v2166_v0 }
 0x537   : > { %v2751_v6 = vadd.f32 %v2750_v2, %v2162_v61  ;;  %v2752_v8 = vpop.f32.mrb[11].mxu1 }
 0x538   : > { %v2753_v10 = vadd.f32 %v2752_v8, %v2166_v0 }
 0x539   : > { %v2816_v11 = vpack.c.bf16 %v2751_v6, %v2747_v3 }
 0x53a   : > { %v9287_v12 = vpack.c.bf16 %v2753_v10, %v2749_v9 }
 0x53b   : > { %6891 = vmatprep.subr.bf16.mxu1 %v2816_v11 }
 0x53c   : > { %v2756_v13 = vpop.f32.mrb[12].mxu1  ;;  %6892 = vmatpush3.bf16.xpose.msra.mxu1 %v2816_v11 }
 0x53d   : > { %v2757_v14 = vadd.f32 %v2756_v13, %v2162_v61  ;;  %v2758_v15 = vpop.f32.mrb[13].mxu1 }
 0x53e   : > { %v9289_v16 = vadd.f32 %v2758_v15, %v2166_v0  ;;  %v2760_v17 = vpop.f32.mrb[14].mxu1 }
 0x53f   : > { %v2817_v18 = vpack.c.bf16 %v2757_v14, %v2757_v14  ;;  %v2761_v19 = vpop.f32.mrb[15].mxu1 }
 0x541   : > { %6893 = vmatprep.subr.bf16.mxu1 %v2817_v18 }
 0x544   : > { %6894 = vmatpush3.bf16.xpose.msra.mxu1 %v2817_v18 }
 0x54b   : > { %6896 = vmatmul.mubr.bf16.vlgmr.msra.gmra.mrb[24].mxu1 %v2815_v20 }
 0x574   : > { %v2797_v24 = vpop.f32.mrb[16].mxu1 }
 0x575   : > { %v2799_v26 = vpop.f32.mrb[17].mxu1  ;;  %v2798_v28 = vadd.f32 %v2797_v24, %v2170_v23 }
 0x576   : > { %v2801_v27 = vpop.f32.mrb[18].mxu1  ;;  %v2800_v30 = vadd.f32 %v2799_v26, %v2174_v25 }
 0x577   : > { %v2802_v31 = vadd.f32 %v2801_v27, %v2170_v23  ;;  %v2803_v32 = vpop.f32.mrb[19].mxu1 }
 0x578   : > { %v2804_v33 = vadd.f32 %v2803_v32, %v2174_v25 }
 0x579   : > { %v2818_v34 = vpack.c.bf16 %v2802_v31, %v2798_v28 }
 0x57a   : > { %v2974_v36 = vpack.c.bf16 %v2804_v33, %v2800_v30 }
 0x57b   : > { %6899 = vmatprep.subr.bf16.mxu0 %v2818_v34 }
 0x57c   : > { %v2807_v37 = vpop.f32.mrb[20].mxu1  ;;  %6900 = vmatpush3.bf16.msra.mxu0 %v2818_v34  ;;  %6915 = vmatprep.subr.bf16.mxu1 %v2974_v36 }
 0x57d   : > { %v2808_v29 = vadd.f32 %v2807_v37, %v2170_v23  ;;  %v2809_v39 = vpop.f32.mrb[21].mxu1  ;;  %6916 = vmatpush3.bf16.msra.mxu1 %v2974_v36  ;;  %v2973_v37 = vpack.c.bf16 %v9289_v16, %v9289_v16 }
 0x57e   : > { %v2810_v40 = vadd.f32 %v2809_v39, %v2174_v25  ;;  %v2811_v41 = vpop.f32.mrb[22].mxu1 }
 0x57f   : > { %v2819_v43 = vpack.c.bf16 %v2808_v29, %v2808_v29  ;;  %v2812_v44 = vpop.f32.mrb[23].mxu1  ;;  %v2708_v29 = vadd.f32 %v9279_v56, %v9269_v47 }
 0x580   : > { %v2975_v45 = vpack.c.bf16 %v2810_v40, %v2810_v40 }
 0x581   : > { %7051 = vmatprep.subr.msk.bf16.mxu0 %vm2918_vm2, %v2819_v43  ;;  %v2920_v46 = vsel %vm2918_vm2, %v2819_v43, 0  ;;  %v2971_v39 = vpack.c.bf16 %v2708_v29, %v2708_v29  ;;  %v7504_v29 = vld [vmem:[%s8761_s2 + $0x50] ss:$8 sps:$4 sm:$0xff]  }
 0x582   : > { %v3072_v48 = vsel %vm2918_vm2, %v2975_v45, 0  ;;  %6902 = vmatpush3.bf16.msra.mxu0 %v2920_v46  ;;  %7052 = vmatprep.subr.msk.bf16.mxu1 %vm2918_vm2, %v2975_v45 }
 0x583   : > { %6907 = vmatprep.subr.bf16.mxu0 %v9287_v12  ;;  %6918 = vmatpush3.bf16.msra.mxu1 %v3072_v48 }
 0x61e   : > { %v6897_v50 = vpop.f32.mrb[24].mxu1 }
 0x61f   : > { %v2854_v51 = vpop.f32.mrb[25].mxu1  ;;  %v2870_v52 = vmul.f32 0.088388346, %v6897_v50 }
 0x620   : > { %v2868_v38 = vmul.f32 0.088388346, %v2854_v51  ;;  %v6898_v54 = vpop.f32.mrb[26].mxu1 }
 0x621   : > { %v2857_v55 = vpop.f32.mrb[27].mxu1  ;;  %v2875_v62 = vsel %vm1963_vm3, %v2870_v52, -1e+30 }
 0x622   : > { %v2869_v57 = vmul.f32 0.088388346, %v2857_v55  ;;  %v2873_v58 = vsel %vm1963_vm3, %v2868_v38, -1e+30  ;;  %v2883_v1 = vsel %vm2876_vm4, %v2875_v62, -inf }
 0x623   : > { %v2877_v61 = vsel %vm2876_vm4, %v2873_v58, -inf }
 0x624   : > { %2878 = vmax.xlane.f32.xlu0 %v2877_v61  ;;  %v2874_v63 = vsel %vm1963_vm3, %v2869_v57, -1e+30 }
 0x625   : > { %v2880_v0 = vsel %vm2876_vm4, %v2874_v63, -inf }
 0x626   : > { %2881 = vmax.xlane.f32.xlu1 %v2880_v0 }
 0x628   : > { %2884 = vmax.xlane.f32.xlu0 %v2883_v1 }
 0x6b1   : > { %v2879_v2 = vpop.xlane.xlu0 %2878 }
 0x6b2   : > { %v2886_v3 = vsub.f32 %v2873_v58, %v2879_v2 }
 0x6b3   : > { %v2882_v6 = vpop.xlane.xlu1 %2881 }
 0x6b4   : > { %v2889_v8 = vmul.f32 1.442695, %v2886_v3  ;;  %v2887_v9 = vsub.f32 %v2874_v63, %v2882_v6 }
 0x6b5   : > { %v2885_v10 = vpop.xlane.xlu0 %2884 }
 0x6b6   : > { %7735 = vpow2.f32 %v2889_v8  ;;  %v2891_v11 = vmul.f32 1.442695, %v2887_v9  ;;  %v2888_v13 = vsub.f32 %v2875_v62, %v2885_v10  ;;  %v7491_v10 = vld [vmem:[%s8761_s2 + $0x4] ss:$8 sps:$4 sm:$0xff]  }
 0x6b7   : > { %3330 = vmatprep.subr.bf16.mxu1 %v7491_v10 }
 0x6b8   : > { %7737 = vpow2.f32 %v2891_v11  ;;  %v2893_v14 = vmul.f32 1.442695, %v2888_v13 }
 0x6ba   : > { %7739 = vpow2.f32 %v2893_v14 }
 0x6c0   : > { %v7736_v15 = vpop.eup %7735 }
 0x6c1   : > { %v2895_v17 = vsel %vm2876_vm4, %v7736_v15, 0.0 }
 0x6c2   : > { %v7738_v18 = vpop.eup %7737  ;;  %2896 = vadd.xlane.f32.xlu1 %v2895_v17 }
 0x6c3   : > { %v2898_v19 = vsel %vm2876_vm4, %v7738_v18, 0.0 }
 0x6c4   : > { %v7740_v20 = vpop.eup %7739  ;;  %2899 = vadd.xlane.f32.xlu0 %v2898_v19 }
 0x6c5   : > { %v2901_v23 = vsel %vm2876_vm4, %v7740_v20, 0.0 }
 0x6c6   : > { %2902 = vadd.xlane.f32.xlu1 %v2901_v23 }
 0x74f   : > { %v2897_v24 = vpop.xlane.xlu1 %2896 }
 0x750   : > { %7741 = vrcp.f32 %v2897_v24 }
 0x751   : > { %v2900_v25 = vpop.xlane.xlu0 %2899 }
 0x752   : > { %7743 = vrcp.f32 %v2900_v25  ;;  %v7489_v25 = vld [vmem:[%s8761_s2] ss:$8 sps:$4 sm:$0xff]  }
 0x753   : > { %v2903_v26 = vpop.xlane.xlu1 %2902 }
 0x754   : > { %7745 = vrcp.f32 %v2903_v26 }
 0x75a   : > { %v7742_v27 = vpop.eup %7741 }
 0x75b   : > { %v2907_v31 = vmul.f32 %v7742_v27, %v7736_v15  ;;  %v7494_v27 = vld [vmem:[%s8761_s2 + $0x14] ss:$8 sps:$4 sm:$0xff]  }
 0x75c   : > { %v7744_v28 = vpop.eup %7743 }
 0x75d   : > { %v2908_v32 = vmul.f32 %v7744_v28, %v7738_v18  ;;  %v7492_v28 = vld [vmem:[%s8761_s2 + $0x10] ss:$8 sps:$4 sm:$0xff]  }
 0x75e   : > { %v7746_v30 = vpop.eup %7745 }
 0x75f   : > { %v2910_v33 = vpack.c.bf16 %v2908_v32, %v2907_v31  ;;  %v2909_v34 = vmul.f32 %v7746_v30, %v7740_v20  ;;  %v7497_v31 = vld [vmem:[%s8761_s2 + $0x24] ss:$8 sps:$4 sm:$0xff]   ;;  %v7495_v32 = vld [vmem:[%s8761_s2 + $0x20] ss:$8 sps:$4 sm:$0xff]   ;;  %v7500_v30 = vld [vmem:[%s8761_s2 + $0x34] ss:$8 sps:$4 sm:$0xff]  }
 0x761   : > { %6903 = vmatprep.mubr.msk.bf16.mxu0 %vm2876_vm4, %v2910_v33  ;;  %v2911_v36 = vpack.c.bf16 %v2909_v34, %v2909_v34  ;;  %v7498_v33 = vld [vmem:[%s8761_s2 + $0x30] ss:$8 sps:$4 sm:$0xff]   ;;  %v7503_v34 = vld [vmem:[%s8761_s2 + $0x44] ss:$8 sps:$4 sm:$0xff]  }
 0x763   : > { %6904 = vmatmul.mubr.msk.bf16.vlgmr.msra.gmra.mrb[0].mxu0 %vm2876_vm4, %v2911_v36  ;;  %v7501_v36 = vld [vmem:[%s8761_s2 + $0x40] ss:$8 sps:$4 sm:$0xff]  }
 0x764   : > { %6908 = vmatpush3.bf16.xpose.msra.mxu0 %v9287_v12  ;;  %6911 = vmatprep.mubr.bf16.mxu0 %v2970_v42 }
 0x765   : > { %6909 = vmatprep.subr.bf16.mxu0 %v2973_v37 }
 0x76c   : > { %6910 = vmatpush3.bf16.xpose.msra.mxu0 %v2973_v37  ;;  %v7506_v37 = vld [vmem:[%s8761_s2 + $0x54] ss:$8 sps:$4 sm:$0xff]  }
 0x773   : > { %6912 = vmatmul.mubr.bf16.vlgmr.msra.gmra.mrb[4].mxu0 %v2971_v39  ;;  %v7509_v39 = vld [vmem:[%s8761_s2 + $0x64] ss:$8 sps:$4 sm:$0xff]  }
 0x836   : > { %v9324_v40 = vpop.f32.mrb[0].mxu0 }
 0x837   : > { %v9326_v41 = vpop.f32.mrb[1].mxu0 }
 0x838   : > { %v6906_v16 = vpop.f32.mrb[2].mxu0 }
 0x839   : > { %v9328_v43 = vpop.f32.mrb[3].mxu0  ;;  %v7507_v16 = vld [vmem:[%s8761_s2 + $0x60] ss:$8 sps:$4 sm:$0xff]  }
 0x83a   : > { %v3122_v12 = vpack.c.bf16 %v9328_v43, %v9326_v41 }
 0x846   : > { %v6913_v44 = vpop.f32.mrb[4].mxu0 }
 0x847   : > { %v3010_v53 = vpop.f32.mrb[5].mxu0  ;;  %v3026_v35 = vmul.f32 0.088388346, %v6913_v44  ;;  %v7512_v44 = vld [vmem:[%s8761_s2 + $0x74] ss:$8 sps:$4 sm:$0xff]  }
 0x848   : > { %v3024_v42 = vmul.f32 0.088388346, %v3010_v53  ;;  %v6914_v45 = vpop.f32.mrb[6].mxu0  ;;  %v7510_v53 = vld [vmem:[%s8761_s2 + $0x70] ss:$8 sps:$4 sm:$0xff]  }
 0x849   : > { %v3013_v46 = vpop.f32.mrb[7].mxu0  ;;  %v3029_v51 = vsel %vm1963_vm3, %v3026_v35, -1e+30  ;;  %v7515_v35 = vld [vmem:[%s8761_s2 + $0x84] ss:$8 sps:$4 sm:$0xff]  }
 0x84a   : > { %v3025_v48 = vmul.f32 0.088388346, %v3013_v46  ;;  %v3027_v47 = vsel %vm1963_vm3, %v3024_v42, -1e+30  ;;  %v3036_v38 = vsel %vm2876_vm4, %v3029_v51, -inf }
 0x84b   : > { %v3030_v56 = vsel %vm2876_vm4, %v3027_v47, -inf  ;;  %v7513_v42 = vld [vmem:[%s8761_s2 + $0x80] ss:$8 sps:$4 sm:$0xff]   ;;  %v7518_v45 = vld [vmem:[%s8761_s2 + $0x94] ss:$8 sps:$4 sm:$0xff]  }
 0x84c   : > { %3031 = vmax.xlane.f32.xlu0 %v3030_v56  ;;  %v3028_v50 = vsel %vm1963_vm3, %v3025_v48, -1e+30  ;;  %v7516_v46 = vld [vmem:[%s8761_s2 + $0x90] ss:$8 sps:$4 sm:$0xff]   ;;  %v7521_v48 = vld [vmem:[%s8761_s2 + $0xa4] ss:$8 sps:$4 sm:$0xff]  }
 0x84d   : > { %v3033_v52 = vsel %vm2876_vm4, %v3028_v50, -inf  ;;  %v7524_v56 = vld [vmem:[%s8761_s2 + $0xb4] ss:$8 sps:$4 sm:$0xff]  }
 0x84e   : > { %3034 = vmax.xlane.f32.xlu1 %v3033_v52  ;;  %v7525_v52 = vld [vmem:[%s8761_s2 + $0xc0] ss:$8 sps:$4 sm:$0xff]  }
 0x850   : > { %3037 = vmax.xlane.f32.xlu0 %v3036_v38  ;;  %v7530_v38 = vld [vmem:[%s8761_s2 + $0xd4] ss:$8 sps:$4 sm:$0xff]  }
 0x8d9   : > { %v3032_v54 = vpop.xlane.xlu0 %3031 }
 0x8da   : > { %v3039_v55 = vsub.f32 %v3027_v47, %v3032_v54  ;;  %v7519_v47 = vld [vmem:[%s8761_s2 + $0xa0] ss:$8 sps:$4 sm:$0xff]   ;;  %v7528_v54 = vld [vmem:[%s8761_s2 + $0xd0] ss:$8 sps:$4 sm:$0xff]  }
 0x8db   : > { %v3035_v57 = vpop.xlane.xlu1 %3034 }
 0x8dc   : > { %v3042_v58 = vmul.f32 1.442695, %v3039_v55  ;;  %v3040_v61 = vsub.f32 %v3028_v50, %v3035_v57  ;;  %v7522_v50 = vld [vmem:[%s8761_s2 + $0xb0] ss:$8 sps:$4 sm:$0xff]   ;;  %v7533_v55 = vld [vmem:[%s8761_s2 + $0xe4] ss:$8 sps:$4 sm:$0xff]  }
 0x8dd   : > { %v3038_v63 = vpop.xlane.xlu0 %3037  ;;  %v7531_v57 = vld [vmem:[%s8761_s2 + $0xe0] ss:$8 sps:$4 sm:$0xff]  }
 0x8de   : > { %7747 = vpow2.f32 %v3042_v58  ;;  %v3044_v62 = vmul.f32 1.442695, %v3040_v61  ;;  %v3041_v0 = vsub.f32 %v3029_v51, %v3038_v63  ;;  %v7527_v51 = vld [vmem:[%s8761_s2 + $0xc4] ss:$8 sps:$4 sm:$0xff]   ;;  %v7536_v58 = vld [vmem:[%s8761_s2 + $0xf4] ss:$8 sps:$4 sm:$0xff]  }
 0x8df   : > { %v7534_v61 = vld [vmem:[%s8761_s2 + $0xf0] ss:$8 sps:$4 sm:$0xff]  }
 0x8e0   : > { %7749 = vpow2.f32 %v3044_v62  ;;  %v3046_v1 = vmul.f32 1.442695, %v3041_v0 }
 0x8e2   : > { %7751 = vpow2.f32 %v3046_v1 }
 0x8e8   : > { %v7748_v49 = vpop.eup %7747 }
 0x8e9   : > { %v3048_v2 = vsel %vm2876_vm4, %v7748_v49, 0.0 }
 0x8ea   : > { %v7750_v3 = vpop.eup %7749  ;;  %3049 = vadd.xlane.f32.xlu1 %v3048_v2 }
 0x8eb   : > { %v3051_v6 = vsel %vm2876_vm4, %v7750_v3, 0.0 }
 0x8ec   : > { %v7752_v8 = vpop.eup %7751  ;;  %3052 = vadd.xlane.f32.xlu0 %v3051_v6  ;;  %v3158_v6 = vld [vmem:[%s1095_s7] sm:$0x3]  ;;  %s10344_s7 = scalar_lea.vmem [#allocation11], %s8698_s26 }
 0x8ed   : > { %v3054_v9 = vsel %vm2876_vm4, %v7752_v8, 0.0  ;;  %v3167_v10 = vrot.slane %v3158_v6, %v9158_v5 }
 0x8ee   : > { %3055 = vadd.xlane.f32.xlu1 %v3054_v9  ;;  %v3163_v9 = vrot.slane %v3158_v6, %v9166_v7  ;;  %v3510_v6 = vld [vmem:[%s8766_s14 + $0x88] sm:$0xff] }
 0x977   : > { %v3050_v11 = vpop.xlane.xlu1 %3049 }
 0x978   : > { %7753 = vrcp.f32 %v3050_v11 }
 0x979   : > { %v3053_v13 = vpop.xlane.xlu0 %3052 }
 0x97a   : > { %7755 = vrcp.f32 %v3053_v13 }
 0x97b   : > { %v3056_v14 = vpop.xlane.xlu1 %3055 }
 0x97c   : > { %7757 = vrcp.f32 %v3056_v14 }
 0x982   : > { %v7754_v15 = vpop.eup %7753 }
 0x983   : > { %v3060_v18 = vmul.f32 %v7754_v15, %v7748_v49 }
 0x984   : > { %v7756_v17 = vpop.eup %7755 }
 0x985   : > { %v3061_v19 = vmul.f32 %v7756_v17, %v7750_v3  ;;  %v3124_v3 = vpack.c.bf16 %v9324_v40, %v9324_v40 }
 0x986   : > { %v7758_v20 = vpop.eup %7757 }
 0x987   : > { %v3062_v23 = vmul.f32 %v7758_v20, %v7752_v8  ;;  %v3063_v24 = vpack.c.bf16 %v3061_v19, %v3060_v18  ;;  %v3381_v8 = vld [vmem:[%s10342_s17] sm:$0x3] }
 0x988   : > { %v3386_v11 = vrot.slane %v3381_v8, %v9166_v7  ;;  %v3390_v43 = vrot.slane %v3381_v8, %v9158_v5  ;;  %v3514_v8 = vld [vmem:[%s8766_s14 + $0xa8] sm:$0xff] }
 0x989   : > { %6919 = vmatprep.mubr.msk.bf16.mxu1 %vm2876_vm4, %v3063_v24  ;;  %v3064_v26 = vpack.c.bf16 %v3062_v23, %v3062_v23  ;;  %v7813_v23 = vld [vmem:[#allocation2] sm:$0xff] }
 0x98b   : > { %6920 = vmatmul.mubr.msk.bf16.vlgmr.msra.gmra.mrb[28].mxu1 %vm2876_vm4, %v3064_v26  ;;  %v7814_v26 = vld [vmem:[#allocation2 + $0x8] sm:$0xff] }
 0x98c   : > { %3331 = vmatpush1.bf16.msra.mxu1 %v7489_v25 }
 0x98d   : > { %3332 = vmatprep.subr.bf16.mxu1 %v7494_v27 }
 0x990   : > { %3333 = vmatpush1.bf16.msra.mxu1 %v7492_v28 }
 0x991   : > { %3334 = vmatprep.subr.bf16.mxu1 %v7497_v31  ;;  %v7815_v31 = vld [vmem:[#allocation2 + $0x10] sm:$0xff] }
 0x994   : > { %3335 = vmatpush1.bf16.msra.mxu1 %v7495_v32 }
 0x995   : > { %3336 = vmatprep.subr.bf16.mxu1 %v7500_v30  ;;  %v7816_v30 = vld [vmem:[#allocation2 + $0x18] sm:$0xff] }
 0x998   : > { %3337 = vmatpush1.bf16.msra.mxu1 %v7498_v33 }
 0x999   : > { %3338 = vmatprep.subr.bf16.mxu1 %v7503_v34 }
 0x99c   : > { %3339 = vmatpush1.bf16.msra.mxu1 %v7501_v36 }
 0x99d   : > { %3340 = vmatprep.subr.bf16.mxu1 %v7506_v37 }
 0x9a0   : > { %3341 = vmatpush1.bf16.msra.mxu1 %v7504_v29 }
 0x9a1   : > { %3342 = vmatprep.subr.bf16.mxu1 %v7509_v39 }
 0x9a4   : > { %3343 = vmatpush1.bf16.msra.mxu1 %v7507_v16 }
 0x9a5   : > { %3344 = vmatprep.subr.bf16.mxu1 %v7512_v44 }
 0x9a8   : > { %3345 = vmatpush1.bf16.msra.mxu1 %v7510_v53 }
 0x9a9   : > { %3346 = vmatprep.subr.bf16.mxu1 %v7515_v35 }
 0x9ac   : > { %3347 = vmatpush1.bf16.msra.mxu1 %v7513_v42 }
 0x9ad   : > { %3348 = vmatprep.subr.bf16.mxu1 %v7518_v45  ;;  %v7817_v45 = vld [vmem:[#allocation2 + $0x20] sm:$0xff] }
 0x9b0   : > { %3349 = vmatpush1.bf16.msra.mxu1 %v7516_v46 }
 0x9b1   : > { %3350 = vmatprep.subr.bf16.mxu1 %v7521_v48  ;;  %v7818_v48 = vld [vmem:[#allocation2 + $0x28] sm:$0xff] }
 0x9b4   : > { %3351 = vmatpush1.bf16.msra.mxu1 %v7519_v47 }
 0x9b5   : > { %3352 = vmatprep.subr.bf16.mxu1 %v7524_v56 }
 0x9b8   : > { %3353 = vmatpush1.bf16.msra.mxu1 %v7522_v50  ;;  %v3493_v50 = vld [vmem:[%s8766_s14] sm:$0xff] }
 0x9b9   : > { %3354 = vmatprep.subr.bf16.mxu1 %v7527_v51  ;;  %v3497_v51 = vld [vmem:[%s8766_s14 + $0x20] sm:$0xff] }
 0x9bc   : > { %3355 = vmatpush1.bf16.msra.mxu1 %v7525_v52  ;;  %v3494_v52 = vld [vmem:[%s8766_s14 + $0x8] sm:$0xff] }
 0x9bd   : > { %3356 = vmatprep.subr.bf16.mxu1 %v7530_v38  ;;  %v6567_v38 = vcombine.low %v3493_v50, %v3497_v51 }
 0x9c0   : > { %3357 = vmatpush1.bf16.msra.mxu1 %v7528_v54  ;;  %v6568_v54 = vcombine.high %v3493_v50, %v3497_v51 }
 0x9c1   : > { %3358 = vmatprep.subr.bf16.mxu1 %v7533_v55  ;;  %v3498_v55 = vld [vmem:[%s8766_s14 + $0x28] sm:$0xff] }
 0x9c2   : > { %4303 = vmatprep.subr.bf16.mxu0 %v6568_v54  ;;  %v3553_v54 = vld [vmem:[%s8766_s14 + $0x1e0] sm:$0xff] }
 0x9c3   : > { %4304 = vmatpush1.bf16.msra.mxu0 %v6567_v38  ;;  %v3549_v38 = vld [vmem:[%s8766_s14 + $0x1c0] sm:$0xff] }
 0x9c4   : > { %3359 = vmatpush1.bf16.msra.mxu1 %v7531_v57  ;;  %v3501_v57 = vld [vmem:[%s8766_s14 + $0x40] sm:$0xff] }
 0x9c5   : > { %3360 = vmatprep.subr.bf16.mxu1 %v7536_v58  ;;  %v3505_v58 = vld [vmem:[%s8766_s14 + $0x60] sm:$0xff] }
 0x9c8   : > { %3361 = vmatpush1.bf16.msra.mxu1 %v7534_v61  ;;  %v6569_v61 = vcombine.low %v3494_v52, %v3498_v55 }
 0xa5e   : > { %v6921_v63 = vpop.f32.mrb[28].mxu1 }
 0xa5f   : > { %v3108_v62 = vpop.f32.mrb[29].mxu1  ;;  %v3125_v2 = vpack.c.bf16 %v6921_v63, %v6921_v63  ;;  %v6570_v63 = vcombine.high %v3494_v52, %v3498_v55  ;;  %v3550_v55 = vld [vmem:[%s8766_s14 + $0x1c8] sm:$0xff] }
 0xa60   : > { %v6922_v0 = vpop.f32.mrb[30].mxu1 }
 0xa61   : > { %v3111_v1 = vpop.f32.mrb[31].mxu1  ;;  %v3502_v0 = vld [vmem:[%s8766_s14 + $0x48] sm:$0xff]  ;;  %4354 = vmatprep.subr.bf16.mxu1 %v6570_v63  ;;  %v6624_v63 = vcombine.high %v3549_v38, %v3553_v54 }
 0xa62   : > { %v3123_v49 = vpack.c.bf16 %v3111_v1, %v3108_v62  ;;  %v6576_v62 = vcombine.high %v3501_v57, %v3505_v58  ;;  %v3506_v1 = vld [vmem:[%s8766_s14 + $0x68] sm:$0xff] }
 0xa64   : > { %3362 = vmatprep.mubr.bf16.mxu1 %v3123_v49  ;;  %v3509_v49 = vld [vmem:[%s8766_s14 + $0x80] sm:$0xff]  ;;  %4305 = vmatprep.subr.bf16.mxu0 %v6576_v62 }
 0xa65   : > { %3363 = vmatmul.mubr.bf16.vlgmr.msra.gmra.mrb[32].mxu1 %v3122_v12 }
 0xa66   : > { %3372 = vmatprep.mubr.bf16.mxu1 %v3125_v2  ;;  %v6578_v2 = vcombine.high %v3502_v0, %v3506_v1  ;;  %4355 = vmatpush1.bf16.msra.mxu1 %v6569_v61 }
 0xa68   : > { %4356 = vmatprep.subr.bf16.mxu1 %v6578_v2  ;;  %v3562_v2 = vld [vmem:[%s8766_s14 + $0x228] sm:$0xff] }
 0xa6d   : > { %3373 = vmatmul.mubr.bf16.gmra.mrb[36].mxu1 %v3124_v3  ;;  %v3513_v3 = vld [vmem:[%s8766_s14 + $0xa0] sm:$0xff] }
 0xb38   : > { %v3364_v41 = vpop.f32.mrb[32].mxu1 }
 0xb39   : > { %v3365_v12 = vadd.f32 %v3364_v41, %v3163_v9  ;;  %v3366_v13 = vpop.f32.mrb[33].mxu1  ;;  %v6586_v41 = vcombine.high %v3510_v6, %v3514_v8 }
 0xb3a   : > { %v3367_v40 = vadd.f32 %v3366_v13, %v3167_v10  ;;  %v3368_v14 = vpop.f32.mrb[34].mxu1  ;;  %v3518_v13 = vld [vmem:[%s8766_s14 + $0xc8] sm:$0xff] }
 0xb3b   : > { %v3393_v15 = vmul.f32 %v3386_v11, %v3365_v12  ;;  %v3369_v17 = vadd.f32 %v3368_v14, %v3163_v9  ;;  %v3370_v18 = vpop.f32.mrb[35].mxu1  ;;  %v3521_v12 = vld [vmem:[%s8766_s14 + $0xe0] sm:$0xff]  ;;  %v6583_v14 = vcombine.low %v3509_v49, %v3513_v3 }
 0xb3c   : > { %v3394_v19 = vmul.f32 %v3390_v43, %v3367_v40  ;;  %v3371_v20 = vadd.f32 %v3370_v18, %v3167_v10  ;;  %v3522_v40 = vld [vmem:[%s8766_s14 + $0xe8] sm:$0xff] }
 0xb3d   : > { %v9394_v24 = vadd.f32 %v7813_v23, %v3393_v15  ;;  %v3395_v25 = vmul.f32 %v3386_v11, %v3369_v17  ;;  %v6585_v15 = vcombine.low %v3510_v6, %v3514_v8  ;;  %v6594_v18 = vcombine.high %v3518_v13, %v3522_v40  ;;  %v3526_v23 = vld [vmem:[%s8766_s14 + $0x108] sm:$0xff] }
 0xb3e   : > { %v9396_v27 = vadd.f32 %v7814_v26, %v3394_v19  ;;  %v3396_v28 = vmul.f32 %v3390_v43, %v3371_v20  ;;  %v3525_v19 = vld [vmem:[%s8766_s14 + $0x100] sm:$0xff] }
 0xb3f   : > { %v9398_v32 = vadd.f32 %v7815_v31, %v3395_v25  ;;  %v3529_v20 = vld [vmem:[%s8766_s14 + $0x120] sm:$0xff]  ;;  %v3530_v25 = vld [vmem:[%s8766_s14 + $0x128] sm:$0xff] }
 0xb40   : > { %v9400_v33 = vadd.f32 %v7816_v30, %v3396_v28  ;;  %v3374_v34 = vpop.f32.mrb[36].mxu1  ;;  %v3407_v36 = vadd.f32 %v9396_v27, %v9394_v24  ;;  %v6593_v28 = vcombine.low %v3518_v13, %v3522_v40  ;;  %v6600_v31 = vcombine.high %v3525_v19, %v3529_v20 }
 0xb41   : > { %v3375_v37 = vadd.f32 %v3374_v34, %v3163_v9  ;;  %v3376_v29 = vpop.f32.mrb[37].mxu1  ;;  %v6575_v9 = vcombine.low %v3501_v57, %v3505_v58  ;;  %v6602_v30 = vcombine.high %v3526_v23, %v3530_v25  ;;  %v3533_v34 = vld [vmem:[%s8766_s14 + $0x140] sm:$0xff]  ;;  %v3554_v57 = vld [vmem:[%s8766_s14 + $0x1e8] sm:$0xff] }
 0xb42   : > { %v3377_v39 = vadd.f32 %v3376_v29, %v3167_v10  ;;  %v3378_v16 = vpop.f32.mrb[38].mxu1  ;;  %3408 = vadd.xlane.f32.xlu0 %v3407_v36  ;;  %v3410_v44 = vadd.f32 %v9400_v33, %v9398_v32  ;;  %v6577_v10 = vcombine.low %v3502_v0, %v3506_v1  ;;  %v3537_v36 = vld [vmem:[%s8766_s14 + $0x160] sm:$0xff]  ;;  %v3538_v29 = vld [vmem:[%s8766_s14 + $0x168] sm:$0xff]  ;;  %v6626_v62 = vcombine.high %v3550_v55, %v3554_v57 }
 0xb43   : > { %v3397_v53 = vmul.f32 %v3386_v11, %v3375_v37  ;;  %v3379_v35 = vpop.f32.mrb[39].mxu1  ;;  %v6584_v11 = vcombine.high %v3509_v49, %v3513_v3  ;;  %4306 = vmatpush1.bf16.msra.mxu0 %v6575_v9  ;;  %v3534_v37 = vld [vmem:[%s8766_s14 + $0x148] sm:$0xff]  ;;  %v6601_v16 = vcombine.low %v3526_v23, %v3530_v25  ;;  %v3557_v0 = vld [vmem:[%s8766_s14 + $0x200] sm:$0xff]  ;;  %v6623_v3 = vcombine.low %v3549_v38, %v3553_v54 }
 0xb44   : > { %v3398_v42 = vmul.f32 %v3390_v43, %v3377_v39  ;;  %3411 = vadd.xlane.f32.xlu1 %v3410_v44  ;;  %v3517_v43 = vld [vmem:[%s8766_s14 + $0xc0] sm:$0xff]  ;;  %4357 = vmatpush1.bf16.msra.mxu1 %v6577_v10  ;;  %v6599_v39 = vcombine.low %v3525_v19, %v3529_v20  ;;  %v6608_v44 = vcombine.high %v3533_v34, %v3537_v36  ;;  %v3558_v49 = vld [vmem:[%s8766_s14 + $0x208] sm:$0xff] }
 0xb45   : > { %v9406_v46 = vadd.f32 %v7817_v45, %v3397_v53  ;;  %4307 = vmatprep.subr.bf16.mxu0 %v6584_v11  ;;  %v6592_v17 = vcombine.high %v3517_v43, %v3521_v12  ;;  %4358 = vmatprep.subr.bf16.mxu1 %v6586_v41  ;;  %v6591_v26 = vcombine.low %v3517_v43, %v3521_v12  ;;  %v3541_v35 = vld [vmem:[%s8766_s14 + $0x180] sm:$0xff]  ;;  %v3542_v45 = vld [vmem:[%s8766_s14 + $0x188] sm:$0xff] }
 0xb46   : > { %v9408_v47 = vadd.f32 %v7818_v48, %v3398_v42  ;;  %v6610_v53 = vcombine.high %v3534_v37, %v3538_v29  ;;  %v3545_v42 = vld [vmem:[%s8766_s14 + $0x1a0] sm:$0xff]  ;;  %v3546_v48 = vld [vmem:[%s8766_s14 + $0x1a8] sm:$0xff]  ;;  %v6609_v50 = vcombine.low %v3534_v37, %v3538_v29  ;;  %v6625_v6 = vcombine.low %v3550_v55, %v3554_v57 }
 0xb47   : > { %4308 = vmatpush1.bf16.msra.mxu0 %v6583_v14  ;;  %v6616_v51 = vcombine.high %v3541_v35, %v3545_v42  ;;  %v6618_v52 = vcombine.high %v3542_v45, %v3546_v48  ;;  %v6615_v58 = vcombine.low %v3541_v35, %v3545_v42  ;;  %v6617_v61 = vcombine.low %v3542_v45, %v3546_v48  ;;  %v3561_v1 = vld [vmem:[%s8766_s14 + $0x220] sm:$0xff]  ;;  %v3566_v41 = vld [vmem:[%s8766_s14 + $0x248] sm:$0xff] }
 0xb48   : > { %v3413_v56 = vadd.f32 %v9408_v47, %v9406_v46  ;;  %4359 = vmatpush1.bf16.msra.mxu1 %v6585_v15  ;;  %4309 = vmatprep.subr.bf16.mxu0 %v6592_v17  ;;  %v6632_v8 = vcombine.high %v3557_v0, %v3561_v1  ;;  %v6634_v9 = vcombine.high %v3558_v49, %v3562_v2  ;;  %v3565_v10 = vld [vmem:[%s8766_s14 + $0x240] sm:$0xff]  ;;  %v3570_v43 = vld [vmem:[%s8766_s14 + $0x268] sm:$0xff] }
 0xb49   : > { %4360 = vmatprep.subr.bf16.mxu1 %v6594_v18  ;;  %v3569_v11 = vld [vmem:[%s8766_s14 + $0x260] sm:$0xff]  ;;  %v6631_v12 = vcombine.low %v3557_v0, %v3561_v1  ;;  %v6633_v13 = vcombine.low %v3558_v49, %v3562_v2  ;;  %v6642_v14 = vcombine.high %v3566_v41, %v3570_v43  ;;  %v6641_v17 = vcombine.low %v3566_v41, %v3570_v43  ;;  %v3578_v38 = vld [vmem:[%s8766_s14 + $0x2a8] sm:$0xff] }
 0xb4a   : > { %3414 = vadd.xlane.f32.xlu0 %v3413_v56  ;;  %v6607_v56 = vcombine.low %v3533_v34, %v3537_v36  ;;  %v6640_v40 = vcombine.high %v3565_v10, %v3569_v11  ;;  %v6639_v15 = vcombine.low %v3565_v10, %v3569_v11  ;;  %v3586_v0 = vld [vmem:[%s8766_s14 + $0x2e8] sm:$0xff] }
 0xb4b   : > { %4310 = vmatpush1.bf16.msra.mxu0 %v6591_v26  ;;  %v3594_v10 = vld [vmem:[%s8766_s14 + $0x328] sm:$0xff] }
 0xb4c   : > { %4361 = vmatpush1.bf16.msra.mxu1 %v6593_v28  ;;  %4311 = vmatprep.subr.bf16.mxu0 %v6600_v31 }
 0xb4d   : > { %4362 = vmatprep.subr.bf16.mxu1 %v6602_v30 }
 0xb4f   : > { %4312 = vmatpush1.bf16.msra.mxu0 %v6599_v39 }
 0xb50   : > { %4363 = vmatpush1.bf16.msra.mxu1 %v6601_v16  ;;  %4313 = vmatprep.subr.bf16.mxu0 %v6608_v44 }
 0xb51   : > { %4364 = vmatprep.subr.bf16.mxu1 %v6610_v53 }
 0xb53   : > { %4314 = vmatpush1.bf16.msra.mxu0 %v6607_v56  ;;  %v3573_v56 = vld [vmem:[%s8766_s14 + $0x280] sm:$0xff] }
 0xb54   : > { %4365 = vmatpush1.bf16.msra.mxu1 %v6609_v50  ;;  %4315 = vmatprep.subr.bf16.mxu0 %v6616_v51  ;;  %v3577_v50 = vld [vmem:[%s8766_s14 + $0x2a0] sm:$0xff]  ;;  %v3574_v51 = vld [vmem:[%s8766_s14 + $0x288] sm:$0xff] }
 0xb55   : > { %4366 = vmatprep.subr.bf16.mxu1 %v6618_v52  ;;  %v6648_v52 = vcombine.high %v3573_v56, %v3577_v50  ;;  %v6647_v54 = vcombine.low %v3573_v56, %v3577_v50  ;;  %v6649_v55 = vcombine.low %v3574_v51, %v3578_v38  ;;  %v6650_v57 = vcombine.high %v3574_v51, %v3578_v38  ;;  %v9510_v38 = vld [vmem:[%s8766_s14 + $0x30] sm:$0xff] }
 0xb57   : > { %4316 = vmatpush1.bf16.msra.mxu0 %v6615_v58  ;;  %v3581_v58 = vld [vmem:[%s8766_s14 + $0x2c0] sm:$0xff] }
 0xb58   : > { %4367 = vmatpush1.bf16.msra.mxu1 %v6617_v61  ;;  %4317 = vmatprep.subr.bf16.mxu0 %v6624_v63  ;;  %v3585_v61 = vld [vmem:[%s8766_s14 + $0x2e0] sm:$0xff]  ;;  %v3582_v63 = vld [vmem:[%s8766_s14 + $0x2c8] sm:$0xff] }
 0xb59   : > { %4368 = vmatprep.subr.bf16.mxu1 %v6626_v62  ;;  %v6656_v62 = vcombine.high %v3581_v58, %v3585_v61  ;;  %v6655_v1 = vcombine.low %v3581_v58, %v3585_v61  ;;  %v6657_v49 = vcombine.low %v3582_v63, %v3586_v0  ;;  %v6658_v2 = vcombine.high %v3582_v63, %v3586_v0 }
 0xb5b   : > { %4318 = vmatpush1.bf16.msra.mxu0 %v6623_v3  ;;  %v3589_v3 = vld [vmem:[%s8766_s14 + $0x300] sm:$0xff] }
 0xb5c   : > { %4369 = vmatpush1.bf16.msra.mxu1 %v6625_v6  ;;  %4319 = vmatprep.subr.bf16.mxu0 %v6632_v8  ;;  %v3593_v6 = vld [vmem:[%s8766_s14 + $0x320] sm:$0xff]  ;;  %v3590_v8 = vld [vmem:[%s8766_s14 + $0x308] sm:$0xff] }
 0xb5d   : > { %4370 = vmatprep.subr.bf16.mxu1 %v6634_v9  ;;  %v6664_v9 = vcombine.high %v3589_v3, %v3593_v6  ;;  %v6663_v11 = vcombine.low %v3589_v3, %v3593_v6  ;;  %v6665_v41 = vcombine.low %v3590_v8, %v3594_v10  ;;  %v6666_v43 = vcombine.high %v3590_v8, %v3594_v10  ;;  %v3405_v10 = vld [vmem:[%s10343_s0] sm:$0x3] }
 0xb5f   : > { %4320 = vmatpush1.bf16.msra.mxu0 %v6631_v12  ;;  %v3597_v12 = vld [vmem:[%s8766_s14 + $0x340] sm:$0xff] }
 0xb60   : > { %4371 = vmatpush1.bf16.msra.mxu1 %v6633_v13  ;;  %4321 = vmatprep.subr.bf16.mxu0 %v6640_v40  ;;  %v3601_v13 = vld [vmem:[%s8766_s14 + $0x360] sm:$0xff]  ;;  %v3598_v40 = vld [vmem:[%s8766_s14 + $0x348] sm:$0xff] }
 0xb61   : > { %4372 = vmatprep.subr.bf16.mxu1 %v6642_v14  ;;  %v6672_v14 = vcombine.high %v3597_v12, %v3601_v13 }
 0xb63   : > { %4322 = vmatpush1.bf16.msra.mxu0 %v6639_v15  ;;  %v3602_v15 = vld [vmem:[%s8766_s14 + $0x368] sm:$0xff] }
 0xb64   : > { %4373 = vmatpush1.bf16.msra.mxu1 %v6641_v17  ;;  %4323 = vmatprep.subr.bf16.mxu0 %v6648_v52  ;;  %v6671_v17 = vcombine.low %v3597_v12, %v3601_v13  ;;  %v9507_v52 = vld [vmem:[%s8766_s14 + $0x10] sm:$0xff] }
 0xb65   : > { %4374 = vmatprep.subr.bf16.mxu1 %v6650_v57  ;;  %v3500_v57 = vld [vmem:[%s8766_s14 + $0x38] sm:$0xff]  ;;  %v6571_v58 = vcombine.low %v9507_v52, %v9510_v38 }
 0xb67   : > { %4324 = vmatpush1.bf16.msra.mxu0 %v6647_v54  ;;  %v9513_v54 = vld [vmem:[%s8766_s14 + $0x18] sm:$0xff] }
 0xb68   : > { %4375 = vmatpush1.bf16.msra.mxu1 %v6649_v55  ;;  %4325 = vmatprep.subr.bf16.mxu0 %v6656_v62  ;;  %v6572_v55 = vcombine.high %v9507_v52, %v9510_v38  ;;  %v6573_v61 = vcombine.low %v9513_v54, %v3500_v57  ;;  %v6574_v63 = vcombine.high %v9513_v54, %v3500_v57  ;;  %v3511_v52 = vld [vmem:[%s8766_s14 + $0x90] sm:$0xff] }
 0xb69   : > { %4376 = vmatprep.subr.bf16.mxu1 %v6658_v2  ;;  %v3515_v54 = vld [vmem:[%s8766_s14 + $0xb0] sm:$0xff] }
 0xb6b   : > { %4326 = vmatpush1.bf16.msra.mxu0 %v6655_v1 }
 0xb6c   : > { %4377 = vmatpush1.bf16.msra.mxu1 %v6657_v49  ;;  %4327 = vmatprep.subr.bf16.mxu0 %v6664_v9 }
 0xb6d   : > { %4378 = vmatprep.subr.bf16.mxu1 %v6666_v43  ;;  %v3459_v43 = vrot.slane %v3405_v10, %v9166_v7 }
 0xb6f   : > { %4328 = vmatpush1.bf16.msra.mxu0 %v6663_v11  ;;  %v3406_v11 = vld [vmem:[%s10344_s7] sm:$0x3] }
 0xb70   : > { %4379 = vmatpush1.bf16.msra.mxu1 %v6665_v41  ;;  %4329 = vmatprep.subr.bf16.mxu0 %v6672_v14  ;;  %v3463_v41 = vrot.slane %v3405_v10, %v9158_v5  ;;  %v3527_v10 = vld [vmem:[%s8766_s14 + $0x110] sm:$0xff] }
 0xb73   : > { %4330 = vmatpush1.bf16.msra.mxu0 %v6671_v17  ;;  %v3476_v17 = vrot.slane %v3406_v11, %v9166_v7 }
 0xbcf   : > { %v3409_v18 = vpop.xlane.xlu0 %3408 }
 0xbd0   : > { %v3416_v19 = vmul.f32 0.00390625, %v3409_v18  ;;  %v6673_v18 = vcombine.low %v3598_v40, %v3602_v15 }
 0xbd1   : > { %v3412_v20 = vpop.xlane.xlu1 %3411 }
 0xbd2   : > { %v9453_v23 = vsub.f32 %v9394_v24, %v3416_v19  ;;  %v9456_v25 = vsub.f32 %v9396_v27, %v3416_v19  ;;  %v3417_v26 = vmul.f32 0.00390625, %v3412_v20  ;;  %v6674_v19 = vcombine.high %v3598_v40, %v3602_v15  ;;  %v3605_v20 = vld [vmem:[%s8766_s14 + $0x380] sm:$0xff] }
 0xbd3   : > { %v3480_v15 = vrot.slane %v3406_v11, %v9158_v5 }
 0xbd4   : > { %v9459_v28 = vsub.f32 %v9398_v32, %v3417_v26  ;;  %v9462_v31 = vsub.f32 %v9400_v33, %v3417_v26  ;;  %v3425_v30 = vmul.f32 %v9453_v23, %v9453_v23  ;;  %v3426_v34 = vmul.f32 %v9456_v25, %v9456_v25  ;;  %4380 = vmatprep.subr.bf16.mxu1 %v6674_v19  ;;  %v3609_v26 = vld [vmem:[%s8766_s14 + $0x3a0] sm:$0xff] }
 0xbd5   : > { %4381 = vmatpush1.bf16.msra.mxu1 %v6673_v18 }
 0xbd6   : > { %v3431_v36 = vadd.f32 %v3426_v34, %v3425_v30  ;;  %v3427_v37 = vmul.f32 %v9459_v28, %v9459_v28  ;;  %v3428_v29 = vmul.f32 %v9462_v31, %v9462_v31  ;;  %v3606_v30 = vld [vmem:[%s8766_s14 + $0x388] sm:$0xff]  ;;  %v6680_v34 = vcombine.high %v3605_v20, %v3609_v26 }
 0xbd7   : > { %v3415_v39 = vpop.xlane.xlu0 %3414 }
 0xbd8   : > { %v3418_v16 = vmul.f32 0.00390625, %v3415_v39  ;;  %3432 = vadd.xlane.f32.xlu1 %v3431_v36  ;;  %v3434_v44 = vadd.f32 %v3428_v29, %v3427_v37  ;;  %v3610_v36 = vld [vmem:[%s8766_s14 + $0x3a8] sm:$0xff]  ;;  %v6679_v37 = vcombine.low %v3605_v20, %v3609_v26  ;;  %4331 = vmatprep.subr.bf16.mxu0 %v6680_v34 }
 0xbd9   : > { %v6681_v29 = vcombine.low %v3606_v30, %v3610_v36  ;;  %v6682_v39 = vcombine.high %v3606_v30, %v3610_v36  ;;  %v3503_v36 = vld [vmem:[%s8766_s14 + $0x50] sm:$0xff] }
 0xbda   : > { %v9473_v53 = vsub.f32 %v9406_v46, %v3418_v16  ;;  %v9476_v35 = vsub.f32 %v9408_v47, %v3418_v16  ;;  %3435 = vadd.xlane.f32.xlu0 %v3434_v44  ;;  %4332 = vmatpush1.bf16.msra.mxu0 %v6679_v37  ;;  %v3613_v16 = vld [vmem:[%s8766_s14 + $0x3c0] sm:$0xff] }
 0xbdb   : > { %4382 = vmatprep.subr.bf16.mxu1 %v6682_v39  ;;  %v3617_v44 = vld [vmem:[%s8766_s14 + $0x3e0] sm:$0xff]  ;;  %v3507_v39 = vld [vmem:[%s8766_s14 + $0x70] sm:$0xff] }
 0xbdc   : > { %v3429_v42 = vmul.f32 %v9473_v53, %v9473_v53  ;;  %v3430_v45 = vmul.f32 %v9476_v35, %v9476_v35  ;;  %4383 = vmatpush1.bf16.msra.mxu1 %v6681_v29  ;;  %v6687_v56 = vcombine.low %v3613_v16, %v3617_v44 }
 0xbde   : > { %v3437_v48 = vadd.f32 %v3430_v45, %v3429_v42  ;;  %v3614_v42 = vld [vmem:[%s8766_s14 + $0x3c8] sm:$0xff]  ;;  %v6688_v45 = vcombine.high %v3613_v16, %v3617_v44  ;;  %v3504_v16 = vld [vmem:[%s8766_s14 + $0x58] sm:$0xff] }
 0xbdf   : > { %v3508_v44 = vld [vmem:[%s8766_s14 + $0x78] sm:$0xff] }
 0xbe0   : > { %3438 = vadd.xlane.f32.xlu1 %v3437_v48  ;;  %v3618_v48 = vld [vmem:[%s8766_s14 + $0x3e8] sm:$0xff]  ;;  %4333 = vmatprep.subr.bf16.mxu0 %v6688_v45  ;;  %v6581_v57 = vcombine.low %v3504_v16, %v3508_v44 }
 0xbe1   : > { %v6689_v50 = vcombine.low %v3614_v42, %v3618_v48  ;;  %v6690_v51 = vcombine.high %v3614_v42, %v3618_v48  ;;  %4334 = vmatpush1.bf16.msra.mxu0 %v6687_v56  ;;  %v6580_v56 = vcombine.high %v3503_v36, %v3507_v39 }
 0xbe2   : > { %4405 = vmatprep.subr.bf16.mxu0 %v6572_v55  ;;  %v6579_v55 = vcombine.low %v3503_v36, %v3507_v39  ;;  %v3548_v39 = vld [vmem:[%s8766_s14 + $0x1b8] sm:$0xff] }
 0xbe3   : > { %4384 = vmatprep.subr.bf16.mxu1 %v6690_v51 }
 0xbe4   : > { %4385 = vmatpush1.bf16.msra.mxu1 %v6689_v50  ;;  %v6582_v50 = vcombine.high %v3504_v16, %v3508_v44 }
 0xbe5   : > { %4456 = vmatprep.subr.bf16.mxu1 %v6574_v63 }
 0xc65   : > { %v3433_v62 = vpop.xlane.xlu1 %3432 }
 0xc66   : > { %v3440_v0 = vmul.f32 0.00390625, %v3433_v62 }
 0xc67   : > { %v3436_v1 = vpop.xlane.xlu0 %3435 }
 0xc68   : > { %v3443_v49 = vadd.f32 1e-06, %v3440_v0  ;;  %v3441_v2 = vmul.f32 0.00390625, %v3436_v1  ;;  %v6588_v1 = vcombine.high %v3511_v52, %v3515_v54 }
 0xc6a   : > { %7759 = vrsqrt.f32 %v3443_v49  ;;  %v3444_v3 = vadd.f32 1e-06, %v3441_v2  ;;  %v3519_v2 = vld [vmem:[%s8766_s14 + $0xd0] sm:$0xff] }
 0xc6c   : > { %7761 = vrsqrt.f32 %v3444_v3  ;;  %v3523_v3 = vld [vmem:[%s8766_s14 + $0xf0] sm:$0xff] }
 0xc6d   : > { %v3439_v6 = vpop.xlane.xlu1 %3438  ;;  %v6596_v11 = vcombine.high %v3519_v2, %v3523_v3 }
 0xc6e   : > { %v3442_v8 = vmul.f32 0.00390625, %v3439_v6  ;;  %v3520_v6 = vld [vmem:[%s8766_s14 + $0xd8] sm:$0xff] }
 0xc70   : > { %v3445_v9 = vadd.f32 1e-06, %v3442_v8  ;;  %v3524_v8 = vld [vmem:[%s8766_s14 + $0xf8] sm:$0xff] }
 0xc72   : > { %7763 = vrsqrt.f32 %v3445_v9 }
 0xc74   : > { %v7760_v12 = vpop.eup %7759 }
 0xc75   : > { %v3449_v13 = vmul.f32 %v7760_v12, %v9453_v23  ;;  %v3450_v40 = vmul.f32 %v7760_v12, %v9456_v25  ;;  %v3528_v12 = vld [vmem:[%s8766_s14 + $0x118] sm:$0xff] }
 0xc76   : > { %v7762_v14 = vpop.eup %7761 }
 0xc77   : > { %v3451_v18 = vmul.f32 %v7762_v14, %v9459_v28  ;;  %v3452_v19 = vmul.f32 %v7762_v14, %v9462_v31  ;;  %v3467_v20 = vmul.f32 %v3463_v41, %v3450_v40  ;;  %v3466_v26 = vmul.f32 %v3459_v43, %v3449_v13  ;;  %v3532_v13 = vld [vmem:[%s8766_s14 + $0x138] sm:$0xff] }
 0xc78   : > { %v6595_v40 = vcombine.low %v3519_v2, %v3523_v3  ;;  %v6597_v14 = vcombine.low %v3520_v6, %v3524_v8  ;;  %v3567_v2 = vld [vmem:[%s8766_s14 + $0x250] sm:$0xff] }
 0xc79   : > { %v3469_v30 = vmul.f32 %v3463_v41, %v3452_v19  ;;  %v3468_v34 = vmul.f32 %v3459_v43, %v3451_v18  ;;  %v3484_v23 = vadd.f32 %v3480_v15, %v3467_v20  ;;  %v3483_v25 = vadd.f32 %v3476_v17, %v3466_v26  ;;  %v3535_v18 = vld [vmem:[%s8766_s14 + $0x150] sm:$0xff]  ;;  %v3536_v20 = vld [vmem:[%s8766_s14 + $0x158] sm:$0xff] }
 0xc7a   : > { %v3539_v19 = vld [vmem:[%s8766_s14 + $0x170] sm:$0xff]  ;;  %v3540_v26 = vld [vmem:[%s8766_s14 + $0x178] sm:$0xff] }
 0xc7b   : > { %v3486_v37 = vadd.f32 %v3480_v15, %v3469_v30  ;;  %v3485_v29 = vadd.f32 %v3476_v17, %v3468_v34  ;;  %v6605_v34 = vcombine.low %v3528_v12, %v3532_v13  ;;  %v6612_v36 = vcombine.high %v3535_v18, %v3539_v19  ;;  %v3571_v3 = vld [vmem:[%s8766_s14 + $0x270] sm:$0xff] }
 0xc7c   : > { %v7764_v42 = vpop.eup %7763  ;;  %v6611_v16 = vcombine.low %v3535_v18, %v3539_v19  ;;  %v6613_v44 = vcombine.low %v3536_v20, %v3540_v26  ;;  %v3583_v18 = vld [vmem:[%s8766_s14 + $0x2d0] sm:$0xff] }
 0xc7d   : > { %v3453_v28 = vmul.f32 %v7764_v42, %v9473_v53  ;;  %v3454_v31 = vmul.f32 %v7764_v42, %v9476_v35  ;;  %v3490_v45 = vpack.c.bf16 %v3486_v37, %v3484_v23  ;;  %v9540_v48 = vpack.c.bf16 %v3485_v29, %v3483_v25  ;;  %v3512_v53 = vld [vmem:[%s8766_s14 + $0x98] sm:$0xff]  ;;  %v3543_v37 = vld [vmem:[%s8766_s14 + $0x190] sm:$0xff] }
 0xc7e   : > { %v3516_v35 = vld [vmem:[%s8766_s14 + $0xb8] sm:$0xff]  ;;  %v6614_v23 = vcombine.high %v3536_v20, %v3540_v26  ;;  %v3547_v25 = vld [vmem:[%s8766_s14 + $0x1b0] sm:$0xff] }
 0xc7f   : > { %4335 = vmatprep.mubr.bf16.mxu0 %v3490_v45  ;;  %4386 = vmatprep.mubr.bf16.mxu1 %v3490_v45  ;;  %v3471_v51 = vmul.f32 %v3463_v41, %v3454_v31  ;;  %v3470_v38 = vmul.f32 %v3459_v43, %v3453_v28  ;;  %v6590_v49 = vcombine.high %v3512_v53, %v3516_v35  ;;  %v3531_v43 = vld [vmem:[%s8766_s14 + $0x130] sm:$0xff]  ;;  %v3544_v29 = vld [vmem:[%s8766_s14 + $0x198] sm:$0xff] }
 0xc80   : > { %4336 = vmatmul.mubr.bf16.vlgmr.msra.gmra.mrb[8].mxu0 %v9540_v48  ;;  %4387 = vmatmul.mubr.bf16.vlgmr.msra.gmra.mrb[40].mxu1 %v9540_v48  ;;  %v6598_v41 = vcombine.high %v3520_v6, %v3524_v8  ;;  %v6603_v30 = vcombine.low %v3527_v10, %v3531_v43  ;;  %v6620_v42 = vcombine.high %v3543_v37, %v3547_v25  ;;  %v3551_v31 = vld [vmem:[%s8766_s14 + $0x1d0] sm:$0xff]  ;;  %v3568_v6 = vld [vmem:[%s8766_s14 + $0x258] sm:$0xff] }
 0xc81   : > { %4406 = vmatpush1.bf16.msra.mxu0 %v6571_v58  ;;  %4457 = vmatpush1.bf16.msra.mxu1 %v6573_v61  ;;  %v3488_v63 = vadd.f32 %v3480_v15, %v3471_v51  ;;  %v3487_v62 = vadd.f32 %v3476_v17, %v3470_v38  ;;  %v6587_v58 = vcombine.low %v3511_v52, %v3515_v54  ;;  %v3572_v8 = vld [vmem:[%s8766_s14 + $0x278] sm:$0xff]  ;;  %v3587_v19 = vld [vmem:[%s8766_s14 + $0x2f0] sm:$0xff] }
 0xc82   : > { %4407 = vmatprep.subr.bf16.mxu0 %v6580_v56  ;;  %4458 = vmatprep.subr.bf16.mxu1 %v6582_v50  ;;  %v6589_v61 = vcombine.low %v3512_v53, %v3516_v35  ;;  %v6604_v15 = vcombine.high %v3527_v10, %v3531_v43  ;;  %v6606_v17 = vcombine.high %v3528_v12, %v3532_v13  ;;  %v3552_v56 = vld [vmem:[%s8766_s14 + $0x1d8] sm:$0xff]  ;;  %v3559_v53 = vld [vmem:[%s8766_s14 + $0x210] sm:$0xff] }
 0xc83   : > { %v9548_v0 = vpack.c.bf16 %v3488_v63, %v3488_v63  ;;  %v9556_v9 = vpack.c.bf16 %v3487_v62, %v3487_v62  ;;  %v6622_v28 = vcombine.high %v3544_v29, %v3548_v39  ;;  %v3556_v50 = vld [vmem:[%s8766_s14 + $0x1f8] sm:$0xff]  ;;  %v6619_v51 = vcombine.low %v3543_v37, %v3547_v25  ;;  %v3563_v35 = vld [vmem:[%s8766_s14 + $0x230] sm:$0xff] }
 0xc84   : > { %v6621_v52 = vcombine.low %v3544_v29, %v3548_v39  ;;  %v6630_v54 = vcombine.high %v3552_v56, %v3556_v50  ;;  %v6629_v62 = vcombine.low %v3552_v56, %v3556_v50  ;;  %v6644_v10 = vcombine.high %v3567_v2, %v3571_v3  ;;  %v3579_v43 = vld [vmem:[%s8766_s14 + $0x2b0] sm:$0xff]  ;;  %v3576_v12 = vld [vmem:[%s8766_s14 + $0x298] sm:$0xff] }
 0xc85   : > { %4408 = vmatpush1.bf16.msra.mxu0 %v6579_v55  ;;  %4459 = vmatpush1.bf16.msra.mxu1 %v6581_v57  ;;  %v3560_v55 = vld [vmem:[%s8766_s14 + $0x218] sm:$0xff]  ;;  %v3591_v37 = vld [vmem:[%s8766_s14 + $0x310] sm:$0xff] }
 0xc86   : > { %4345 = vmatprep.mubr.bf16.mxu0 %v9548_v0  ;;  %4396 = vmatprep.mubr.bf16.mxu1 %v9548_v0  ;;  %v3564_v57 = vld [vmem:[%s8766_s14 + $0x238] sm:$0xff]  ;;  %v3595_v25 = vld [vmem:[%s8766_s14 + $0x330] sm:$0xff] }
 0xc87   : > { %4409 = vmatprep.subr.bf16.mxu0 %v6588_v1  ;;  %4460 = vmatprep.subr.bf16.mxu1 %v6590_v49  ;;  %v6636_v1 = vcombine.high %v3559_v53, %v3563_v35  ;;  %v6638_v49 = vcombine.high %v3560_v55, %v3564_v57  ;;  %v3580_v13 = vld [vmem:[%s8766_s14 + $0x2b8] sm:$0xff] }
 0xc88   : > { %4346 = vmatmul.mubr.bf16.gmra.mrb[12].mxu0 %v9556_v9  ;;  %4397 = vmatmul.mubr.bf16.gmra.mrb[44].mxu1 %v9556_v9  ;;  %v3584_v20 = vld [vmem:[%s8766_s14 + $0x2d8] sm:$0xff] }
 0xc89   : > { %4410 = vmatpush1.bf16.msra.mxu0 %v6587_v58  ;;  %4461 = vmatpush1.bf16.msra.mxu1 %v6589_v61  ;;  %v6635_v58 = vcombine.low %v3559_v53, %v3563_v35  ;;  %v6637_v61 = vcombine.low %v3560_v55, %v3564_v57  ;;  %v3588_v26 = vld [vmem:[%s8766_s14 + $0x2f8] sm:$0xff]  ;;  %v3607_v53 = vld [vmem:[%s8766_s14 + $0x390] sm:$0xff] }
 0xc8a   : > { %4437 = vmatprep.mubr.bf16.mxu0 %v3490_v45  ;;  %4488 = vmatprep.mubr.bf16.mxu1 %v3490_v45  ;;  %v3555_v45 = vld [vmem:[%s8766_s14 + $0x1f0] sm:$0xff]  ;;  %v3592_v29 = vld [vmem:[%s8766_s14 + $0x318] sm:$0xff] }
 0xc8b   : > { %4411 = vmatprep.subr.bf16.mxu0 %v6596_v11  ;;  %4462 = vmatprep.subr.bf16.mxu1 %v6598_v41  ;;  %v6628_v38 = vcombine.high %v3551_v31, %v3555_v45  ;;  %v6627_v63 = vcombine.low %v3551_v31, %v3555_v45  ;;  %v6646_v11 = vcombine.high %v3568_v6, %v3572_v8  ;;  %v3575_v41 = vld [vmem:[%s8766_s14 + $0x290] sm:$0xff]  ;;  %v3596_v39 = vld [vmem:[%s8766_s14 + $0x338] sm:$0xff] }
 0xc8c   : > { %v3599_v31 = vld [vmem:[%s8766_s14 + $0x350] sm:$0xff]  ;;  %v3600_v56 = vld [vmem:[%s8766_s14 + $0x358] sm:$0xff] }
 0xc8d   : > { %4412 = vmatpush1.bf16.msra.mxu0 %v6595_v40  ;;  %4463 = vmatpush1.bf16.msra.mxu1 %v6597_v14  ;;  %v6643_v40 = vcombine.low %v3567_v2, %v3571_v3  ;;  %v6645_v14 = vcombine.low %v3568_v6, %v3572_v8  ;;  %v3603_v45 = vld [vmem:[%s8766_s14 + $0x370] sm:$0xff]  ;;  %v3604_v50 = vld [vmem:[%s8766_s14 + $0x378] sm:$0xff] }
 0xc8e   : > { %4413 = vmatprep.subr.bf16.mxu0 %v6604_v15  ;;  %4464 = vmatprep.subr.bf16.mxu1 %v6606_v17  ;;  %v6652_v15 = vcombine.high %v3575_v41, %v3579_v43  ;;  %v6654_v17 = vcombine.high %v3576_v12, %v3580_v13  ;;  %v3611_v35 = vld [vmem:[%s8766_s14 + $0x3b0] sm:$0xff]  ;;  %v3608_v55 = vld [vmem:[%s8766_s14 + $0x398] sm:$0xff] }
 0xc8f   : > { %v3612_v57 = vld [vmem:[%s8766_s14 + $0x3b8] sm:$0xff]  ;;  %v3615_v2 = vld [vmem:[%s8766_s14 + $0x3d0] sm:$0xff] }
 0xc90   : > { %v3619_v3 = vld [vmem:[%s8766_s14 + $0x3f0] sm:$0xff]  ;;  %v3616_v6 = vld [vmem:[%s8766_s14 + $0x3d8] sm:$0xff] }
 0xc91   : > { %4414 = vmatpush1.bf16.msra.mxu0 %v6603_v30  ;;  %4465 = vmatpush1.bf16.msra.mxu1 %v6605_v34  ;;  %v6651_v30 = vcombine.low %v3575_v41, %v3579_v43  ;;  %v6653_v34 = vcombine.low %v3576_v12, %v3580_v13  ;;  %v3620_v8 = vld [vmem:[%s8766_s14 + $0x3f8] sm:$0xff]  ;;  %v6691_v41 = vcombine.low %v3615_v2, %v3619_v3  ;;  %v7539_v12 = vld [vmem:[%s8776_s3 + $0x4] ss:$8 sps:$4 sm:$0xff]   ;;  %v7537_v13 = vld [vmem:[%s8776_s3] ss:$8 sps:$4 sm:$0xff]   ;;  %s10345_s14 = scalar_lea.vmem [#allocation13], %s8698_s26 }
 0xc92   : > { %4415 = vmatprep.subr.bf16.mxu0 %v6612_v36  ;;  %4466 = vmatprep.subr.bf16.mxu1 %v6614_v23  ;;  %v6660_v36 = vcombine.high %v3583_v18, %v3587_v19  ;;  %v6662_v23 = vcombine.high %v3584_v20, %v3588_v26  ;;  %v6693_v43 = vcombine.low %v3616_v6, %v3620_v8 }
 0xc95   : > { %4416 = vmatpush1.bf16.msra.mxu0 %v6611_v16  ;;  %4467 = vmatpush1.bf16.msra.mxu1 %v6613_v44  ;;  %v6659_v16 = vcombine.low %v3583_v18, %v3587_v19  ;;  %v6661_v44 = vcombine.low %v3584_v20, %v3588_v26  ;;  %v7548_v18 = vld [vmem:[%s8776_s3 + $0x34] ss:$8 sps:$4 sm:$0xff]   ;;  %v7549_v19 = vld [vmem:[%s8776_s3 + $0x40] ss:$8 sps:$4 sm:$0xff]   ;;  %v7552_v26 = vld [vmem:[%s8776_s3 + $0x50] ss:$8 sps:$4 sm:$0xff]  }
 0xc96   : > { %4417 = vmatprep.subr.bf16.mxu0 %v6620_v42  ;;  %4468 = vmatprep.subr.bf16.mxu1 %v6622_v28  ;;  %v6668_v42 = vcombine.high %v3591_v37, %v3595_v25  ;;  %v6670_v28 = vcombine.high %v3592_v29, %v3596_v39  ;;  %v7554_v20 = vld [vmem:[%s8776_s3 + $0x54] ss:$8 sps:$4 sm:$0xff]  }
 0xc99   : > { %4418 = vmatpush1.bf16.msra.mxu0 %v6619_v51  ;;  %4469 = vmatpush1.bf16.msra.mxu1 %v6621_v52  ;;  %v6667_v51 = vcombine.low %v3591_v37, %v3595_v25  ;;  %v6669_v52 = vcombine.low %v3592_v29, %v3596_v39  ;;  %v7561_v37 = vld [vmem:[%s8776_s3 + $0x80] ss:$8 sps:$4 sm:$0xff]   ;;  %v7566_v25 = vld [vmem:[%s8776_s3 + $0x94] ss:$8 sps:$4 sm:$0xff]   ;;  %v7564_v29 = vld [vmem:[%s8776_s3 + $0x90] ss:$8 sps:$4 sm:$0xff]  }
 0xc9a   : > { %4419 = vmatprep.subr.bf16.mxu0 %v6628_v38  ;;  %4470 = vmatprep.subr.bf16.mxu1 %v6630_v54  ;;  %v6676_v38 = vcombine.high %v3599_v31, %v3603_v45  ;;  %v6678_v54 = vcombine.high %v3600_v56, %v3604_v50  ;;  %v7569_v39 = vld [vmem:[%s8776_s3 + $0xa4] ss:$8 sps:$4 sm:$0xff]  }
 0xc9d   : > { %4420 = vmatpush1.bf16.msra.mxu0 %v6627_v63  ;;  %4471 = vmatpush1.bf16.msra.mxu1 %v6629_v62  ;;  %v6675_v63 = vcombine.low %v3599_v31, %v3603_v45  ;;  %v6677_v62 = vcombine.low %v3600_v56, %v3604_v50  ;;  %v7573_v31 = vld [vmem:[%s8776_s3 + $0xc0] ss:$8 sps:$4 sm:$0xff]   ;;  %v7578_v45 = vld [vmem:[%s8776_s3 + $0xd4] ss:$8 sps:$4 sm:$0xff]   ;;  %v7576_v56 = vld [vmem:[%s8776_s3 + $0xd0] ss:$8 sps:$4 sm:$0xff]  }
 0xc9e   : > { %4421 = vmatprep.subr.bf16.mxu0 %v6636_v1  ;;  %4472 = vmatprep.subr.bf16.mxu1 %v6638_v49  ;;  %v6684_v1 = vcombine.high %v3607_v53, %v3611_v35  ;;  %v6686_v49 = vcombine.high %v3608_v55, %v3612_v57  ;;  %v7581_v50 = vld [vmem:[%s8776_s3 + $0xe4] ss:$8 sps:$4 sm:$0xff]  }
 0xca1   : > { %4422 = vmatpush1.bf16.msra.mxu0 %v6635_v58  ;;  %4473 = vmatpush1.bf16.msra.mxu1 %v6637_v61  ;;  %v6683_v58 = vcombine.low %v3607_v53, %v3611_v35  ;;  %v6685_v61 = vcombine.low %v3608_v55, %v3612_v57  ;;  %v9648_v53 = vld [vmem:[%s8771_s21] sm:$0xff]  ;;  %s10346_s21 = scalar_lea.vmem [#allocation14], %s8698_s26  ;;  %s10347_s26 = sld [smem:[#allocation27_spill]] }
 0xca2   : > { %4423 = vmatprep.subr.bf16.mxu0 %v6644_v10  ;;  %4474 = vmatprep.subr.bf16.mxu1 %v6646_v11  ;;  %v6692_v10 = vcombine.high %v3615_v2, %v3619_v3  ;;  %v6694_v11 = vcombine.high %v3616_v6, %v3620_v8  ;;  %v9652_v35 = vrot.slane %v9648_v53, %v9166_v7 }
 0xca3   : > { %v9657_v55 = vrot.slane %v9648_v53, %v2161_v59  ;;  %v9661_v57 = vrot.slane %v9648_v53, %v9158_v5 }
 0xca5   : > { %4424 = vmatpush1.bf16.msra.mxu0 %v6643_v40  ;;  %4475 = vmatpush1.bf16.msra.mxu1 %v6645_v14  ;;  %v7542_v40 = vld [vmem:[%s8776_s3 + $0x14] ss:$8 sps:$4 sm:$0xff]   ;;  %v7540_v14 = vld [vmem:[%s8776_s3 + $0x10] ss:$8 sps:$4 sm:$0xff]  }
 0xca6   : > { %4425 = vmatprep.subr.bf16.mxu0 %v6652_v15  ;;  %4476 = vmatprep.subr.bf16.mxu1 %v6654_v17  ;;  %v7545_v15 = vld [vmem:[%s8776_s3 + $0x24] ss:$8 sps:$4 sm:$0xff]   ;;  %v7543_v17 = vld [vmem:[%s8776_s3 + $0x20] ss:$8 sps:$4 sm:$0xff]  }
 0xca7   : > { %p6823_p12 = scmp.ne.s32.totalorder %s10347_s26, 1 }
 0xca8   : > { %s10348_s22 = sld [smem:[#allocation55_spill]] (!%p6823_p12) }
 0xca9   : > { %4426 = vmatpush1.bf16.msra.mxu0 %v6651_v30  ;;  %4477 = vmatpush1.bf16.msra.mxu1 %v6653_v34  ;;  %v7557_v30 = vld [vmem:[%s8776_s3 + $0x64] ss:$8 sps:$4 sm:$0xff]   ;;  %v7560_v34 = vld [vmem:[%s8776_s3 + $0x74] ss:$8 sps:$4 sm:$0xff]  }
 0xcaa   : > { %4427 = vmatprep.subr.bf16.mxu0 %v6660_v36  ;;  %4478 = vmatprep.subr.bf16.mxu1 %v6662_v23  ;;  %v7558_v36 = vld [vmem:[%s8776_s3 + $0x70] ss:$8 sps:$4 sm:$0xff]   ;;  %v7563_v23 = vld [vmem:[%s8776_s3 + $0x84] ss:$8 sps:$4 sm:$0xff]  }
 0xcad   : > { %4428 = vmatpush1.bf16.msra.mxu0 %v6659_v16  ;;  %4479 = vmatpush1.bf16.msra.mxu1 %v6661_v44  ;;  %v7567_v16 = vld [vmem:[%s8776_s3 + $0xa0] ss:$8 sps:$4 sm:$0xff]   ;;  %v7572_v44 = vld [vmem:[%s8776_s3 + $0xb4] ss:$8 sps:$4 sm:$0xff]  }
 0xcae   : > { %4429 = vmatprep.subr.bf16.mxu0 %v6668_v42  ;;  %4480 = vmatprep.subr.bf16.mxu1 %v6670_v28  ;;  %v7570_v42 = vld [vmem:[%s8776_s3 + $0xb0] ss:$8 sps:$4 sm:$0xff]   ;;  %v7575_v28 = vld [vmem:[%s8776_s3 + $0xc4] ss:$8 sps:$4 sm:$0xff]  }
 0xcb1   : > { %4430 = vmatpush1.bf16.msra.mxu0 %v6667_v51  ;;  %4481 = vmatpush1.bf16.msra.mxu1 %v6669_v52  ;;  %v7579_v51 = vld [vmem:[%s8776_s3 + $0xe0] ss:$8 sps:$4 sm:$0xff]   ;;  %v7584_v52 = vld [vmem:[%s8776_s3 + $0xf4] ss:$8 sps:$4 sm:$0xff]  }
 0xcb2   : > { %4431 = vmatprep.subr.bf16.mxu0 %v6676_v38  ;;  %4482 = vmatprep.subr.bf16.mxu1 %v6678_v54  ;;  %v7582_v38 = vld [vmem:[%s8776_s3 + $0xf0] ss:$8 sps:$4 sm:$0xff]   ;;  %v7587_v54 = vld [vmem:[%s8776_s3 + $0x104] ss:$8 sps:$4 sm:$0xff]  }
 0xcb5   : > { %4432 = vmatpush1.bf16.msra.mxu0 %v6675_v63  ;;  %4483 = vmatpush1.bf16.msra.mxu1 %v6677_v62  ;;  %v9666_v63 = vrot.slane %v9648_v53, %v2165_v60 }
 0xcb6   : > { %4433 = vmatprep.subr.bf16.mxu0 %v6684_v1  ;;  %4484 = vmatprep.subr.bf16.mxu1 %v6686_v49 }
 0xcb9   : > { %4434 = vmatpush1.bf16.msra.mxu0 %v6683_v58  ;;  %4485 = vmatpush1.bf16.msra.mxu1 %v6685_v61 }
 0xcba   : > { %4435 = vmatprep.subr.bf16.mxu0 %v6692_v10  ;;  %4486 = vmatprep.subr.bf16.mxu1 %v6694_v11 }
 0xcbd   : > { %4436 = vmatpush1.bf16.msra.mxu0 %v6691_v41  ;;  %4487 = vmatpush1.bf16.msra.mxu1 %v6693_v43 }
 0xcbe   : > { %5519 = vmatprep.subr.bf16.mxu0 %v7539_v12 }
 0xcc0   : > { %4438 = vmatmul.mubr.bf16.vlgmr.msra.gmra.mrb[16].mxu0 %v9540_v48  ;;  %4489 = vmatmul.mubr.bf16.vlgmr.msra.gmra.mrb[48].mxu1 %v9540_v48  ;;  %v7546_v48 = vld [vmem:[%s8776_s3 + $0x30] ss:$8 sps:$4 sm:$0xff]  }
 0xcc1   : > { %4447 = vmatprep.mubr.bf16.mxu0 %v9548_v0  ;;  %4498 = vmatprep.mubr.bf16.mxu1 %v9548_v0  ;;  %v7551_v0 = vld [vmem:[%s8776_s3 + $0x44] ss:$8 sps:$4 sm:$0xff]  }
 0xcc2   : > { %5520 = vmatpush1.bf16.msra.mxu0 %v7537_v13 }
 0xcc3   : > { %5521 = vmatprep.subr.bf16.mxu0 %v7542_v40 }
 0xcc6   : > { %5522 = vmatpush1.bf16.msra.mxu0 %v7540_v14 }
 0xcc7   : > { %5523 = vmatprep.subr.bf16.mxu0 %v7545_v15 }
 0xcc8   : > { %4448 = vmatmul.mubr.bf16.gmra.mrb[20].mxu0 %v9556_v9  ;;  %4499 = vmatmul.mubr.bf16.gmra.mrb[52].mxu1 %v9556_v9  ;;  %v7555_v9 = vld [vmem:[%s8776_s3 + $0x60] ss:$8 sps:$4 sm:$0xff]  }
 0xcca   : > { %5524 = vmatpush1.bf16.msra.mxu0 %v7543_v17 }
 0xccb   : > { %5525 = vmatprep.subr.bf16.mxu0 %v7548_v18 }
 0xcce   : > { %5526 = vmatpush1.bf16.msra.mxu0 %v7546_v48 }
 0xccf   : > { %5527 = vmatprep.subr.bf16.mxu0 %v7551_v0 }
 0xcd2   : > { %5528 = vmatpush1.bf16.msra.mxu0 %v7549_v19 }
 0xcd3   : > { %5529 = vmatprep.subr.bf16.mxu0 %v7554_v20 }
 0xcd6   : > { %5530 = vmatpush1.bf16.msra.mxu0 %v7552_v26 }
 0xcd7   : > { %5531 = vmatprep.subr.bf16.mxu0 %v7557_v30 }
 0xcda   : > { %5532 = vmatpush1.bf16.msra.mxu0 %v7555_v9 }
 0xcdb   : > { %5533 = vmatprep.subr.bf16.mxu0 %v7560_v34 }
 0xcde   : > { %5534 = vmatpush1.bf16.msra.mxu0 %v7558_v36 }
 0xcdf   : > { %5535 = vmatprep.subr.bf16.mxu0 %v7563_v23 }
 0xce2   : > { %5536 = vmatpush1.bf16.msra.mxu0 %v7561_v37 }
 0xce3   : > { %5537 = vmatprep.subr.bf16.mxu0 %v7566_v25 }
 0xce6   : > { %5538 = vmatpush1.bf16.msra.mxu0 %v7564_v29 }
 0xce7   : > { %5539 = vmatprep.subr.bf16.mxu0 %v7569_v39 }
 0xcea   : > { %5540 = vmatpush1.bf16.msra.mxu0 %v7567_v16 }
 0xceb   : > { %5541 = vmatprep.subr.bf16.mxu0 %v7572_v44 }
 0xcee   : > { %5542 = vmatpush1.bf16.msra.mxu0 %v7570_v42 }
 0xcef   : > { %5543 = vmatprep.subr.bf16.mxu0 %v7575_v28 }
 0xcf2   : > { %5544 = vmatpush1.bf16.msra.mxu0 %v7573_v31 }
 0xcf3   : > { %5545 = vmatprep.subr.bf16.mxu0 %v7578_v45 }
 0xcf6   : > { %5546 = vmatpush1.bf16.msra.mxu0 %v7576_v56 }
 0xcf7   : > { %5547 = vmatprep.subr.bf16.mxu0 %v7581_v50 }
 0xcfa   : > { %5548 = vmatpush1.bf16.msra.mxu0 %v7579_v51 }
 0xcfb   : > { %5549 = vmatprep.subr.bf16.mxu0 %v7584_v52 }
 0xcfe   : > { %5550 = vmatpush1.bf16.msra.mxu0 %v7582_v38 }
 0xcff   : > { %5570 = vmatprep.subr.bf16.mxu0 %v7587_v54 }
 0xd53   : > { %v4337_v62 = vpop.f32.mrb[8].mxu0  ;;  %v4388_v1 = vpop.f32.mrb[40].mxu1 }
 0xd54   : > { %v9669_v49 = vadd.f32 %v4337_v62, %v9652_v35  ;;  %v9672_v2 = vadd.f32 %v4388_v1, %v9657_v55  ;;  %v4339_v3 = vpop.f32.mrb[9].mxu0  ;;  %v4390_v59 = vpop.f32.mrb[41].mxu1 }
 0xd55   : > { %v9675_v6 = vadd.f32 %v4339_v3, %v9661_v57  ;;  %v9678_v8 = vadd.f32 %v4390_v59, %v9666_v63  ;;  %v4341_v58 = vpop.f32.mrb[10].mxu0  ;;  %v4392_v61 = vpop.f32.mrb[42].mxu1 }
 0xd56   : > { %v4507_v60 = vmul.f32 %v9669_v49, %v9669_v49  ;;  %v4509_v10 = vmul.f32 %v9672_v2, %v9672_v2  ;;  %v9685_v11 = vadd.f32 %v4341_v58, %v9652_v35  ;;  %v9688_v41 = vadd.f32 %v4392_v61, %v9657_v55  ;;  %v4343_v43 = vpop.f32.mrb[11].mxu0  ;;  %v4394_v12 = vpop.f32.mrb[43].mxu1 }
 0xd57   : > { %v4508_v13 = vmul.f32 %v9675_v6, %v9675_v6  ;;  %v4510_v40 = vmul.f32 %v9678_v8, %v9678_v8  ;;  %v9695_v14 = vadd.f32 %v4343_v43, %v9661_v57  ;;  %v9698_v15 = vadd.f32 %v4394_v12, %v9666_v63 }
 0xd58   : > { %v4531_v17 = vmul.f32 %v4507_v60, %v9669_v49  ;;  %v4533_v18 = vmul.f32 %v4509_v10, %v9672_v2  ;;  %v4515_v48 = vmul.f32 %v9685_v11, %v9685_v11  ;;  %v4517_v0 = vmul.f32 %v9688_v41, %v9688_v41 }
 0xd59   : > { %v4532_v19 = vmul.f32 %v4508_v13, %v9675_v6  ;;  %v4534_v20 = vmul.f32 %v4510_v40, %v9678_v8  ;;  %v4516_v26 = vmul.f32 %v9695_v14, %v9695_v14  ;;  %v4518_v30 = vmul.f32 %v9698_v15, %v9698_v15 }
 0xd5a   : > { %v4555_v9 = vmul.f32 0.044715, %v4531_v17  ;;  %v4557_v34 = vmul.f32 0.044715, %v4533_v18  ;;  %v4539_v36 = vmul.f32 %v4515_v48, %v9685_v11  ;;  %v4541_v23 = vmul.f32 %v4517_v0, %v9688_v41 }
 0xd5b   : > { %v4556_v37 = vmul.f32 0.044715, %v4532_v19  ;;  %v4558_v25 = vmul.f32 0.044715, %v4534_v20  ;;  %v4540_v29 = vmul.f32 %v4516_v26, %v9695_v14  ;;  %v4542_v39 = vmul.f32 %v4518_v30, %v9698_v15  ;;  %v4347_v16 = vpop.f32.mrb[12].mxu0  ;;  %v9716_v44 = vpop.f32.mrb[44].mxu1 }
 0xd5c   : > { %v4579_v42 = vadd.f32 %v4555_v9, %v9669_v49  ;;  %v4581_v28 = vadd.f32 %v4557_v34, %v9672_v2  ;;  %v4563_v31 = vmul.f32 0.044715, %v4539_v36  ;;  %v4565_v45 = vmul.f32 0.044715, %v4541_v23  ;;  %v4349_v56 = vpop.f32.mrb[13].mxu0  ;;  %v9720_v50 = vpop.f32.mrb[45].mxu1 }
 0xd5d   : > { %v4580_v51 = vadd.f32 %v4556_v37, %v9675_v6  ;;  %v4582_v52 = vadd.f32 %v4558_v25, %v9678_v8  ;;  %v4564_v38 = vmul.f32 0.044715, %v4540_v29  ;;  %v4566_v54 = vmul.f32 0.044715, %v4542_v39  ;;  %v4351_v62 = vpop.f32.mrb[14].mxu0  ;;  %v4402_v1 = vpop.f32.mrb[46].mxu1 }
 0xd5e   : > { %v4603_v3 = vmul.f32 0.7978846, %v4579_v42  ;;  %v4605_v59 = vmul.f32 0.7978846, %v4581_v28  ;;  %v4587_v58 = vadd.f32 %v4563_v31, %v9685_v11  ;;  %v4589_v61 = vadd.f32 %v4565_v45, %v9688_v41  ;;  %v4352_v60 = vpop.f32.mrb[15].mxu0  ;;  %v4403_v10 = vpop.f32.mrb[47].mxu1 }
 0xd5f   : > { %v4604_v43 = vmul.f32 0.7978846, %v4580_v51  ;;  %v4606_v12 = vmul.f32 0.7978846, %v4582_v52  ;;  %v4588_v13 = vadd.f32 %v4564_v38, %v9695_v14  ;;  %v4590_v40 = vadd.f32 %v4566_v54, %v9698_v15 }
 0xd60   : > { %7765 = vtanh.f32 %v4603_v3  ;;  %v4611_v17 = vmul.f32 0.7978846, %v4587_v58  ;;  %v9729_v18 = vadd.f32 %v4347_v16, %v9652_v35  ;;  %v4613_v48 = vmul.f32 0.7978846, %v4589_v61 }
 0xd61   : > { %7767 = vtanh.f32 %v4605_v59  ;;  %v4612_v0 = vmul.f32 0.7978846, %v4588_v13  ;;  %v9734_v20 = vadd.f32 %v4349_v56, %v9661_v57  ;;  %v4614_v26 = vmul.f32 0.7978846, %v4590_v40 }
 0xd62   : > { %7769 = vtanh.f32 %v4604_v43  ;;  %v4523_v19 = vmul.f32 %v9729_v18, %v9729_v18 }
 0xd63   : > { %7771 = vtanh.f32 %v4606_v12  ;;  %v4524_v9 = vmul.f32 %v9734_v20, %v9734_v20 }
 0xd64   : > { %7773 = vtanh.f32 %v4611_v17  ;;  %v4547_v30 = vmul.f32 %v4523_v19, %v9729_v18 }
 0xd65   : > { %7775 = vtanh.f32 %v4613_v48  ;;  %v4548_v34 = vmul.f32 %v4524_v9, %v9734_v20 }
 0xd66   : > { %7777 = vtanh.f32 %v4612_v0  ;;  %v4571_v35 = vmul.f32 0.044715, %v4547_v30 }
 0xd67   : > { %7779 = vtanh.f32 %v4614_v26  ;;  %v4572_v23 = vmul.f32 0.044715, %v4548_v34 }
 0xd68   : > { %v4595_v36 = vadd.f32 %v4571_v35, %v9729_v18 }
 0xd69   : > { %v4596_v25 = vadd.f32 %v4572_v23, %v9734_v20 }
 0xd6a   : > { %v7766_v37 = vpop.eup %7765  ;;  %v4619_v57 = vmul.f32 0.7978846, %v4595_v36  ;;  %v7585_v36 = vld [vmem:[%s8776_s3 + $0x100] ss:$8 sps:$4 sm:$0xff]  }
 0xd6b   : > { %v7768_v29 = vpop.eup %7767  ;;  %v4651_v39 = vadd.f32 1.0, %v7766_v37  ;;  %v4620_v28 = vmul.f32 0.7978846, %v4596_v25  ;;  %v7590_v37 = vld [vmem:[%s8776_s3 + $0x114] ss:$8 sps:$4 sm:$0xff]  }
 0xd6c   : > { %v7770_v16 = vpop.eup %7769  ;;  %v4653_v42 = vadd.f32 1.0, %v7768_v29  ;;  %7781 = vtanh.f32 %v4619_v57  ;;  %v7588_v25 = vld [vmem:[%s8776_s3 + $0x110] ss:$8 sps:$4 sm:$0xff]  }
 0xd6d   : > { %v7772_v31 = vpop.eup %7771  ;;  %v4652_v45 = vadd.f32 1.0, %v7770_v16  ;;  %7783 = vtanh.f32 %v4620_v28  ;;  %v4675_v38 = vmul.f32 0.5, %v4651_v39  ;;  %v9767_v16 = vadd.f32 %v9720_v50, %v9666_v63  ;;  %v7594_v63 = vld [vmem:[%s8776_s3 + $0x130] ss:$8 sps:$4 sm:$0xff]  }
 0xd6e   : > { %v7774_v56 = vpop.eup %7773  ;;  %v4654_v51 = vadd.f32 1.0, %v7772_v31  ;;  %v4677_v1 = vmul.f32 0.5, %v4653_v42  ;;  %v7591_v31 = vld [vmem:[%s8776_s3 + $0x120] ss:$8 sps:$4 sm:$0xff]  }
 0xd6f   : > { %v7776_v52 = vpop.eup %7775  ;;  %v4659_v54 = vadd.f32 1.0, %v7774_v56  ;;  %v4676_v60 = vmul.f32 0.5, %v4652_v45  ;;  %v4699_v13 = vmul.f32 %v4675_v38, %v9669_v49  ;;  %v7596_v45 = vld [vmem:[%s8776_s3 + $0x134] ss:$8 sps:$4 sm:$0xff]  }
 0xd70   : > { %v7778_v62 = vpop.eup %7777  ;;  %v4661_v3 = vadd.f32 1.0, %v7776_v52  ;;  %v4678_v12 = vmul.f32 0.5, %v4654_v51  ;;  %v9745_v48 = vmul.f32 %v4677_v1, %v9672_v2  ;;  %v7597_v51 = vld [vmem:[%s8776_s3 + $0x140] ss:$8 sps:$4 sm:$0xff]   ;;  %v7602_v38 = vld [vmem:[%s8776_s3 + $0x154] ss:$8 sps:$4 sm:$0xff]  }
 0xd71   : > { %v7780_v59 = vpop.eup %7779  ;;  %v4683_v58 = vmul.f32 0.5, %v4659_v54  ;;  %v4660_v61 = vadd.f32 1.0, %v7778_v62  ;;  %v4700_v30 = vmul.f32 %v4676_v60, %v9675_v6  ;;  %v7600_v62 = vld [vmem:[%s8776_s3 + $0x150] ss:$8 sps:$4 sm:$0xff]   ;;  %v7603_v60 = vld [vmem:[%s8776_s3 + $0x160] ss:$8 sps:$4 sm:$0xff]  }
 0xd72   : > { %v4685_v10 = vmul.f32 0.5, %v4661_v3  ;;  %v4662_v43 = vadd.f32 1.0, %v7780_v59  ;;  %v7605_v3 = vld [vmem:[%s8776_s3 + $0x164] ss:$8 sps:$4 sm:$0xff]   ;;  %v3649_v59 = vsub.s32 6, %v9155_v4 }
 0xd73   : > { %v4707_v40 = vmul.f32 %v4683_v58, %v9685_v11  ;;  %v4684_v17 = vmul.f32 0.5, %v4660_v61  ;;  %v4702_v11 = vmul.f32 %v4678_v12, %v9678_v8  ;;  %v9761_v8 = vadd.f32 %v9716_v44, %v9657_v55 }
 0xd74   : > { %v9748_v0 = vmul.f32 %v4685_v10, %v9688_v41  ;;  %v4686_v19 = vmul.f32 0.5, %v4662_v43  ;;  %v3653_v61 = vsub.s32 7, %v9155_v4  ;;  %v9792_v43 = vrot.slane %v9648_v53, %v2169_v21 }
 0xd75   : > { %v4723_v26 = vpack.c.bf16 %v4707_v40, %v4699_v13  ;;  %v4708_v9 = vmul.f32 %v4684_v17, %v9695_v14  ;;  %v4525_v55 = vmul.f32 %v9761_v8, %v9761_v8  ;;  %v9795_v12 = vrot.slane %v9648_v53, %v3649_v59  ;;  %v7608_v13 = vld [vmem:[%s8776_s3 + $0x174] ss:$8 sps:$4 sm:$0xff]  }
 0xd76   : > { %v7782_v35 = vpop.eup %7781  ;;  %v4725_v49 = vpack.c.bf16 %v9748_v0, %v9745_v48  ;;  %v4710_v34 = vmul.f32 %v4686_v19, %v9698_v15  ;;  %v7593_v15 = vld [vmem:[%s8776_s3 + $0x124] ss:$8 sps:$4 sm:$0xff]   ;;  %v9801_v17 = vrot.slane %v9648_v53, %v2173_v22  ;;  %v9804_v19 = vrot.slane %v9648_v53, %v3653_v61  ;;  %v7642_v48 = vld [vmem:[%s8776_s3 + $0x230] ss:$8 sps:$4 sm:$0xff]  }
 0xd77   : > { %v4724_v2 = vpack.c.bf16 %v4708_v9, %v4700_v30  ;;  %v4667_v41 = vadd.f32 1.0, %v7782_v35  ;;  %v7784_v23 = vpop.eup %7783  ;;  %v4549_v50 = vmul.f32 %v4525_v55, %v9761_v8  ;;  %v7606_v9 = vld [vmem:[%s8776_s3 + $0x170] ss:$8 sps:$4 sm:$0xff]   ;;  %v7647_v0 = vld [vmem:[%s8776_s3 + $0x244] ss:$8 sps:$4 sm:$0xff]  }
 0xd78   : > { %v4726_v57 = vpack.c.bf16 %v4710_v34, %v4702_v11  ;;  %v4668_v6 = vadd.f32 1.0, %v7784_v23  ;;  %v7611_v34 = vld [vmem:[%s8776_s3 + $0x184] ss:$8 sps:$4 sm:$0xff]  }
 0xd79   : > { %5551 = vmatprep.mubr.bf16.mxu0 %v4724_v2  ;;  %v4691_v14 = vmul.f32 0.5, %v4667_v41  ;;  %v4573_v52 = vmul.f32 0.044715, %v4549_v50 }
 0xd7a   : > { %5552 = vmatmul.mubr.bf16.vlgmr.msra.gmra.mrb[24].mxu0 %v4723_v26  ;;  %v4692_v29 = vmul.f32 0.5, %v4668_v6 }
 0xd7b   : > { %5571 = vmatpush1.bf16.msra.mxu0 %v7585_v36  ;;  %v4715_v39 = vmul.f32 %v4691_v14, %v9729_v18  ;;  %v4526_v18 = vmul.f32 %v9767_v16, %v9767_v16  ;;  %v4597_v1 = vadd.f32 %v4573_v52, %v9761_v8 }
 0xd7c   : > { %5572 = vmatprep.subr.bf16.mxu0 %v7590_v37  ;;  %v4716_v42 = vmul.f32 %v4692_v29, %v9734_v20  ;;  %v7599_v20 = vld [vmem:[%s8776_s3 + $0x144] ss:$8 sps:$4 sm:$0xff]  }
 0xd7d   : > { %v4731_v44 = vpack.c.bf16 %v4715_v39, %v4715_v39  ;;  %v4550_v56 = vmul.f32 %v4526_v18, %v9767_v16  ;;  %v4621_v10 = vmul.f32 0.7978846, %v4597_v1 }
 0xd7e   : > { %v4732_v28 = vpack.c.bf16 %v4716_v42, %v4716_v42  ;;  %v7609_v42 = vld [vmem:[%s8776_s3 + $0x180] ss:$8 sps:$4 sm:$0xff]  }
 0xd7f   : > { %5573 = vmatpush1.bf16.msra.mxu0 %v7588_v25  ;;  %v4574_v54 = vmul.f32 0.044715, %v4550_v56  ;;  %7785 = vtanh.f32 %v4621_v10  ;;  %v7612_v56 = vld [vmem:[%s8776_s3 + $0x190] ss:$8 sps:$4 sm:$0xff]  }
 0xd80   : > { %5574 = vmatprep.subr.bf16.mxu0 %v7593_v15  ;;  %5561 = vmatprep.mubr.bf16.mxu0 %v4732_v28 }
 0xd81   : > { %v4598_v58 = vadd.f32 %v4574_v54, %v9767_v16 }
 0xd82   : > { %5562 = vmatmul.mubr.bf16.gmra.mrb[28].mxu0 %v4731_v44 }
 0xd83   : > { %5575 = vmatpush1.bf16.msra.mxu0 %v7591_v31  ;;  %5602 = vmatprep.mubr.bf16.mxu0 %v4726_v57  ;;  %v4622_v40 = vmul.f32 0.7978846, %v4598_v58 }
 0xd84   : > { %5576 = vmatprep.subr.bf16.mxu0 %v7596_v45  ;;  %v7614_v45 = vld [vmem:[%s8776_s3 + $0x194] ss:$8 sps:$4 sm:$0xff]  }
 0xd85   : > { %7787 = vtanh.f32 %v4622_v40 }
 0xd87   : > { %5577 = vmatpush1.bf16.msra.mxu0 %v7594_v63 }
 0xd88   : > { %5578 = vmatprep.subr.bf16.mxu0 %v7599_v20 }
 0xd8b   : > { %5579 = vmatpush1.bf16.msra.mxu0 %v7597_v51 }
 0xd8c   : > { %5580 = vmatprep.subr.bf16.mxu0 %v7602_v38 }
 0xd8f   : > { %5581 = vmatpush1.bf16.msra.mxu0 %v7600_v62  ;;  %v7617_v62 = vld [vmem:[%s8776_s3 + $0x1a4] ss:$8 sps:$4 sm:$0xff]  }
 0xd90   : > { %5582 = vmatprep.subr.bf16.mxu0 %v7605_v3 }
 0xd93   : > { %5583 = vmatpush1.bf16.msra.mxu0 %v7603_v60  ;;  %v4439_v26 = vpop.f32.mrb[16].mxu0  ;;  %v4490_v30 = vpop.f32.mrb[48].mxu1 }
 0xd94   : > { %v9808_v21 = vadd.f32 %v4439_v26, %v9792_v43  ;;  %v9811_v35 = vadd.f32 %v4490_v30, %v9795_v12  ;;  %5584 = vmatprep.subr.bf16.mxu0 %v7608_v13  ;;  %v4441_v11 = vpop.f32.mrb[17].mxu0  ;;  %v4492_v4 = vpop.f32.mrb[49].mxu1 }
 0xd95   : > { %v9815_v22 = vadd.f32 %v4441_v11, %v9801_v17  ;;  %v9818_v53 = vadd.f32 %v4492_v4, %v9804_v19  ;;  %v4443_v2 = vpop.f32.mrb[18].mxu0  ;;  %v4494_v36 = vpop.f32.mrb[50].mxu1 }
 0xd96   : > { %v4511_v41 = vmul.f32 %v9808_v21, %v9808_v21  ;;  %v4513_v23 = vmul.f32 %v9811_v35, %v9811_v35  ;;  %v9825_v37 = vadd.f32 %v4443_v2, %v9792_v43  ;;  %v9828_v57 = vadd.f32 %v4494_v36, %v9795_v12  ;;  %v4445_v6 = vpop.f32.mrb[19].mxu0  ;;  %v4496_v14 = vpop.f32.mrb[51].mxu1 }
 0xd97   : > { %v4512_v25 = vmul.f32 %v9815_v22, %v9815_v22  ;;  %v4514_v29 = vmul.f32 %v9818_v53, %v9818_v53  ;;  %5585 = vmatpush1.bf16.msra.mxu0 %v7606_v9  ;;  %v9835_v15 = vadd.f32 %v4445_v6, %v9801_v17  ;;  %v9838_v39 = vadd.f32 %v4496_v14, %v9804_v19 }
 0xd98   : > { %v4535_v28 = vmul.f32 %v4511_v41, %v9808_v21  ;;  %v4537_v31 = vmul.f32 %v4513_v23, %v9811_v35  ;;  %v4519_v55 = vmul.f32 %v9825_v37, %v9825_v37  ;;  %v4521_v44 = vmul.f32 %v9828_v57, %v9828_v57  ;;  %5586 = vmatprep.subr.bf16.mxu0 %v7611_v34  ;;  %v9872_v23 = vpop.eup %7785 }
 0xd99   : > { %v4536_v18 = vmul.f32 %v4512_v25, %v9815_v22  ;;  %v4538_v63 = vmul.f32 %v4514_v29, %v9818_v53  ;;  %v4520_v50 = vmul.f32 %v9835_v15, %v9835_v15  ;;  %v4522_v20 = vmul.f32 %v9838_v39, %v9838_v39 }
 0xd9a   : > { %v4559_v51 = vmul.f32 0.044715, %v4535_v28  ;;  %v4561_v52 = vmul.f32 0.044715, %v4537_v31  ;;  %v4543_v38 = vmul.f32 %v4519_v55, %v9825_v37  ;;  %v4545_v54 = vmul.f32 %v4521_v44, %v9828_v57  ;;  %v7788_v31 = vpop.eup %7787 }
 0xd9b   : > { %v4560_v1 = vmul.f32 0.044715, %v4536_v18  ;;  %v4562_v3 = vmul.f32 0.044715, %v4538_v63  ;;  %v4544_v59 = vmul.f32 %v4520_v50, %v9835_v15  ;;  %v4546_v58 = vmul.f32 %v4522_v20, %v9838_v39  ;;  %5587 = vmatpush1.bf16.msra.mxu0 %v7609_v42  ;;  %v9860_v61 = vpop.f32.mrb[20].mxu0  ;;  %v9862_v60 = vpop.f32.mrb[52].mxu1 }
 0xd9c   : > { %v4583_v10 = vadd.f32 %v4559_v51, %v9808_v21  ;;  %v4585_v13 = vadd.f32 %v4561_v52, %v9811_v35  ;;  %v4567_v40 = vmul.f32 0.044715, %v4543_v38  ;;  %v4569_v26 = vmul.f32 0.044715, %v4545_v54  ;;  %5588 = vmatprep.subr.bf16.mxu0 %v7614_v45  ;;  %v9866_v30 = vpop.f32.mrb[21].mxu0  ;;  %v9868_v9 = vpop.f32.mrb[53].mxu1 }
 0xd9d   : > { %v4584_v11 = vadd.f32 %v4560_v1, %v9815_v22  ;;  %v4586_v4 = vadd.f32 %v4562_v3, %v9818_v53  ;;  %v4568_v34 = vmul.f32 0.044715, %v4544_v59  ;;  %v4570_v2 = vmul.f32 0.044715, %v4546_v58  ;;  %v4453_v36 = vpop.f32.mrb[22].mxu0  ;;  %v4504_v41 = vpop.f32.mrb[54].mxu1 }
 0xd9e   : > { %v4607_v6 = vmul.f32 0.7978846, %v4583_v10  ;;  %v4609_v14 = vmul.f32 0.7978846, %v4585_v13  ;;  %v4591_v25 = vadd.f32 %v4567_v40, %v9825_v37  ;;  %v4593_v29 = vadd.f32 %v4569_v26, %v9828_v57  ;;  %v4454_v42 = vpop.f32.mrb[23].mxu0  ;;  %v4505_v28 = vpop.f32.mrb[55].mxu1 }
 0xd9f   : > { %v4608_v55 = vmul.f32 0.7978846, %v4584_v11  ;;  %v4610_v44 = vmul.f32 0.7978846, %v4586_v4  ;;  %v4592_v45 = vadd.f32 %v4568_v34, %v9835_v15  ;;  %v4594_v18 = vadd.f32 %v4570_v2, %v9838_v39  ;;  %5589 = vmatpush1.bf16.msra.mxu0 %v7612_v56  ;;  %v7615_v63 = vld [vmem:[%s8776_s3 + $0x1a0] ss:$8 sps:$4 sm:$0xff]  }
 0xda0   : > { %7789 = vtanh.f32 %v4607_v6  ;;  %v4615_v50 = vmul.f32 0.7978846, %v4591_v25  ;;  %5590 = vmatprep.subr.bf16.mxu0 %v7617_v62  ;;  %v7620_v20 = vld [vmem:[%s8776_s3 + $0x1b4] ss:$8 sps:$4 sm:$0xff]   ;;  %v4617_v51 = vmul.f32 0.7978846, %v4593_v29 }
 0xda1   : > { %7791 = vtanh.f32 %v4609_v14  ;;  %v4616_v52 = vmul.f32 0.7978846, %v4592_v45  ;;  %v4618_v38 = vmul.f32 0.7978846, %v4594_v18  ;;  %v7618_v54 = vld [vmem:[%s8776_s3 + $0x1b0] ss:$8 sps:$4 sm:$0xff]  }
 0xda2   : > { %7793 = vtanh.f32 %v4608_v55  ;;  %v7623_v56 = vld [vmem:[%s8776_s3 + $0x1c4] ss:$8 sps:$4 sm:$0xff]   ;;  %v7621_v62 = vld [vmem:[%s8776_s3 + $0x1c0] ss:$8 sps:$4 sm:$0xff]   ;;  %v7626_v1 = vld [vmem:[%s8776_s3 + $0x1d4] ss:$8 sps:$4 sm:$0xff]  }
 0xda3   : > { %7795 = vtanh.f32 %v4610_v44  ;;  %5591 = vmatpush1.bf16.msra.mxu0 %v7615_v63  ;;  %v7624_v10 = vld [vmem:[%s8776_s3 + $0x1d0] ss:$8 sps:$4 sm:$0xff]   ;;  %v7629_v26 = vld [vmem:[%s8776_s3 + $0x1e4] ss:$8 sps:$4 sm:$0xff]   ;;  %v4670_v4 = vadd.f32 1.0, %v7788_v31 }
 0xda4   : > { %7797 = vtanh.f32 %v4615_v50  ;;  %5592 = vmatprep.subr.bf16.mxu0 %v7620_v20  ;;  %v7627_v25 = vld [vmem:[%s8776_s3 + $0x1e0] ss:$8 sps:$4 sm:$0xff]   ;;  %v7632_v55 = vld [vmem:[%s8776_s3 + $0x1f4] ss:$8 sps:$4 sm:$0xff]  }
 0xda5   : > { %7799 = vtanh.f32 %v4617_v51  ;;  %v4694_v18 = vmul.f32 0.5, %v4670_v4  ;;  %v7641_v4 = vld [vmem:[%s8776_s3 + $0x224] ss:$8 sps:$4 sm:$0xff]  }
 0xda6   : > { %7801 = vtanh.f32 %v4616_v52 }
 0xda7   : > { %7803 = vtanh.f32 %v4618_v38  ;;  %5593 = vmatpush1.bf16.msra.mxu0 %v7618_v54  ;;  %v7630_v54 = vld [vmem:[%s8776_s3 + $0x1f0] ss:$8 sps:$4 sm:$0xff]  }
 0xda8   : > { %5594 = vmatprep.subr.bf16.mxu0 %v7623_v56 }
 0xdaa   : > { %v7790_v3 = vpop.eup %7789 }
 0xdab   : > { %v7792_v59 = vpop.eup %7791  ;;  %v4655_v58 = vadd.f32 1.0, %v7790_v3  ;;  %5595 = vmatpush1.bf16.msra.mxu0 %v7621_v62  ;;  %v7635_v3 = vld [vmem:[%s8776_s3 + $0x204] ss:$8 sps:$4 sm:$0xff]  }
 0xdac   : > { %v7794_v13 = vpop.eup %7793  ;;  %v4657_v40 = vadd.f32 1.0, %v7792_v59  ;;  %5596 = vmatprep.subr.bf16.mxu0 %v7626_v1  ;;  %v4669_v59 = vadd.f32 1.0, %v9872_v23 }
 0xdad   : > { %v7796_v11 = vpop.eup %7795  ;;  %v4656_v34 = vadd.f32 1.0, %v7794_v13  ;;  %v4679_v6 = vmul.f32 0.5, %v4655_v58  ;;  %v4718_v58 = vmul.f32 %v4694_v18, %v9767_v16  ;;  %v7638_v16 = vld [vmem:[%s8776_s3 + $0x214] ss:$8 sps:$4 sm:$0xff]  }
 0xdae   : > { %v7798_v2 = vpop.eup %7797  ;;  %v4658_v36 = vadd.f32 1.0, %v7796_v11  ;;  %v4681_v42 = vmul.f32 0.5, %v4657_v40  ;;  %v7633_v40 = vld [vmem:[%s8776_s3 + $0x200] ss:$8 sps:$4 sm:$0xff]  }
 0xdaf   : > { %v7800_v41 = vpop.eup %7799  ;;  %v4663_v14 = vadd.f32 1.0, %v7798_v2  ;;  %5597 = vmatpush1.bf16.msra.mxu0 %v7624_v10  ;;  %v4680_v31 = vmul.f32 0.5, %v4656_v34  ;;  %v9889_v52 = vmul.f32 %v4679_v6, %v9808_v21  ;;  %v4734_v11 = vpack.c.bf16 %v4718_v58, %v4718_v58  ;;  %v7639_v34 = vld [vmem:[%s8776_s3 + $0x220] ss:$8 sps:$4 sm:$0xff]   ;;  %v7648_v6 = vld [vmem:[%s8776_s3 + $0x250] ss:$8 sps:$4 sm:$0xff]  }
 0xdb0   : > { %v7802_v29 = vpop.eup %7801  ;;  %v4665_v28 = vadd.f32 1.0, %v7800_v41  ;;  %5598 = vmatprep.subr.bf16.mxu0 %v7629_v26  ;;  %v4682_v51 = vmul.f32 0.5, %v4658_v36  ;;  %v9896_v62 = vmul.f32 %v4681_v42, %v9811_v35  ;;  %v7644_v36 = vld [vmem:[%s8776_s3 + $0x234] ss:$8 sps:$4 sm:$0xff]   ;;  %v7671_v58 = vld [vmem:[%s8776_s3 + $0x2c4] ss:$8 sps:$4 sm:$0xff]  }
 0xdb1   : > { %v7804_v44 = vpop.eup %7803  ;;  %v4687_v45 = vmul.f32 0.5, %v4663_v14  ;;  %v4664_v63 = vadd.f32 1.0, %v7802_v29  ;;  %v4704_v10 = vmul.f32 %v4680_v31, %v9815_v22  ;;  %v4693_v22 = vmul.f32 0.5, %v4669_v59  ;;  %v7650_v41 = vld [vmem:[%s8776_s3 + $0x254] ss:$8 sps:$4 sm:$0xff]  }
 0xdb2   : > { %v4689_v50 = vmul.f32 0.5, %v4665_v28  ;;  %v4666_v20 = vadd.f32 1.0, %v7804_v44  ;;  %v9911_v13 = vmul.f32 %v4682_v51, %v9818_v53  ;;  %v7636_v53 = vld [vmem:[%s8776_s3 + $0x210] ss:$8 sps:$4 sm:$0xff]   ;;  %v9942_v29 = vadd.f32 %v9860_v61, %v9792_v43  ;;  %v7656_v42 = vld [vmem:[%s8776_s3 + $0x274] ss:$8 sps:$4 sm:$0xff]  }
 0xdb3   : > { %v9892_v38 = vmul.f32 %v4687_v45, %v9825_v37  ;;  %5599 = vmatpush1.bf16.msra.mxu0 %v7627_v25  ;;  %v4688_v56 = vmul.f32 0.5, %v4664_v63  ;;  %v7653_v25 = vld [vmem:[%s8776_s3 + $0x264] ss:$8 sps:$4 sm:$0xff]   ;;  %v7657_v61 = vld [vmem:[%s8776_s3 + $0x280] ss:$8 sps:$4 sm:$0xff]  }
 0xdb4   : > { %v9899_v1 = vmul.f32 %v4689_v50, %v9828_v57  ;;  %5600 = vmatprep.subr.bf16.mxu0 %v7632_v55  ;;  %v4690_v21 = vmul.f32 0.5, %v4666_v20  ;;  %v4527_v28 = vmul.f32 %v9942_v29, %v9942_v29  ;;  %v7654_v55 = vld [vmem:[%s8776_s3 + $0x270] ss:$8 sps:$4 sm:$0xff]   ;;  %v7659_v45 = vld [vmem:[%s8776_s3 + $0x284] ss:$8 sps:$4 sm:$0xff]  }
 0xdb5   : > { %v4727_v37 = vpack.c.bf16 %v9892_v38, %v9889_v52  ;;  %v4712_v35 = vmul.f32 %v4688_v56, %v9835_v15  ;;  %v7662_v63 = vld [vmem:[%s8776_s3 + $0x294] ss:$8 sps:$4 sm:$0xff]   ;;  %v7660_v50 = vld [vmem:[%s8776_s3 + $0x290] ss:$8 sps:$4 sm:$0xff]   ;;  %v7665_v51 = vld [vmem:[%s8776_s3 + $0x2a4] ss:$8 sps:$4 sm:$0xff]  }
 0xdb6   : > { %v4729_v57 = vpack.c.bf16 %v9899_v1, %v9896_v62  ;;  %v9914_v23 = vmul.f32 %v4690_v21, %v9838_v39  ;;  %v4717_v39 = vmul.f32 %v4693_v22, %v9761_v8  ;;  %v9933_v8 = vadd.f32 %v9866_v30, %v9801_v17  ;;  %v7651_v17 = vld [vmem:[%s8776_s3 + $0x260] ss:$8 sps:$4 sm:$0xff]   ;;  %v7666_v21 = vld [vmem:[%s8776_s3 + $0x2b0] ss:$8 sps:$4 sm:$0xff]   ;;  %v7695_v38 = vld [vmem:[%s8776_s3 + $0x344] ss:$8 sps:$4 sm:$0xff]  }
 0xdb7   : > { %5601 = vmatpush1.bf16.msra.mxu0 %v7630_v54  ;;  %v4728_v26 = vpack.c.bf16 %v4712_v35, %v4704_v10  ;;  %v4551_v43 = vmul.f32 %v4527_v28, %v9942_v29  ;;  %v7663_v56 = vld [vmem:[%s8776_s3 + $0x2a0] ss:$8 sps:$4 sm:$0xff]   ;;  %v7674_v35 = vld [vmem:[%s8776_s3 + $0x2d4] ss:$8 sps:$4 sm:$0xff]   ;;  %v7690_v52 = vld [vmem:[%s8776_s3 + $0x330] ss:$8 sps:$4 sm:$0xff]  }
 0xdb8   : > { %5621 = vmatprep.subr.bf16.mxu0 %v7635_v3  ;;  %v4730_v15 = vpack.c.bf16 %v9914_v23, %v9911_v13  ;;  %v4733_v2 = vpack.c.bf16 %v4717_v39, %v4717_v39  ;;  %v4528_v14 = vmul.f32 %v9933_v8, %v9933_v8  ;;  %v7668_v3 = vld [vmem:[%s8776_s3 + $0x2b4] ss:$8 sps:$4 sm:$0xff]   ;;  %v7669_v10 = vld [vmem:[%s8776_s3 + $0x2c0] ss:$8 sps:$4 sm:$0xff]   ;;  %v7701_v23 = vld [vmem:[%s8776_s3 + $0x364] ss:$8 sps:$4 sm:$0xff]  }
 0xdb9   : > { %v4575_v31 = vmul.f32 0.044715, %v4551_v43  ;;  %v7698_v28 = vld [vmem:[%s8776_s3 + $0x354] ss:$8 sps:$4 sm:$0xff]   ;;  %v7702_v43 = vld [vmem:[%s8776_s3 + $0x370] ss:$8 sps:$4 sm:$0xff]  }
 0xdba   : > { %5603 = vmatmul.mubr.bf16.vlgmr.msra.gmra.mrb[24].mxu0 %v4725_v49  ;;  %v7645_v49 = vld [vmem:[%s8776_s3 + $0x240] ss:$8 sps:$4 sm:$0xff]   ;;  %v4552_v30 = vmul.f32 %v4528_v14, %v9933_v8  ;;  %v7684_v14 = vld [vmem:[%s8776_s3 + $0x310] ss:$8 sps:$4 sm:$0xff]  }
 0xdbb   : > { %5612 = vmatprep.mubr.bf16.mxu0 %v4734_v11  ;;  %5622 = vmatpush1.bf16.msra.mxu0 %v7633_v40  ;;  %v4599_v54 = vadd.f32 %v4575_v31, %v9942_v29  ;;  %v7675_v11 = vld [vmem:[%s8776_s3 + $0x2e0] ss:$8 sps:$4 sm:$0xff]   ;;  %v7710_v31 = vld [vmem:[%s8776_s3 + $0x394] ss:$8 sps:$4 sm:$0xff]  }
 0xdbc   : > { %5623 = vmatprep.subr.bf16.mxu0 %v7638_v16  ;;  %v4576_v44 = vmul.f32 0.044715, %v4552_v30  ;;  %v7677_v16 = vld [vmem:[%s8776_s3 + $0x2e4] ss:$8 sps:$4 sm:$0xff]  }
 0xdbd   : > { %v4623_v59 = vmul.f32 0.7978846, %v4599_v54  ;;  %v7713_v54 = vld [vmem:[%s8776_s3 + $0x3a4] ss:$8 sps:$4 sm:$0xff]  }
 0xdbe   : > { %v4600_v18 = vadd.f32 %v4576_v44, %v9933_v8  ;;  %v7699_v44 = vld [vmem:[%s8776_s3 + $0x360] ss:$8 sps:$4 sm:$0xff]  }
 0xdbf   : > { %5624 = vmatpush1.bf16.msra.mxu0 %v7636_v53  ;;  %v7680_v53 = vld [vmem:[%s8776_s3 + $0x2f4] ss:$8 sps:$4 sm:$0xff]  }
 0xdc0   : > { %5625 = vmatprep.subr.bf16.mxu0 %v7641_v4  ;;  %v4624_v20 = vmul.f32 0.7978846, %v4600_v18  ;;  %v7707_v18 = vld [vmem:[%s8776_s3 + $0x384] ss:$8 sps:$4 sm:$0xff]  }
 0xdc2   : > { %5613 = vmatmul.mubr.bf16.gmra.mrb[28].mxu0 %v4733_v2  ;;  %7805 = vtanh.f32 %v4624_v20  ;;  %v7683_v2 = vld [vmem:[%s8776_s3 + $0x304] ss:$8 sps:$4 sm:$0xff]   ;;  %v7708_v20 = vld [vmem:[%s8776_s3 + $0x390] ss:$8 sps:$4 sm:$0xff]  }
 0xdc3   : > { %5626 = vmatpush1.bf16.msra.mxu0 %v7639_v34  ;;  %5653 = vmatprep.mubr.bf16.mxu0 %v4728_v26  ;;  %7807 = vtanh.f32 %v4623_v59  ;;  %v7672_v26 = vld [vmem:[%s8776_s3 + $0x2d0] ss:$8 sps:$4 sm:$0xff]   ;;  %v7716_v59 = vld [vmem:[%s8776_s3 + $0x3b4] ss:$8 sps:$4 sm:$0xff]  }
 0xdc4   : > { %5627 = vmatprep.subr.bf16.mxu0 %v7644_v36  ;;  %v7678_v34 = vld [vmem:[%s8776_s3 + $0x2f0] ss:$8 sps:$4 sm:$0xff]  }
 0xdc7   : > { %5628 = vmatpush1.bf16.msra.mxu0 %v7642_v48 }
 0xdc8   : > { %5629 = vmatprep.subr.bf16.mxu0 %v7647_v0  ;;  %v7681_v0 = vld [vmem:[%s8776_s3 + $0x300] ss:$8 sps:$4 sm:$0xff]  }
 0xdcb   : > { %5630 = vmatpush1.bf16.msra.mxu0 %v7645_v49  ;;  %v7686_v49 = vld [vmem:[%s8776_s3 + $0x314] ss:$8 sps:$4 sm:$0xff]  }
 0xdcc   : > { %5631 = vmatprep.subr.bf16.mxu0 %v7650_v41  ;;  %v7806_v40 = vpop.eup %7805 }
 0xdcd   : > { %v4672_v22 = vadd.f32 1.0, %v7806_v40  ;;  %v7808_v39 = vpop.eup %7807  ;;  %v7722_v40 = vld [vmem:[%s8776_s3 + $0x3d4] ss:$8 sps:$4 sm:$0xff]  }
 0xdce   : > { %v4671_v36 = vadd.f32 1.0, %v7808_v39  ;;  %v7728_v39 = vld [vmem:[%s8776_s3 + $0x3f4] ss:$8 sps:$4 sm:$0xff]  }
 0xdcf   : > { %5632 = vmatpush1.bf16.msra.mxu0 %v7648_v6  ;;  %v4696_v4 = vmul.f32 0.5, %v4672_v22  ;;  %v7725_v22 = vld [vmem:[%s8776_s3 + $0x3e4] ss:$8 sps:$4 sm:$0xff]  }
 0xdd0   : > { %5633 = vmatprep.subr.bf16.mxu0 %v7653_v25  ;;  %v4695_v41 = vmul.f32 0.5, %v4671_v36  ;;  %v7689_v25 = vld [vmem:[%s8776_s3 + $0x324] ss:$8 sps:$4 sm:$0xff]  }
 0xdd1   : > { %v4720_v48 = vmul.f32 %v4696_v4, %v9933_v8 }
 0xdd2   : > { %v4719_v8 = vmul.f32 %v4695_v41, %v9942_v29  ;;  %v9989_v29 = vadd.f32 %v9868_v9, %v9804_v19  ;;  %v7704_v9 = vld [vmem:[%s8776_s3 + $0x374] ss:$8 sps:$4 sm:$0xff]  }
 0xdd3   : > { %5634 = vmatpush1.bf16.msra.mxu0 %v7651_v17  ;;  %v4736_v6 = vpack.c.bf16 %v4720_v48, %v4720_v48  ;;  %v7687_v17 = vld [vmem:[%s8776_s3 + $0x320] ss:$8 sps:$4 sm:$0xff]  }
 0xdd4   : > { %5635 = vmatprep.subr.bf16.mxu0 %v7656_v42  ;;  %v4735_v30 = vpack.c.bf16 %v4719_v8, %v4719_v8  ;;  %v7692_v42 = vld [vmem:[%s8776_s3 + $0x334] ss:$8 sps:$4 sm:$0xff]   ;;  %v4530_v13 = vmul.f32 %v9989_v29, %v9989_v29 }
 0xdd5   : > { %v5723_v8 = vld [vmem:[%s10346_s21] sm:$0x3] }
 0xdd6   : > { %v4554_v19 = vmul.f32 %v4530_v13, %v9989_v29 }
 0xdd7   : > { %5636 = vmatpush1.bf16.msra.mxu0 %v7654_v55  ;;  %v7696_v55 = vld [vmem:[%s8776_s3 + $0x350] ss:$8 sps:$4 sm:$0xff]  }
 0xdd8   : > { %5637 = vmatprep.subr.bf16.mxu0 %v7659_v45 }
 0xddb   : > { %5638 = vmatpush1.bf16.msra.mxu0 %v7657_v61  ;;  %v4578_v61 = vmul.f32 0.044715, %v4554_v19 }
 0xddc   : > { %5639 = vmatprep.subr.bf16.mxu0 %v7662_v63 }
 0xddf   : > { %5640 = vmatpush1.bf16.msra.mxu0 %v7660_v50 }
 0xde0   : > { %5641 = vmatprep.subr.bf16.mxu0 %v7665_v51 }
 0xde3   : > { %5642 = vmatpush1.bf16.msra.mxu0 %v7663_v56 }
 0xde4   : > { %5643 = vmatprep.subr.bf16.mxu0 %v7668_v3  ;;  %v7711_v3 = vld [vmem:[%s8776_s3 + $0x3a0] ss:$8 sps:$4 sm:$0xff]  }
 0xde7   : > { %5644 = vmatpush1.bf16.msra.mxu0 %v7666_v21 }
 0xde8   : > { %5645 = vmatprep.subr.bf16.mxu0 %v7671_v58  ;;  %v7714_v58 = vld [vmem:[%s8776_s3 + $0x3b0] ss:$8 sps:$4 sm:$0xff]  }
 0xdeb   : > { %5646 = vmatpush1.bf16.msra.mxu0 %v7669_v10  ;;  %v7719_v10 = vld [vmem:[%s8776_s3 + $0x3c4] ss:$8 sps:$4 sm:$0xff]  }
 0xdec   : > { %5647 = vmatprep.subr.bf16.mxu0 %v7674_v35  ;;  %v7717_v35 = vld [vmem:[%s8776_s3 + $0x3c0] ss:$8 sps:$4 sm:$0xff]  }
 0xdef   : > { %5648 = vmatpush1.bf16.msra.mxu0 %v7672_v26 }
 0xdf0   : > { %5649 = vmatprep.subr.bf16.mxu0 %v7677_v16  ;;  %v7720_v16 = vld [vmem:[%s8776_s3 + $0x3d0] ss:$8 sps:$4 sm:$0xff]  }
 0xdf3   : > { %5650 = vmatpush1.bf16.msra.mxu0 %v7675_v11 }
 0xdf4   : > { %5651 = vmatprep.subr.bf16.mxu0 %v7680_v53  ;;  %v7723_v53 = vld [vmem:[%s8776_s3 + $0x3e0] ss:$8 sps:$4 sm:$0xff]  }
 0xdf7   : > { %5652 = vmatpush1.bf16.msra.mxu0 %v7678_v34 }
 0xdf8   : > { %5672 = vmatprep.subr.bf16.mxu0 %v7683_v2  ;;  %v7726_v2 = vld [vmem:[%s8776_s3 + $0x3f0] ss:$8 sps:$4 sm:$0xff]  }
 0xdfa   : > { %5654 = vmatmul.mubr.bf16.vlgmr.msra.gmra.mrb[24].mxu0 %v4727_v37  ;;  %v7693_v37 = vld [vmem:[%s8776_s3 + $0x340] ss:$8 sps:$4 sm:$0xff]  }
 0xdfb   : > { %5663 = vmatprep.mubr.bf16.mxu0 %v4736_v6  ;;  %5673 = vmatpush1.bf16.msra.mxu0 %v7681_v0 }
 0xdfc   : > { %5674 = vmatprep.subr.bf16.mxu0 %v7686_v49 }
 0xdff   : > { %5675 = vmatpush1.bf16.msra.mxu0 %v7684_v14  ;;  %v4867_v14 = vld [vmem:[%s10345_s14] sm:$0x3] }
 0xe00   : > { %5676 = vmatprep.subr.bf16.mxu0 %v7689_v25  ;;  %v4872_v25 = vrot.slane %v4867_v14, %v9166_v7 }
 0xe02   : > { %5664 = vmatmul.mubr.bf16.gmra.mrb[28].mxu0 %v4735_v30  ;;  %v5728_v30 = vrot.slane %v5723_v8, %v9166_v7 }
 0xe03   : > { %5677 = vmatpush1.bf16.msra.mxu0 %v7687_v17  ;;  %5704 = vmatprep.mubr.bf16.mxu0 %v4730_v15  ;;  %v4501_v15 = vadd.f32 %v9862_v60, %v9795_v12  ;;  %v7705_v12 = vld [vmem:[%s8776_s3 + $0x380] ss:$8 sps:$4 sm:$0xff]   ;;  %v4602_v60 = vadd.f32 %v4578_v61, %v9989_v29  ;;  %v4876_v17 = vrot.slane %v4867_v14, %v9158_v5 }
 0xe04   : > { %5678 = vmatprep.subr.bf16.mxu0 %v7692_v42 }
 0xe05   : > { %v4529_v45 = vmul.f32 %v4501_v15, %v4501_v15  ;;  %v4626_v51 = vmul.f32 0.7978846, %v4602_v60 }
 0xe07   : > { %5679 = vmatpush1.bf16.msra.mxu0 %v7690_v52  ;;  %v4553_v63 = vmul.f32 %v4529_v45, %v4501_v15  ;;  %7809 = vtanh.f32 %v4626_v51  ;;  %v5732_v52 = vrot.slane %v5723_v8, %v9158_v5  ;;  %v5857_v51 = vld [vmem:[%s10348_s22 + $0x80] sm:$0xff] (!%p6823_p12) }
 0xe08   : > { %5680 = vmatprep.subr.bf16.mxu0 %v7695_v38 }
 0xe09   : > { %v4577_v50 = vmul.f32 0.044715, %v4553_v63 }
 0xe0b   : > { %5681 = vmatpush1.bf16.msra.mxu0 %v7693_v37  ;;  %v4601_v56 = vadd.f32 %v4577_v50, %v4501_v15 }
 0xe0c   : > { %5682 = vmatprep.subr.bf16.mxu0 %v7698_v28 }
 0xe0d   : > { %v4625_v21 = vmul.f32 0.7978846, %v4601_v56  ;;  %v5842_v56 = vld [vmem:[%s10348_s22 + $0x8] sm:$0xff] (!%p6823_p12) }
 0xe0f   : > { %5683 = vmatpush1.bf16.msra.mxu0 %v7696_v55  ;;  %7811 = vtanh.f32 %v4625_v21 }
 0xe10   : > { %5684 = vmatprep.subr.bf16.mxu0 %v7701_v23 }
 0xe11   : > { %v7810_v26 = vpop.eup %7809 }
 0xe12   : > { %v4674_v11 = vadd.f32 1.0, %v7810_v26  ;;  %v5862_v26 = vld [vmem:[%s10348_s22 + $0xa8] sm:$0xff] (!%p6823_p12) }
 0xe13   : > { %5685 = vmatpush1.bf16.msra.mxu0 %v7699_v44 }
 0xe14   : > { %5686 = vmatprep.subr.bf16.mxu0 %v7704_v9  ;;  %v4698_v34 = vmul.f32 0.5, %v4674_v11  ;;  %v5845_v11 = vld [vmem:[%s10348_s22 + $0x20] sm:$0xff] (!%p6823_p12) }
 0xe16   : > { %v4722_v48 = vmul.f32 %v4698_v34, %v9989_v29 }
 0xe17   : > { %5687 = vmatpush1.bf16.msra.mxu0 %v7702_v43 }
 0xe18   : > { %5688 = vmatprep.subr.bf16.mxu0 %v7707_v18  ;;  %v4738_v49 = vpack.c.bf16 %v4722_v48, %v4722_v48 }
 0xe19   : > { %v7812_v4 = vpop.eup %7811 }
 0xe1a   : > { %v4673_v36 = vadd.f32 1.0, %v7812_v4 }
 0xe1b   : > { %5689 = vmatpush1.bf16.msra.mxu0 %v7705_v12 }
 0xe1c   : > { %5690 = vmatprep.subr.bf16.mxu0 %v7710_v31  ;;  %v4697_v0 = vmul.f32 0.5, %v4673_v36 }
 0xe1e   : > { %v4721_v41 = vmul.f32 %v4697_v0, %v4501_v15 }
 0xe1f   : > { %5691 = vmatpush1.bf16.msra.mxu0 %v7708_v20 }
 0xe20   : > { %5692 = vmatprep.subr.bf16.mxu0 %v7713_v54  ;;  %v4737_v6 = vpack.c.bf16 %v4721_v41, %v4721_v41 }
 0xe23   : > { %5693 = vmatpush1.bf16.msra.mxu0 %v7711_v3  ;;  %v5859_v3 = vld [vmem:[%s10348_s22 + $0x90] sm:$0xff] (!%p6823_p12) }
 0xe24   : > { %5694 = vmatprep.subr.bf16.mxu0 %v7716_v59  ;;  %v5860_v59 = vld [vmem:[%s10348_s22 + $0x98] sm:$0xff] (!%p6823_p12) }
 0xe27   : > { %5695 = vmatpush1.bf16.msra.mxu0 %v7714_v58  ;;  %v6927_v58 = vpack.c.bf16 (!%p6823_p12), %v5860_v59, %v5859_v3  ;;  %v5856_v3 = vld [vmem:[%s10348_s22 + $0x78] sm:$0xff] (!%p6823_p12) }
 0xe28   : > { %5696 = vmatprep.subr.bf16.mxu0 %v7719_v10  ;;  %v5843_v10 = vld [vmem:[%s10348_s22 + $0x10] sm:$0xff] (!%p6823_p12) }
 0xe2b   : > { %5697 = vmatpush1.bf16.msra.mxu0 %v7717_v35  ;;  %v5844_v35 = vld [vmem:[%s10348_s22 + $0x18] sm:$0xff] (!%p6823_p12) }
 0xe2c   : > { %5698 = vmatprep.subr.bf16.mxu0 %v7722_v40  ;;  %v5861_v40 = vld [vmem:[%s10348_s22 + $0xa0] sm:$0xff] (!%p6823_p12) }
 0xe2f   : > { %5699 = vmatpush1.bf16.msra.mxu0 %v7720_v16  ;;  %v6929_v16 = vpack.c.bf16 (!%p6823_p12), %v5844_v35, %v5843_v10 }
 0xe30   : > { %5700 = vmatprep.subr.bf16.mxu0 %v7725_v22  ;;  %v6931_v22 = vpack.c.bf16 (!%p6823_p12), %v5862_v26, %v5861_v40 }
 0xe33   : > { %5701 = vmatpush1.bf16.msra.mxu0 %v7723_v53  ;;  %v5846_v53 = vld [vmem:[%s10348_s22 + $0x28] sm:$0xff] (!%p6823_p12) }
 0xe34   : > { %5702 = vmatprep.subr.bf16.mxu0 %v7728_v39  ;;  %v6933_v39 = vpack.c.bf16 (!%p6823_p12), %v5846_v53, %v5845_v11  ;;  %v5757_v53 = vld [vmem:[#allocation16] sm:$0x3] (!%p6823_p12) }
 0xe37   : > { %5703 = vmatpush1.bf16.msra.mxu0 %v7726_v2 }
 0xe3a   : > { %5705 = vmatmul.mubr.bf16.vlgmr.msra.gmra.mrb[24].mxu0 %v4729_v57 }
 0xe3b   : > { %5714 = vmatprep.mubr.bf16.mxu0 %v4738_v49 }
 0xe42   : > { %5715 = vmatmul.mubr.bf16.gmra.mrb[28].mxu0 %v4737_v6 }
 0xf0d   : > { %v5706_v42 = vpop.f32.mrb[24].mxu0 }
 0xf0e   : > { %v7005_v38 = vadd.f32 %v5706_v42, %v4872_v25  ;;  %v5708_v62 = vpop.f32.mrb[25].mxu0 }
 0xf0f   : > { %v7006_v1 = vadd.f32 %v5708_v62, %v4876_v17  ;;  %v5710_v57 = vpop.f32.mrb[26].mxu0 }
 0xf10   : > { %v5735_v37 = vmul.f32 %v7005_v38, %v5728_v30  ;;  %v7007_v29 = vadd.f32 %v5710_v57, %v4872_v25  ;;  %v5712_v28 = vpop.f32.mrb[27].mxu0 }
 0xf11   : > { %v5736_v55 = vmul.f32 %v7006_v1, %v5732_v52  ;;  %v7008_v13 = vadd.f32 %v5712_v28, %v4876_v17  ;;  %v5864_v28 = vld [vmem:[%s10348_s22 + $0xb8] sm:$0xff] (!%p6823_p12) }
 0xf12   : > { %v10032_v23 = vadd.f32 %v5735_v37, %v9394_v24  ;;  %v5737_v15 = vmul.f32 %v7007_v29, %v5728_v30  ;;  %v5863_v29 = vld [vmem:[%s10348_s22 + $0xb0] sm:$0xff] (!%p6823_p12) }
 0xf13   : > { %v10035_v44 = vadd.f32 %v5736_v55, %v9396_v27  ;;  %v5738_v19 = vmul.f32 %v7008_v13, %v5732_v52  ;;  %v6935_v55 = vpack.c.bf16 (!%p6823_p12), %v5864_v28, %v5863_v29  ;;  %v5847_v13 = vld [vmem:[%s10348_s22 + $0x30] sm:$0xff] (!%p6823_p12) }
 0xf14   : > { %5747 = vst [vmem:[#allocation2] sm:$0xff] %v10032_v23  ;;  %v5743_v9 = vadd.f32 %v5737_v15, %v9398_v32 }
 0xf15   : > { %5748 = vst [vmem:[#allocation2 + $0x8] sm:$0xff] %v10035_v44  ;;  %v5744_v45 = vadd.f32 %v5738_v19, %v9400_v33  ;;  %v5716_v43 = vpop.f32.mrb[28].mxu0  ;;  %v5759_v20 = vadd.f32 (!%p6823_p12), %v10035_v44, %v10032_v23  ;;  %v5866_v19 = vld [vmem:[%s10348_s22 + $0xc8] sm:$0xff] (!%p6823_p12) }
 0xf16   : > { %5749 = vst [vmem:[#allocation2 + $0x10] sm:$0xff] %v5743_v9  ;;  %v7009_v61 = vadd.f32 %v5716_v43, %v4872_v25  ;;  %v5718_v18 = vpop.f32.mrb[29].mxu0  ;;  %v5850_v43 = vld [vmem:[%s10348_s22 + $0x48] sm:$0xff] (!%p6823_p12) }
 0xf17   : > { %5750 = vst [vmem:[#allocation2 + $0x18] sm:$0xff] %v5744_v45  ;;  %v7010_v24 = vadd.f32 %v5718_v18, %v4876_v17  ;;  %v5720_v63 = vpop.f32.mrb[30].mxu0  ;;  %5756 = sbr.rel (%p6823_p12) target bundleno = 4402 (0x1132), region = 156  ;;  %v5762_v32 = vadd.f32 (!%p6823_p12), %v5744_v45, %v5743_v9  ;;  %v5867_v18 = vld [vmem:[%s10348_s22 + $0xd0] sm:$0xff] (!%p6823_p12) }
 0xf18   : > { %v5739_v12 = vmul.f32 %v7009_v61, %v5728_v30  ;;  %v5721_v60 = vpop.f32.mrb[31].mxu0 }
 0xf19   : > { %v5740_v27 = vmul.f32 %v7010_v24, %v5732_v52  ;;  %5763 = vadd.xlane.f32.xlu0 (!%p6823_p12), %v5762_v32  ;;  %v5868_v24 = vld [vmem:[%s10348_s22 + $0xd8] sm:$0xff] (!%p6823_p12)  ;;  %v5853_v32 = vld [vmem:[%s10348_s22 + $0x60] sm:$0xff] (!%p6823_p12) }
 0xf1a   : > { %v5745_v31 = vadd.f32 %v5739_v12, %v9406_v46  ;;  %v5858_v46 = vld [vmem:[%s10348_s22 + $0x88] sm:$0xff] (!%p6823_p12)  ;;  %v6943_v63 = vpack.c.bf16 (!%p6823_p12), %v5868_v24, %v5867_v18  ;;  %v5851_v12 = vld [vmem:[%s10348_s22 + $0x50] sm:$0xff] (!%p6823_p12)  ;;  %v5852_v60 = vld [vmem:[%s10348_s22 + $0x58] sm:$0xff] (!%p6823_p12) }
 0xf1b   : > { %v5746_v50 = vadd.f32 %v5740_v27, %v9408_v47  ;;  %v5841_v47 = vld [vmem:[%s10348_s22] sm:$0xff] (!%p6823_p12)  ;;  %v6923_v54 = vpack.c.bf16 (!%p6823_p12), %v5858_v46, %v5857_v51  ;;  %v5871_v51 = vld [vmem:[%s10348_s22 + $0xf0] sm:$0xff] (!%p6823_p12)  ;;  %v5872_v46 = vld [vmem:[%s10348_s22 + $0xf8] sm:$0xff] (!%p6823_p12) }
 0xf1c   : > { %5751 = vst [vmem:[#allocation2 + $0x20] sm:$0xff] %v5745_v31  ;;  %v6925_v21 = vpack.c.bf16 (!%p6823_p12), %v5842_v56, %v5841_v47  ;;  %v5869_v27 = vld [vmem:[%s10348_s22 + $0xe0] sm:$0xff] (!%p6823_p12)  ;;  %v5855_v56 = vld [vmem:[%s10348_s22 + $0x70] sm:$0xff] (!%p6823_p12) }
 0xf1d   : > { %5752 = vst [vmem:[#allocation2 + $0x28] sm:$0xff] %v5746_v50  ;;  %v5765_v33 = vadd.f32 (!%p6823_p12), %v5746_v50, %v5745_v31  ;;  %5760 = vadd.xlane.f32.xlu0 (!%p6823_p12), %v5759_v20  ;;  %7035 = vmatprep.subr.bf16.mxu1 (!%p6823_p12), %v6923_v54  ;;  %v6953_v59 = vpack.c.bf16 (!%p6823_p12), %v5856_v3, %v5855_v56 }
 0xf1e   : > { %6924 = vmatprep.subr.bf16.mxu0 %v6923_v54  ;;  %7043 = vmatpush3.bf16.msra.mxu1 %v6925_v21  ;;  %v6951_v54 = vpack.c.bf16 %v5872_v46, %v5871_v51 }
 0xf1f   : > { %5766 = vadd.xlane.f32.xlu1 %v5765_v33  ;;  %6926 = vmatpush3.bf16.msra.mxu0 %v6925_v21  ;;  %v5854_v33 = vld [vmem:[%s10348_s22 + $0x68] sm:$0xff] }
 0xf20   : > { %7036 = vmatprep.subr.bf16.mxu1 %v6927_v58  ;;  %6928 = vmatprep.subr.bf16.mxu0 %v6927_v58  ;;  %v6949_v47 = vpack.c.bf16 %v5854_v33, %v5853_v32 }
 0xf22   : > { %7044 = vmatpush3.bf16.msra.mxu1 %v6929_v16 }
 0xf23   : > { %6930 = vmatpush3.bf16.msra.mxu0 %v6929_v16  ;;  %7037 = vmatprep.subr.bf16.mxu1 %v6931_v22 }
 0xf24   : > { %6932 = vmatprep.subr.bf16.mxu0 %v6931_v22 }
 0xf26   : > { %7045 = vmatpush3.bf16.msra.mxu1 %v6933_v39 }
 0xf27   : > { %6934 = vmatpush3.bf16.msra.mxu0 %v6933_v39  ;;  %7038 = vmatprep.subr.bf16.mxu1 %v6935_v55  ;;  %v5758_v39 = vld [vmem:[#allocation17] sm:$0x3] }
 0xf28   : > { %6936 = vmatprep.subr.bf16.mxu0 %v6935_v55 }
 0xfa6   : > { %v5764_v4 = vpop.xlane.xlu0 %5763 }
 0xfa7   : > { %v5769_v2 = vmul.f32 0.00390625, %v5764_v4  ;;  %v5811_v4 = vrot.slane %v5757_v53, %v9166_v7 }
 0xfa9   : > { %v10082_v48 = vsub.f32 %v5743_v9, %v5769_v2  ;;  %v10084_v0 = vsub.f32 %v5744_v45, %v5769_v2  ;;  %v5849_v45 = vld [vmem:[%s10348_s22 + $0x40] sm:$0xff] }
 0xfaa   : > { %v5761_v6 = vpop.xlane.xlu0 %5760  ;;  %v6941_v61 = vpack.c.bf16 %v5850_v43, %v5849_v45 }
 0xfab   : > { %v5768_v14 = vmul.f32 0.00390625, %v5761_v6  ;;  %v5779_v8 = vmul.f32 %v10082_v48, %v10082_v48  ;;  %v5780_v25 = vmul.f32 %v10084_v0, %v10084_v0  ;;  %v5828_v6 = vrot.slane %v5758_v39, %v9166_v7 }
 0xfac   : > { %v5767_v34 = vpop.xlane.xlu1 %5766 }
 0xfad   : > { %v5770_v36 = vmul.f32 0.00390625, %v5767_v34  ;;  %v10099_v42 = vsub.f32 %v10032_v23, %v5768_v14  ;;  %v10102_v52 = vsub.f32 %v10035_v44, %v5768_v14  ;;  %v5786_v38 = vadd.f32 %v5780_v25, %v5779_v8  ;;  %v5848_v23 = vld [vmem:[%s10348_s22 + $0x38] sm:$0xff]  ;;  %v5865_v44 = vld [vmem:[%s10348_s22 + $0xc0] sm:$0xff] }
 0xfae   : > { %v6937_v15 = vpack.c.bf16 %v5848_v23, %v5847_v13  ;;  %v6939_v9 = vpack.c.bf16 %v5866_v19, %v5865_v44  ;;  %v5815_v34 = vrot.slane %v5757_v53, %v9158_v5  ;;  %v5832_v14 = vrot.slane %v5758_v39, %v9158_v5 }
 0xfaf   : > { %v10086_v49 = vsub.f32 %v5745_v31, %v5770_v36  ;;  %v10088_v41 = vsub.f32 %v5746_v50, %v5770_v36  ;;  %5787 = vadd.xlane.f32.xlu1 %v5786_v38  ;;  %v5777_v1 = vmul.f32 %v10099_v42, %v10099_v42  ;;  %v5778_v57 = vmul.f32 %v10102_v52, %v10102_v52  ;;  %v5870_v50 = vld [vmem:[%s10348_s22 + $0xe8] sm:$0xff] }
 0xfb0   : > { %7046 = vmatpush3.bf16.msra.mxu1 %v6937_v15  ;;  %6938 = vmatpush3.bf16.msra.mxu0 %v6937_v15  ;;  %v6945_v31 = vpack.c.bf16 %v5852_v60, %v5851_v12  ;;  %v6947_v20 = vpack.c.bf16 %v5870_v50, %v5869_v27 }
 0xfb1   : > { %v5781_v17 = vmul.f32 %v10086_v49, %v10086_v49  ;;  %v5782_v30 = vmul.f32 %v10088_v41, %v10088_v41  ;;  %v5783_v37 = vadd.f32 %v5778_v57, %v5777_v1  ;;  %7039 = vmatprep.subr.bf16.mxu1 %v6939_v9  ;;  %6940 = vmatprep.subr.bf16.mxu0 %v6939_v9 }
 0xfb3   : > { %v5789_v62 = vadd.f32 %v5782_v30, %v5781_v17  ;;  %5784 = vadd.xlane.f32.xlu0 %v5783_v37 }
 0xfb4   : > { %7047 = vmatpush3.bf16.msra.mxu1 %v6941_v61  ;;  %6942 = vmatpush3.bf16.msra.mxu0 %v6941_v61 }
 0xfb5   : > { %5790 = vadd.xlane.f32.xlu1 %v5789_v62  ;;  %7040 = vmatprep.subr.bf16.mxu1 %v6943_v63 }
 0xfb6   : > { %6944 = vmatprep.subr.bf16.mxu0 %v6943_v63 }
 0xfb8   : > { %7048 = vmatpush3.bf16.msra.mxu1 %v6945_v31  ;;  %6946 = vmatpush3.bf16.msra.mxu0 %v6945_v31 }
 0xfb9   : > { %7041 = vmatprep.subr.bf16.mxu1 %v6947_v20  ;;  %6948 = vmatprep.subr.bf16.mxu0 %v6947_v20 }
 0xfbc   : > { %7049 = vmatpush3.bf16.msra.mxu1 %v6949_v47  ;;  %6950 = vmatpush3.bf16.msra.mxu0 %v6949_v47 }
 0xfbd   : > { %7042 = vmatprep.subr.bf16.mxu1 %v6951_v54  ;;  %6952 = vmatprep.subr.bf16.mxu0 %v6951_v54 }
 0xfc0   : > { %7050 = vmatpush3.bf16.msra.mxu1 %v6953_v59  ;;  %6954 = vmatpush3.bf16.msra.mxu0 %v6953_v59 }
0x103c   : > { %v5788_v21 = vpop.xlane.xlu1 %5787 }
0x103d   : > { %v5793_v58 = vmul.f32 0.00390625, %v5788_v21 }
0x103f   : > { %v5796_v10 = vadd.f32 1e-06, %v5793_v58 }
0x1040   : > { %v5785_v40 = vpop.xlane.xlu0 %5784 }
0x1041   : > { %7819 = vrsqrt.f32 %v5796_v10  ;;  %v5792_v16 = vmul.f32 0.00390625, %v5785_v40 }
0x1042   : > { %v5791_v35 = vpop.xlane.xlu1 %5790 }
0x1043   : > { %v5794_v26 = vmul.f32 0.00390625, %v5791_v35  ;;  %v5795_v11 = vadd.f32 1e-06, %v5792_v16 }
0x1045   : > { %v5797_v22 = vadd.f32 1e-06, %v5794_v26 }
0x1047   : > { %7821 = vrsqrt.f32 %v5797_v22 }
0x1048   : > { %7823 = vrsqrt.f32 %v5795_v11 }
0x104b   : > { %v7820_v2 = vpop.eup %7819 }
0x104c   : > { %v5804_v36 = vmul.f32 %v7820_v2, %v10084_v0  ;;  %v5803_v8 = vmul.f32 %v7820_v2, %v10082_v48 }
0x104e   : > { %v5821_v25 = vmul.f32 %v5815_v34, %v5804_v36  ;;  %v5820_v17 = vmul.f32 %v5811_v4, %v5803_v8 }
0x1050   : > { %v5838_v62 = vadd.f32 %v5832_v14, %v5821_v25  ;;  %v5837_v1 = vadd.f32 %v5828_v6, %v5820_v17 }
0x1051   : > { %v7822_v30 = vpop.eup %7821 }
0x1052   : > { %v7824_v38 = vpop.eup %7823  ;;  %v5806_v57 = vmul.f32 %v7822_v30, %v10088_v41  ;;  %v5805_v37 = vmul.f32 %v7822_v30, %v10086_v49  ;;  %5942 = vmatprep.mubr.f32.mxu1 %v5838_v62 }
0x1053   : > { %v5802_v29 = vmul.f32 %v7824_v38, %v10102_v52  ;;  %v5801_v0 = vmul.f32 %v7824_v38, %v10099_v42  ;;  %5943 = vmatmul.mubr.f32.vlgmr.msra.gmra.mrb[0].mxu1 %v5837_v1 }
0x1054   : > { %v5823_v7 = vmul.f32 %v5815_v34, %v5806_v57  ;;  %v5822_v5 = vmul.f32 %v5811_v4, %v5805_v37 }
0x1055   : > { %v5819_v48 = vmul.f32 %v5815_v34, %v5802_v29  ;;  %v5818_v28 = vmul.f32 %v5811_v4, %v5801_v0 }
0x1056   : > { %v5840_v55 = vadd.f32 %v5832_v14, %v5823_v7  ;;  %v5839_v13 = vadd.f32 %v5828_v6, %v5822_v5 }
0x1057   : > { %v5836_v23 = vadd.f32 %v5832_v14, %v5819_v48  ;;  %v5835_v15 = vadd.f32 %v5828_v6, %v5818_v28 }
0x1058   : > { %5947 = vmatprep.mubr.f32.mxu1 %v5840_v55 }
0x1059   : > { %5937 = vmatprep.mubr.f32.mxu0 %v5836_v23  ;;  %5948 = vmatmul.mubr.f32.gmra.mrb[2].mxu1 %v5839_v13 }
0x105a   : > { %5938 = vmatmul.mubr.f32.vlgmr.msra.gmra.mrb[0].mxu0 %v5835_v15 }
0x1126   : > { %v6885_v49 = vpop.f32.mrb[0].mxu1 }
0x1127   : > { %v6886_v41 = vpop.f32.mrb[1].mxu1 }
0x1128   : > { %v6887_v42 = vadd.f32 %v6886_v41, %v6885_v49 }
0x112a   : > { %5954 = vst [vmem:[%s8784_s10 + $0x8] sm:$0xff] %v6887_v42 }
0x112c   : > { %v6888_v52 = vpop.f32.mrb[2].mxu1 }
0x112d   : > { %v6882_v44 = vpop.f32.mrb[0].mxu0  ;;  %v6889_v19 = vpop.f32.mrb[3].mxu1 }
0x112e   : > { %v6883_v9 = vpop.f32.mrb[1].mxu0  ;;  %v6890_v45 = vadd.f32 %v6889_v19, %v6888_v52 }
0x112f   : > { %v6884_v43 = vadd.f32 %v6883_v9, %v6882_v44 }
0x1130   : > { %5955 = vst [vmem:[%s8784_s10 + $0x10] sm:$0xff] %v6890_v45 }
0x1131   : > { %5953 = vst [vmem:[%s8784_s10] sm:$0xff] %v6884_v43 }
0x1132 PF: > { %s44_s1 = sadd.s32 1, %s8205_s1   ;;  %s10349_s12 = sld [smem:[#allocation26_spill]] }
0x1133   : > { %p41_p10 = scmp.ge.s32.totalorder %s44_s1, 6   ;;  %s10350_s29 = sld [smem:[#allocation33_spill]] }
0x1134   : > { %s10351_s30 = sld [smem:[#allocation29_spill]]  ;;  %s10352_s4 = sld [smem:[#allocation30_spill]] }
0x1135   : > { %s10353_s0 = sld [smem:[#allocation31_spill]]  ;;  %s10354_s23 = sld [smem:[#allocation32_spill]] }
0x1136   : > { %s10355_s3 = smov %s8181_s28  ;;  %43 = sbr.rel (!%p41_p10) target bundleno = 35 (0x23), region = 255 }
0x1138   : > { %s10356_s28 = smov %s10349_s12 }
0x113d   :  { %5977 = vsyncpa [#allocation4], 1 }
0x113e   :  { %5979 = vsyncpa [#allocation4 + $0x1], 1 }
0x113f   :  { %5980 = vsyncpa [#allocation6], 1 }
0x1140   :  { %5981 = vsyncpa [#allocation9], 1 }
0x1141   :  { %5983 = vsyncpa [#allocation9 + $0x1], 1 }
0x1142   :  { %5984 = vsyncpa [#allocation12], 1 }
0x1143   :  { %5986 = vsyncpa [#allocation12 + $0x1], 1 }
0x1144   :  { %5987 = vsyncpa [#allocation15], 1 }
0x1145   :  { %5989 = vsyncpa [#allocation15 + $0x1], 1 }
0x1146   :  { %5990 = vsyncpa [#allocation18], 1 }

</bundles_post_ra>
